<compile_context>
chip_gen: v5e
topology: v5e:2x2
jax: 0.10.0
libtpu: 0.0.40
codegen_flags: <defaults>
</compile_context>

<pallas_src>
import jax
import jax.numpy as jnp
import numpy as np
from jax.experimental import pallas as pl
from jax.experimental.pallas import tpu as pltpu


def _pick_batch_block(B):
    """Largest divisor of B that is <= 4 (2*Bb map rows fill <= 8 sublanes)."""
    for bb in (4, 3, 2, 1):
        if B % bb == 0:
            return bb
    return 1


def _make_cbam_kernel(H, W, K, HW, HWp, Bb):
    """Builds the CBAM kernel closed over the static geometry.

    HW  = H*W (true spatial length), HWp = HW rounded up to a multiple of 128.
    """
    pad = (K - 1) // 2
    PAD = pad * W + pad                    # furthest flat conv-tap shift
    PAD_A = ((PAD + 127) // 128) * 128     # lane-aligned left zero border
    HWP = PAD_A + HWp + PAD                # total flat scratch length
    R = 2 * Bb                             # scratch rows: [mean_0..  , max_0.. ]

    def kernel(x_ref, w1_ref, w2_ref, wk_ref, out_ref, scr_ref):
        # x_ref  : (Bb, C, HWp) VMEM, lane-dense, zero-padded past HW
        # w1_ref : (Cr, C)      ChannelAttention.fc1 (1x1 conv, no bias)
        # w2_ref : (C, Cr)      ChannelAttention.fc2 (1x1 conv, no bias)
        # wk_ref : (2*Bb, K*K)  SpatialAttention conv weight (rows repeated per image)
        # out_ref: (Bb, C, HWp)
        # scr_ref: (2*Bb, HWP)  flat zero-bordered [mean | max] maps
        f32 = jnp.float32
        w1 = w1_ref[...].astype(f32)                       # (Cr, C)
        w2 = w2_ref[...].astype(f32)                       # (C, Cr)
        wk = wk_ref[...].astype(f32)                       # (2*Bb, K*K) hoisted once

        lane = jax.lax.broadcasted_iota(jnp.int32, (1, HWp), 1)
        col = lane % W                                      # column of each flat pos

        # ---------------- Channel attention (batched over Bb images) ------------
        avg_cols, max_cols = [], []
        for b in range(Bb):
            xb = x_ref[b].astype(f32)                                   # (C, HWp)
            avg_cols.append(jnp.sum(xb, axis=1, keepdims=True) * (1.0 / HW))
            if HWp == HW:
                max_cols.append(jnp.max(xb, axis=1, keepdims=True))
            else:
                # padded lanes hold 0 (from the wrapper) -> exclude from the max
                max_cols.append(jnp.max(jnp.where(lane < HW, xb, -jnp.inf),
                                        axis=1, keepdims=True))
        pooled = jnp.concatenate(avg_cols + max_cols, axis=1)           # (C, 2*Bb)
        h = jnp.maximum(jnp.dot(w1, pooled, preferred_element_type=f32), 0.0)
        # fc2 is linear: fc2(relu(fc1(avg))) + fc2(relu(fc1(max))) == fc2(h_avg+h_max)
        hsum = h[:, :Bb] + h[:, Bb:]                                     # (Cr, Bb)
        ca = jax.nn.sigmoid(jnp.dot(w2, hsum, preferred_element_type=f32))  # (C, Bb)

        # ---------------- Spatial attention: channel-wise mean/max maps ---------
        # Zero only the borders; the interior is fully overwritten just below.
        scr_ref[:, :PAD_A] = jnp.zeros((R, PAD_A), f32)
        scr_ref[:, PAD_A + HWp:] = jnp.zeros((R, HWP - PAD_A - HWp), f32)

        mean_rows, max_rows = [], []
        for b in range(Bb):
            x1 = x_ref[b].astype(f32) * ca[:, b:b + 1]                   # (C, HWp)
            mean_rows.append(jnp.mean(x1, axis=0, keepdims=True))        # (1, HWp)
            max_rows.append(jnp.max(x1, axis=0, keepdims=True))          # (1, HWp)
        maps = jnp.concatenate(mean_rows + max_rows, axis=0)             # (2*Bb, HWp)
        scr_ref[:, PAD_A:PAD_A + HWp] = maps     # lane-aligned, unmasked store

        # ------- KxK conv (2 -> 1, padding=pad, no bias) over the flat maps -----
        # One lane-dense load per vertical offset; horizontal taps are XLU rolls.
        # Roll wrap-around and flat row-wrap are both killed by the column mask;
        # vertical out-of-range taps land in the zeroed borders / padded lanes.
        bases = [scr_ref[:, PAD_A + (i - pad) * W: PAD_A + (i - pad) * W + HWp]
                 for i in range(K)]                                       # K x (R, HWp)
        acc = jnp.zeros((R, HWp), f32)
        for j in range(K):
            dj = j - pad
            acc_j = jnp.zeros((R, HWp), f32)
            for i in range(K):
                tap = bases[i] if dj == 0 else pltpu.roll(
                    bases[i], shift=(-dj) % HWp, axis=1)
                acc_j = acc_j + wk[:, i * K + j: i * K + j + 1] * tap
            if dj == 0:
                acc = acc + acc_j
            else:
                cm = ((col + dj >= 0) & (col + dj < W)).astype(f32)       # (1, HWp)
                acc = acc + acc_j * cm

        # ---------------- Apply both attentions and store -----------------------
        for b in range(Bb):
            sa = jax.nn.sigmoid(acc[b:b + 1] + acc[Bb + b:Bb + b + 1])    # (1, HWp)
            xb = x_ref[b].astype(f32)
            out_ref[b] = (xb * ca[:, b:b + 1] * sa).astype(out_ref.dtype)

    return kernel, HWP


@jax.jit
def cbam_forward(x, w1, w2, wk):
    """x: (B, C, H, W); w1: (C//r, C); w2: (C, C//r); wk: (1, 2, K, K)."""
    B, C, H, W = x.shape
    Cr = w1.shape[0]
    K = wk.shape[-1]
    HW = H * W
    HWp = ((HW + 127) // 128) * 128        # lane-dense flat spatial length
    Bb = _pick_batch_block(B)

    kernel, HWP = _make_cbam_kernel(H, W, K, HW, HWp, Bb)

    # Lane-dense layout: flatten spatial dims and zero-pad to a multiple of 128.
    x_flat = x.reshape(B, C, HW)
    if HWp != HW:
        x_flat = jnp.pad(x_flat, ((0, 0), (0, 0), (0, HWp - HW)))

    # Conv weight rows repeated per image in the batch block:
    # rows [0, Bb) multiply the channel-mean maps, rows [Bb, 2Bb) the max maps.
    wk_big = jnp.repeat(wk.reshape(2, K * K).astype(jnp.float32), Bb, axis=0)

    dsize = x.dtype.itemsize
    block_bytes = Bb * C * HWp * dsize
    scratch_bytes = 2 * Bb * HWP * 4
    # Double-buffered in+out blocks + conv scratch + headroom, clamped so it
    # stays under v7x's 64 MiB physical VMEM.
    vmem_limit = min(64 << 20, max(16 << 20, 4 * block_bytes + scratch_bytes + (8 << 20)))

    out_flat = pl.pallas_call(
        kernel,
        out_shape=jax.ShapeDtypeStruct((B, C, HWp), x.dtype),
        grid_spec=pltpu.PrefetchScalarGridSpec(
            num_scalar_prefetch=0,
            grid=(B // Bb,),
            in_specs=[
                pl.BlockSpec((Bb, C, HWp), lambda b: (b, 0, 0)),
                pl.BlockSpec((Cr, C), lambda b: (0, 0)),
                pl.BlockSpec((C, Cr), lambda b: (0, 0)),
                pl.BlockSpec((2 * Bb, K * K), lambda b: (0, 0)),
            ],
            out_specs=pl.BlockSpec((Bb, C, HWp), lambda b: (b, 0, 0)),
            scratch_shapes=[pltpu.VMEM((2 * Bb, HWP), jnp.float32)],
        ),
        # Batch blocks are independent -> let v7x's two TensorCores split them.
        compiler_params=pltpu.CompilerParams(
            dimension_semantics=("parallel",),
            vmem_limit_bytes=vmem_limit),
    )(x_flat, w1, w2, wk_big)

    return out_flat[:, :, :HW].reshape(B, C, H, W)


def cbam_reference(x, w1, w2, wk):
    """Pure-JAX reference mirroring the PyTorch forward (for verification)."""
    K = wk.shape[-1]
    pad = (K - 1) // 2
    avg = jnp.mean(x, axis=(2, 3))                            # (B, C)
    mx = jnp.max(x, axis=(2, 3))                              # (B, C)

    def shared_mlp(v):
        return jnp.maximum(v @ w1.T, 0.0) @ w2.T              # (B, C)

    ca = jax.nn.sigmoid(shared_mlp(avg) + shared_mlp(mx))     # (B, C)
    x1 = x * ca[:, :, None, None]

    avg_c = jnp.mean(x1, axis=1, keepdims=True)
    max_c = jnp.max(x1, axis=1, keepdims=True)
    s = jnp.concatenate([avg_c, max_c], axis=1)               # (B, 2, H, W)
    sa = jax.lax.conv_general_dilated(
        s, wk, window_strides=(1, 1), padding=((pad, pad), (pad, pad)),
        dimension_numbers=("NCHW", "OIHW", "NCHW"))
    sa = jax.nn.sigmoid(sa)                                   # (B, 1, H, W)
    return x1 * sa


if __name__ == "__main__":
    B, C, H, W = 2, 32, 16, 16
    ratio, ksize = 8, 7
    Cr = C // ratio

    key = jax.random.PRNGKey(0)
    kx, k1, k2, k3 = jax.random.split(key, 4)
    x = jax.random.normal(kx, (B, C, H, W), jnp.float32)
    # deterministic synthetic parameters (same shapes as the nn.Module weights)
    w1 = 0.1 * jax.random.normal(k1, (Cr, C), jnp.float32)        # fc1: Conv2d(C, Cr, 1)
    w2 = 0.1 * jax.random.normal(k2, (C, Cr), jnp.float32)        # fc2: Conv2d(Cr, C, 1)
    wk = 0.1 * jax.random.normal(k3, (1, 2, ksize, ksize), jnp.float32)  # SA conv

    out = cbam_forward(x, w1, w2, wk)
    out = jax.block_until_ready(out)

    ref = cbam_reference(x, w1, w2, wk)
    np.testing.assert_allclose(np.asarray(out), np.asarray(ref),
                               atol=1e-4, rtol=1e-4)
    print("KERNEL_OK")
</pallas_src>

<mosaic_0001>
module attributes {stable_mosaic.version = 11 : i64} {
  func.func @kernel(%arg0: i32, %arg1: memref<2x32x256xf32, #tpu.memory_space<vmem>>, %arg2: memref<4x32xf32, #tpu.memory_space<vmem>>, %arg3: memref<32x4xf32, #tpu.memory_space<vmem>>, %arg4: memref<4x49xf32, #tpu.memory_space<vmem>>, %arg5: memref<2x32x256xf32, #tpu.memory_space<vmem>>, %arg6: memref<4x435xf32, #tpu.memory_space<vmem>>) attributes {dimension_semantics = [#tpu.dimension_semantics<parallel>], iteration_bounds = array<i64: 1>, scalar_prefetch = 0 : i64, scratch_operands = 1 : i64, tpu.core_type = #tpu.core_type<tc>, window_params = [{transform_indices = @transform_0, window_bounds = array<i64: 2, 32, 256>}, {pipeline_mode = #tpu.pipeline_mode<synchronous>, transform_indices = @transform_1, window_bounds = array<i64: 4, 32>}, {pipeline_mode = #tpu.pipeline_mode<synchronous>, transform_indices = @transform_2, window_bounds = array<i64: 32, 4>}, {pipeline_mode = #tpu.pipeline_mode<synchronous>, transform_indices = @transform_3, window_bounds = array<i64: 4, 49>}, {transform_indices = @transform_4, window_bounds = array<i64: 2, 32, 256>}]} {
    %c0 = arith.constant 0 : index
    %c0_0 = arith.constant 0 : index
    %0 = vector.load %arg2[%c0, %c0_0] : memref<4x32xf32, #tpu.memory_space<vmem>>, vector<4x32xf32>
    %c0_1 = arith.constant 0 : index
    %c0_2 = arith.constant 0 : index
    %1 = vector.load %arg3[%c0_1, %c0_2] : memref<32x4xf32, #tpu.memory_space<vmem>>, vector<32x4xf32>
    %c0_3 = arith.constant 0 : index
    %c0_4 = arith.constant 0 : index
    %2 = vector.load %arg4[%c0_3, %c0_4] : memref<4x49xf32, #tpu.memory_space<vmem>>, vector<4x49xf32>
    %3 = tpu.iota {dimensions = array<i32: 1>} : vector<1x256xi32>
    %c16_i32 = arith.constant 16 : i32
    %c0_i32 = arith.constant 0 : i32
    %4 = arith.cmpi eq, %c16_i32, %c0_i32 : i32
    %c1_i32 = arith.constant 1 : i32
    %5 = arith.select %4, %c1_i32, %c16_i32 : i32
    %6 = vector.broadcast %5 : i32 to vector<1x256xi32>
    %7 = arith.remsi %3, %6 : vector<1x256xi32>
    %c0_i32_5 = arith.constant 0 : i32
    %8 = vector.broadcast %c0_i32_5 : i32 to vector<1x256xi32>
    %9 = arith.cmpi ne, %7, %8 : vector<1x256xi32>
    %c0_i32_6 = arith.constant 0 : i32
    %10 = vector.broadcast %c0_i32_6 : i32 to vector<1x256xi32>
    %11 = arith.cmpi slt, %7, %10 : vector<1x256xi32>
    %c0_i32_7 = arith.constant 0 : i32
    %12 = arith.cmpi slt, %5, %c0_i32_7 : i32
    %13 = vector.broadcast %12 : i1 to vector<1x256xi1>
    %14 = vector.broadcast %13 : vector<1x256xi1> to vector<1x256xi1>
    %15 = arith.xori %11, %14 : vector<1x256xi1>
    %16 = arith.andi %15, %9 : vector<1x256xi1>
    %17 = vector.broadcast %5 : i32 to vector<1x256xi32>
    %18 = arith.addi %7, %17 : vector<1x256xi32>
    %19 = arith.select %16, %18, %7 : vector<1x256xi1>, vector<1x256xi32>
    %c0_8 = arith.constant 0 : index
    %c0_9 = arith.constant 0 : index
    %c0_10 = arith.constant 0 : index
    %20 = vector.load %arg1[%c0_8, %c0_9, %c0_10] : memref<2x32x256xf32, #tpu.memory_space<vmem>>, vector<1x32x256xf32>
    %21 = vector.shape_cast %20 : vector<1x32x256xf32> to vector<32x256xf32>
    %cst = arith.constant dense<0.000000e+00> : vector<32xf32>
    %22 = vector.multi_reduction <add>, %21, %cst [1] : vector<32x256xf32> to vector<32xf32>
    %23 = vector.shape_cast %22 : vector<32xf32> to vector<32x1xf32>
    %cst_11 = arith.constant 3.906250e-03 : f32
    %24 = vector.broadcast %cst_11 : f32 to vector<32x1xf32>
    %25 = arith.mulf %23, %24 : vector<32x1xf32>
    %cst_12 = arith.constant dense<0xFF800000> : vector<32xf32>
    %26 = vector.multi_reduction <maximumf>, %21, %cst_12 [1] : vector<32x256xf32> to vector<32xf32>
    %27 = vector.shape_cast %26 : vector<32xf32> to vector<32x1xf32>
    %c1 = arith.constant 1 : index
    %c0_13 = arith.constant 0 : index
    %c0_14 = arith.constant 0 : index
    %28 = vector.load %arg1[%c1, %c0_13, %c0_14] : memref<2x32x256xf32, #tpu.memory_space<vmem>>, vector<1x32x256xf32>
    %29 = vector.shape_cast %28 : vector<1x32x256xf32> to vector<32x256xf32>
    %cst_15 = arith.constant dense<0.000000e+00> : vector<32xf32>
    %30 = vector.multi_reduction <add>, %29, %cst_15 [1] : vector<32x256xf32> to vector<32xf32>
    %31 = vector.shape_cast %30 : vector<32xf32> to vector<32x1xf32>
    %cst_16 = arith.constant 3.906250e-03 : f32
    %32 = vector.broadcast %cst_16 : f32 to vector<32x1xf32>
    %33 = arith.mulf %31, %32 : vector<32x1xf32>
    %cst_17 = arith.constant dense<0xFF800000> : vector<32xf32>
    %34 = vector.multi_reduction <maximumf>, %29, %cst_17 [1] : vector<32x256xf32> to vector<32xf32>
    %35 = vector.shape_cast %34 : vector<32xf32> to vector<32x1xf32>
    %36 = tpu.concatenate %25, %33, %27, %35 in 1 : vector<32x1xf32>, vector<32x1xf32>, vector<32x1xf32>, vector<32x1xf32> -> vector<32x4xf32>
    %cst_18 = arith.constant dense<0.000000e+00> : vector<4x4xf32>
    %37 = tpu.matmul %0, %36, %cst_18 {dimension_numbers = #tpu.dot_dimension_numbers<[1], [0], [0], [1], [0, 0, 1, 1], [], []>} : vector<4x32xf32>, vector<32x4xf32>, vector<4x4xf32> -> vector<4x4xf32>
    %cst_19 = arith.constant 0.000000e+00 : f32
    %38 = vector.broadcast %cst_19 : f32 to vector<4x4xf32>
    %39 = arith.maximumf %37, %38 : vector<4x4xf32>
    %40 = vector.extract_strided_slice %39 {offsets = [0, 0], sizes = [4, 2], strides = [1, 1]} : vector<4x4xf32> to vector<4x2xf32>
    %41 = vector.extract_strided_slice %39 {offsets = [0, 2], sizes = [4, 2], strides = [1, 1]} : vector<4x4xf32> to vector<4x2xf32>
    %42 = arith.addf %40, %41 : vector<4x2xf32>
    %cst_20 = arith.constant dense<0.000000e+00> : vector<32x2xf32>
    %43 = tpu.matmul %1, %42, %cst_20 {dimension_numbers = #tpu.dot_dimension_numbers<[1], [0], [0], [1], [0, 0, 1, 1], [], []>} : vector<32x4xf32>, vector<4x2xf32>, vector<32x2xf32> -> vector<32x2xf32>
    %44 = arith.negf %43 : vector<32x2xf32>
    %45 = math.exp %44 : vector<32x2xf32>
    %cst_21 = arith.constant 1.000000e+00 : f32
    %46 = vector.broadcast %cst_21 : f32 to vector<32x2xf32>
    %47 = arith.addf %46, %45 : vector<32x2xf32>
    %48 = arith.divf %46, %47 : vector<32x2xf32>
    %cst_22 = arith.constant 0.000000e+00 : f32
    %49 = vector.broadcast %cst_22 : f32 to vector<4x128xf32>
    %c0_23 = arith.constant 0 : index
    %c0_24 = arith.constant 0 : index
    %50 = vector.load %arg6[%c0_23, %c0_24] : memref<4x435xf32, #tpu.memory_space<vmem>>, vector<4x128xf32>
    tpu.vector_store %arg6[%c0_23, %c0_24], %49 {strides = array<i32>} : memref<4x435xf32, #tpu.memory_space<vmem>>, vector<4x128xf32>,
    %cst_25 = arith.constant 0.000000e+00 : f32
    %51 = vector.broadcast %cst_25 : f32 to vector<4x51xf32>
    %c0_26 = arith.constant 0 : index
    %c384 = arith.constant 384 : index
    %52 = vector.load %arg6[%c0_26, %c384] : memref<4x435xf32, #tpu.memory_space<vmem>>, vector<4x51xf32>
    tpu.vector_store %arg6[%c0_26, %c384], %51 {strides = array<i32>} : memref<4x435xf32, #tpu.memory_space<vmem>>, vector<4x51xf32>,
    %c0_27 = arith.constant 0 : index
    %c0_28 = arith.constant 0 : index
    %c0_29 = arith.constant 0 : index
    %53 = vector.load %arg1[%c0_27, %c0_28, %c0_29] : memref<2x32x256xf32, #tpu.memory_space<vmem>>, vector<1x32x256xf32>
    %54 = vector.shape_cast %53 : vector<1x32x256xf32> to vector<32x256xf32>
    %55 = vector.extract_strided_slice %48 {offsets = [0, 0], sizes = [32, 1], strides = [1, 1]} : vector<32x2xf32> to vector<32x1xf32>
    %56 = vector.broadcast %55 : vector<32x1xf32> to vector<32x256xf32>
    %57 = arith.mulf %54, %56 : vector<32x256xf32>
    %cst_30 = arith.constant dense<0.000000e+00> : vector<256xf32>
    %58 = vector.multi_reduction <add>, %57, %cst_30 [0] : vector<32x256xf32> to vector<256xf32>
    %59 = vector.shape_cast %58 : vector<256xf32> to vector<1x256xf32>
    %cst_31 = arith.constant 3.200000e+01 : f32
    %60 = vector.broadcast %cst_31 : f32 to vector<1x256xf32>
    %61 = arith.divf %59, %60 : vector<1x256xf32>
    %cst_32 = arith.constant dense<0xFF800000> : vector<256xf32>
    %62 = vector.multi_reduction <maximumf>, %57, %cst_32 [0] : vector<32x256xf32> to vector<256xf32>
    %63 = vector.shape_cast %62 : vector<256xf32> to vector<1x256xf32>
    %c1_33 = arith.constant 1 : index
    %c0_34 = arith.constant 0 : index
    %c0_35 = arith.constant 0 : index
    %64 = vector.load %arg1[%c1_33, %c0_34, %c0_35] : memref<2x32x256xf32, #tpu.memory_space<vmem>>, vector<1x32x256xf32>
    %65 = vector.shape_cast %64 : vector<1x32x256xf32> to vector<32x256xf32>
    %66 = vector.extract_strided_slice %48 {offsets = [0, 1], sizes = [32, 1], strides = [1, 1]} : vector<32x2xf32> to vector<32x1xf32>
    %67 = vector.broadcast %66 : vector<32x1xf32> to vector<32x256xf32>
    %68 = arith.mulf %65, %67 : vector<32x256xf32>
    %cst_36 = arith.constant dense<0.000000e+00> : vector<256xf32>
    %69 = vector.multi_reduction <add>, %68, %cst_36 [0] : vector<32x256xf32> to vector<256xf32>
    %70 = vector.shape_cast %69 : vector<256xf32> to vector<1x256xf32>
    %cst_37 = arith.constant 3.200000e+01 : f32
    %71 = vector.broadcast %cst_37 : f32 to vector<1x256xf32>
    %72 = arith.divf %70, %71 : vector<1x256xf32>
    %cst_38 = arith.constant dense<0xFF800000> : vector<256xf32>
    %73 = vector.multi_reduction <maximumf>, %68, %cst_38 [0] : vector<32x256xf32> to vector<256xf32>
    %74 = vector.shape_cast %73 : vector<256xf32> to vector<1x256xf32>
    %75 = tpu.concatenate %61, %72, %63, %74 in 0 : vector<1x256xf32>, vector<1x256xf32>, vector<1x256xf32>, vector<1x256xf32> -> vector<4x256xf32>
    %c0_39 = arith.constant 0 : index
    %c128 = arith.constant 128 : index
    %76 = vector.load %arg6[%c0_39, %c128] : memref<4x435xf32, #tpu.memory_space<vmem>>, vector<4x256xf32>
    tpu.vector_store %arg6[%c0_39, %c128], %75 {strides = array<i32>} : memref<4x435xf32, #tpu.memory_space<vmem>>, vector<4x256xf32>,
    %c0_40 = arith.constant 0 : index
    %c80 = arith.constant 80 : index
    %77 = vector.load %arg6[%c0_40, %c80] : memref<4x435xf32, #tpu.memory_space<vmem>>, vector<4x256xf32>
    %c0_41 = arith.constant 0 : index
    %c96 = arith.constant 96 : index
    %78 = vector.load %arg6[%c0_41, %c96] : memref<4x435xf32, #tpu.memory_space<vmem>>, vector<4x256xf32>
    %c0_42 = arith.constant 0 : index
    %c112 = arith.constant 112 : index
    %79 = vector.load %arg6[%c0_42, %c112] : memref<4x435xf32, #tpu.memory_space<vmem>>, vector<4x256xf32>
    %c0_43 = arith.constant 0 : index
    %c128_44 = arith.constant 128 : index
    %80 = vector.load %arg6[%c0_43, %c128_44] : memref<4x435xf32, #tpu.memory_space<vmem>>, vector<4x256xf32>
    %c0_45 = arith.constant 0 : index
    %c144 = arith.constant 144 : index
    %81 = vector.load %arg6[%c0_45, %c144] : memref<4x435xf32, #tpu.memory_space<vmem>>, vector<4x256xf32>
    %c0_46 = arith.constant 0 : index
    %c160 = arith.constant 160 : index
    %82 = vector.load %arg6[%c0_46, %c160] : memref<4x435xf32, #tpu.memory_space<vmem>>, vector<4x256xf32>
    %c0_47 = arith.constant 0 : index
    %c176 = arith.constant 176 : index
    %83 = vector.load %arg6[%c0_47, %c176] : memref<4x435xf32, #tpu.memory_space<vmem>>, vector<4x256xf32>
    %cst_48 = arith.constant 0.000000e+00 : f32
    %84 = vector.broadcast %cst_48 : f32 to vector<4x256xf32>
    %cst_49 = arith.constant 0.000000e+00 : f32
    %85 = vector.broadcast %cst_49 : f32 to vector<4x256xf32>
    %c3_i32 = arith.constant 3 : i32
    %86 = tpu.dynamic_rotate %77 by %c3_i32 dim 1 : vector<4x256xf32>, i32 -> vector<4x256xf32>
    %87 = vector.extract_strided_slice %2 {offsets = [0, 0], sizes = [4, 1], strides = [1, 1]} : vector<4x49xf32> to vector<4x1xf32>
    %88 = vector.broadcast %87 : vector<4x1xf32> to vector<4x256xf32>
    %89 = arith.mulf %88, %86 : vector<4x256xf32>
    %90 = arith.addf %85, %89 : vector<4x256xf32>
    %c3_i32_50 = arith.constant 3 : i32
    %91 = tpu.dynamic_rotate %78 by %c3_i32_50 dim 1 : vector<4x256xf32>, i32 -> vector<4x256xf32>
    %92 = vector.extract_strided_slice %2 {offsets = [0, 7], sizes = [4, 1], strides = [1, 1]} : vector<4x49xf32> to vector<4x1xf32>
    %93 = vector.broadcast %92 : vector<4x1xf32> to vector<4x256xf32>
    %94 = arith.mulf %93, %91 : vector<4x256xf32>
    %95 = arith.addf %90, %94 : vector<4x256xf32>
    %c3_i32_51 = arith.constant 3 : i32
    %96 = tpu.dynamic_rotate %79 by %c3_i32_51 dim 1 : vector<4x256xf32>, i32 -> vector<4x256xf32>
    %97 = vector.extract_strided_slice %2 {offsets = [0, 14], sizes = [4, 1], strides = [1, 1]} : vector<4x49xf32> to vector<4x1xf32>
    %98 = vector.broadcast %97 : vector<4x1xf32> to vector<4x256xf32>
    %99 = arith.mulf %98, %96 : vector<4x256xf32>
    %100 = arith.addf %95, %99 : vector<4x256xf32>
    %c3_i32_52 = arith.constant 3 : i32
    %101 = tpu.dynamic_rotate %80 by %c3_i32_52 dim 1 : vector<4x256xf32>, i32 -> vector<4x256xf32>
    %102 = vector.extract_strided_slice %2 {offsets = [0, 21], sizes = [4, 1], strides = [1, 1]} : vector<4x49xf32> to vector<4x1xf32>
    %103 = vector.broadcast %102 : vector<4x1xf32> to vector<4x256xf32>
    %104 = arith.mulf %103, %101 : vector<4x256xf32>
    %105 = arith.addf %100, %104 : vector<4x256xf32>
    %c3_i32_53 = arith.constant 3 : i32
    %106 = tpu.dynamic_rotate %81 by %c3_i32_53 dim 1 : vector<4x256xf32>, i32 -> vector<4x256xf32>
    %107 = vector.extract_strided_slice %2 {offsets = [0, 28], sizes = [4, 1], strides = [1, 1]} : vector<4x49xf32> to vector<4x1xf32>
    %108 = vector.broadcast %107 : vector<4x1xf32> to vector<4x256xf32>
    %109 = arith.mulf %108, %106 : vector<4x256xf32>
    %110 = arith.addf %105, %109 : vector<4x256xf32>
    %c3_i32_54 = arith.constant 3 : i32
    %111 = tpu.dynamic_rotate %82 by %c3_i32_54 dim 1 : vector<4x256xf32>, i32 -> vector<4x256xf32>
    %112 = vector.extract_strided_slice %2 {offsets = [0, 35], sizes = [4, 1], strides = [1, 1]} : vector<4x49xf32> to vector<4x1xf32>
    %113 = vector.broadcast %112 : vector<4x1xf32> to vector<4x256xf32>
    %114 = arith.mulf %113, %111 : vector<4x256xf32>
    %115 = arith.addf %110, %114 : vector<4x256xf32>
    %c3_i32_55 = arith.constant 3 : i32
    %116 = tpu.dynamic_rotate %83 by %c3_i32_55 dim 1 : vector<4x256xf32>, i32 -> vector<4x256xf32>
    %117 = vector.extract_strided_slice %2 {offsets = [0, 42], sizes = [4, 1], strides = [1, 1]} : vector<4x49xf32> to vector<4x1xf32>
    %118 = vector.broadcast %117 : vector<4x1xf32> to vector<4x256xf32>
    %119 = arith.mulf %118, %116 : vector<4x256xf32>
    %120 = arith.addf %115, %119 : vector<4x256xf32>
    %c-3_i32 = arith.constant -3 : i32
    %121 = vector.broadcast %c-3_i32 : i32 to vector<1x256xi32>
    %122 = arith.addi %19, %121 : vector<1x256xi32>
    %c0_i32_56 = arith.constant 0 : i32
    %123 = vector.broadcast %c0_i32_56 : i32 to vector<1x256xi32>
    %124 = arith.cmpi sge, %122, %123 : vector<1x256xi32>
    %c-3_i32_57 = arith.constant -3 : i32
    %125 = vector.broadcast %c-3_i32_57 : i32 to vector<1x256xi32>
    %126 = arith.addi %19, %125 : vector<1x256xi32>
    %c16_i32_58 = arith.constant 16 : i32
    %127 = vector.broadcast %c16_i32_58 : i32 to vector<1x256xi32>
    %128 = arith.cmpi slt, %126, %127 : vector<1x256xi32>
    %129 = arith.andi %124, %128 : vector<1x256xi1>
    %130 = arith.extui %129 : vector<1x256xi1> to vector<1x256xi32>
    %131 = arith.sitofp %130 : vector<1x256xi32> to vector<1x256xf32>
    %132 = vector.broadcast %131 : vector<1x256xf32> to vector<4x256xf32>
    %133 = arith.mulf %120, %132 : vector<4x256xf32>
    %134 = arith.addf %84, %133 : vector<4x256xf32>
    %cst_59 = arith.constant 0.000000e+00 : f32
    %135 = vector.broadcast %cst_59 : f32 to vector<4x256xf32>
    %c2_i32 = arith.constant 2 : i32
    %136 = tpu.dynamic_rotate %77 by %c2_i32 dim 1 : vector<4x256xf32>, i32 -> vector<4x256xf32>
    %137 = vector.extract_strided_slice %2 {offsets = [0, 1], sizes = [4, 1], strides = [1, 1]} : vector<4x49xf32> to vector<4x1xf32>
    %138 = vector.broadcast %137 : vector<4x1xf32> to vector<4x256xf32>
    %139 = arith.mulf %138, %136 : vector<4x256xf32>
    %140 = arith.addf %135, %139 : vector<4x256xf32>
    %c2_i32_60 = arith.constant 2 : i32
    %141 = tpu.dynamic_rotate %78 by %c2_i32_60 dim 1 : vector<4x256xf32>, i32 -> vector<4x256xf32>
    %142 = vector.extract_strided_slice %2 {offsets = [0, 8], sizes = [4, 1], strides = [1, 1]} : vector<4x49xf32> to vector<4x1xf32>
    %143 = vector.broadcast %142 : vector<4x1xf32> to vector<4x256xf32>
    %144 = arith.mulf %143, %141 : vector<4x256xf32>
    %145 = arith.addf %140, %144 : vector<4x256xf32>
    %c2_i32_61 = arith.constant 2 : i32
    %146 = tpu.dynamic_rotate %79 by %c2_i32_61 dim 1 : vector<4x256xf32>, i32 -> vector<4x256xf32>
    %147 = vector.extract_strided_slice %2 {offsets = [0, 15], sizes = [4, 1], strides = [1, 1]} : vector<4x49xf32> to vector<4x1xf32>
    %148 = vector.broadcast %147 : vector<4x1xf32> to vector<4x256xf32>
    %149 = arith.mulf %148, %146 : vector<4x256xf32>
    %150 = arith.addf %145, %149 : vector<4x256xf32>
    %c2_i32_62 = arith.constant 2 : i32
    %151 = tpu.dynamic_rotate %80 by %c2_i32_62 dim 1 : vector<4x256xf32>, i32 -> vector<4x256xf32>
    %152 = vector.extract_strided_slice %2 {offsets = [0, 22], sizes = [4, 1], strides = [1, 1]} : vector<4x49xf32> to vector<4x1xf32>
    %153 = vector.broadcast %152 : vector<4x1xf32> to vector<4x256xf32>
    %154 = arith.mulf %153, %151 : vector<4x256xf32>
    %155 = arith.addf %150, %154 : vector<4x256xf32>
    %c2_i32_63 = arith.constant 2 : i32
    %156 = tpu.dynamic_rotate %81 by %c2_i32_63 dim 1 : vector<4x256xf32>, i32 -> vector<4x256xf32>
    %157 = vector.extract_strided_slice %2 {offsets = [0, 29], sizes = [4, 1], strides = [1, 1]} : vector<4x49xf32> to vector<4x1xf32>
    %158 = vector.broadcast %157 : vector<4x1xf32> to vector<4x256xf32>
    %159 = arith.mulf %158, %156 : vector<4x256xf32>
    %160 = arith.addf %155, %159 : vector<4x256xf32>
    %c2_i32_64 = arith.constant 2 : i32
    %161 = tpu.dynamic_rotate %82 by %c2_i32_64 dim 1 : vector<4x256xf32>, i32 -> vector<4x256xf32>
    %162 = vector.extract_strided_slice %2 {offsets = [0, 36], sizes = [4, 1], strides = [1, 1]} : vector<4x49xf32> to vector<4x1xf32>
    %163 = vector.broadcast %162 : vector<4x1xf32> to vector<4x256xf32>
    %164 = arith.mulf %163, %161 : vector<4x256xf32>
    %165 = arith.addf %160, %164 : vector<4x256xf32>
    %c2_i32_65 = arith.constant 2 : i32
    %166 = tpu.dynamic_rotate %83 by %c2_i32_65 dim 1 : vector<4x256xf32>, i32 -> vector<4x256xf32>
    %167 = vector.extract_strided_slice %2 {offsets = [0, 43], sizes = [4, 1], strides = [1, 1]} : vector<4x49xf32> to vector<4x1xf32>
    %168 = vector.broadcast %167 : vector<4x1xf32> to vector<4x256xf32>
    %169 = arith.mulf %168, %166 : vector<4x256xf32>
    %170 = arith.addf %165, %169 : vector<4x256xf32>
    %c-2_i32 = arith.constant -2 : i32
    %171 = vector.broadcast %c-2_i32 : i32 to vector<1x256xi32>
    %172 = arith.addi %19, %171 : vector<1x256xi32>
    %c0_i32_66 = arith.constant 0 : i32
    %173 = vector.broadcast %c0_i32_66 : i32 to vector<1x256xi32>
    %174 = arith.cmpi sge, %172, %173 : vector<1x256xi32>
    %c-2_i32_67 = arith.constant -2 : i32
    %175 = vector.broadcast %c-2_i32_67 : i32 to vector<1x256xi32>
    %176 = arith.addi %19, %175 : vector<1x256xi32>
    %c16_i32_68 = arith.constant 16 : i32
    %177 = vector.broadcast %c16_i32_68 : i32 to vector<1x256xi32>
    %178 = arith.cmpi slt, %176, %177 : vector<1x256xi32>
    %179 = arith.andi %174, %178 : vector<1x256xi1>
    %180 = arith.extui %179 : vector<1x256xi1> to vector<1x256xi32>
    %181 = arith.sitofp %180 : vector<1x256xi32> to vector<1x256xf32>
    %182 = vector.broadcast %181 : vector<1x256xf32> to vector<4x256xf32>
    %183 = arith.mulf %170, %182 : vector<4x256xf32>
    %184 = arith.addf %134, %183 : vector<4x256xf32>
    %cst_69 = arith.constant 0.000000e+00 : f32
    %185 = vector.broadcast %cst_69 : f32 to vector<4x256xf32>
    %c1_i32_70 = arith.constant 1 : i32
    %186 = tpu.dynamic_rotate %77 by %c1_i32_70 dim 1 : vector<4x256xf32>, i32 -> vector<4x256xf32>
    %187 = vector.extract_strided_slice %2 {offsets = [0, 2], sizes = [4, 1], strides = [1, 1]} : vector<4x49xf32> to vector<4x1xf32>
    %188 = vector.broadcast %187 : vector<4x1xf32> to vector<4x256xf32>
    %189 = arith.mulf %188, %186 : vector<4x256xf32>
    %190 = arith.addf %185, %189 : vector<4x256xf32>
    %c1_i32_71 = arith.constant 1 : i32
    %191 = tpu.dynamic_rotate %78 by %c1_i32_71 dim 1 : vector<4x256xf32>, i32 -> vector<4x256xf32>
    %192 = vector.extract_strided_slice %2 {offsets = [0, 9], sizes = [4, 1], strides = [1, 1]} : vector<4x49xf32> to vector<4x1xf32>
    %193 = vector.broadcast %192 : vector<4x1xf32> to vector<4x256xf32>
    %194 = arith.mulf %193, %191 : vector<4x256xf32>
    %195 = arith.addf %190, %194 : vector<4x256xf32>
    %c1_i32_72 = arith.constant 1 : i32
    %196 = tpu.dynamic_rotate %79 by %c1_i32_72 dim 1 : vector<4x256xf32>, i32 -> vector<4x256xf32>
    %197 = vector.extract_strided_slice %2 {offsets = [0, 16], sizes = [4, 1], strides = [1, 1]} : vector<4x49xf32> to vector<4x1xf32>
    %198 = vector.broadcast %197 : vector<4x1xf32> to vector<4x256xf32>
    %199 = arith.mulf %198, %196 : vector<4x256xf32>
    %200 = arith.addf %195, %199 : vector<4x256xf32>
    %c1_i32_73 = arith.constant 1 : i32
    %201 = tpu.dynamic_rotate %80 by %c1_i32_73 dim 1 : vector<4x256xf32>, i32 -> vector<4x256xf32>
    %202 = vector.extract_strided_slice %2 {offsets = [0, 23], sizes = [4, 1], strides = [1, 1]} : vector<4x49xf32> to vector<4x1xf32>
    %203 = vector.broadcast %202 : vector<4x1xf32> to vector<4x256xf32>
    %204 = arith.mulf %203, %201 : vector<4x256xf32>
    %205 = arith.addf %200, %204 : vector<4x256xf32>
    %c1_i32_74 = arith.constant 1 : i32
    %206 = tpu.dynamic_rotate %81 by %c1_i32_74 dim 1 : vector<4x256xf32>, i32 -> vector<4x256xf32>
    %207 = vector.extract_strided_slice %2 {offsets = [0, 30], sizes = [4, 1], strides = [1, 1]} : vector<4x49xf32> to vector<4x1xf32>
    %208 = vector.broadcast %207 : vector<4x1xf32> to vector<4x256xf32>
    %209 = arith.mulf %208, %206 : vector<4x256xf32>
    %210 = arith.addf %205, %209 : vector<4x256xf32>
    %c1_i32_75 = arith.constant 1 : i32
    %211 = tpu.dynamic_rotate %82 by %c1_i32_75 dim 1 : vector<4x256xf32>, i32 -> vector<4x256xf32>
    %212 = vector.extract_strided_slice %2 {offsets = [0, 37], sizes = [4, 1], strides = [1, 1]} : vector<4x49xf32> to vector<4x1xf32>
    %213 = vector.broadcast %212 : vector<4x1xf32> to vector<4x256xf32>
    %214 = arith.mulf %213, %211 : vector<4x256xf32>
    %215 = arith.addf %210, %214 : vector<4x256xf32>
    %c1_i32_76 = arith.constant 1 : i32
    %216 = tpu.dynamic_rotate %83 by %c1_i32_76 dim 1 : vector<4x256xf32>, i32 -> vector<4x256xf32>
    %217 = vector.extract_strided_slice %2 {offsets = [0, 44], sizes = [4, 1], strides = [1, 1]} : vector<4x49xf32> to vector<4x1xf32>
    %218 = vector.broadcast %217 : vector<4x1xf32> to vector<4x256xf32>
    %219 = arith.mulf %218, %216 : vector<4x256xf32>
    %220 = arith.addf %215, %219 : vector<4x256xf32>
    %c-1_i32 = arith.constant -1 : i32
    %221 = vector.broadcast %c-1_i32 : i32 to vector<1x256xi32>
    %222 = arith.addi %19, %221 : vector<1x256xi32>
    %c0_i32_77 = arith.constant 0 : i32
    %223 = vector.broadcast %c0_i32_77 : i32 to vector<1x256xi32>
    %224 = arith.cmpi sge, %222, %223 : vector<1x256xi32>
    %c-1_i32_78 = arith.constant -1 : i32
    %225 = vector.broadcast %c-1_i32_78 : i32 to vector<1x256xi32>
    %226 = arith.addi %19, %225 : vector<1x256xi32>
    %c16_i32_79 = arith.constant 16 : i32
    %227 = vector.broadcast %c16_i32_79 : i32 to vector<1x256xi32>
    %228 = arith.cmpi slt, %226, %227 : vector<1x256xi32>
    %229 = arith.andi %224, %228 : vector<1x256xi1>
    %230 = arith.extui %229 : vector<1x256xi1> to vector<1x256xi32>
    %231 = arith.sitofp %230 : vector<1x256xi32> to vector<1x256xf32>
    %232 = vector.broadcast %231 : vector<1x256xf32> to vector<4x256xf32>
    %233 = arith.mulf %220, %232 : vector<4x256xf32>
    %234 = arith.addf %184, %233 : vector<4x256xf32>
    %cst_80 = arith.constant 0.000000e+00 : f32
    %235 = vector.broadcast %cst_80 : f32 to vector<4x256xf32>
    %236 = vector.extract_strided_slice %2 {offsets = [0, 3], sizes = [4, 1], strides = [1, 1]} : vector<4x49xf32> to vector<4x1xf32>
    %237 = vector.broadcast %236 : vector<4x1xf32> to vector<4x256xf32>
    %238 = arith.mulf %237, %77 : vector<4x256xf32>
    %239 = arith.addf %235, %238 : vector<4x256xf32>
    %240 = vector.extract_strided_slice %2 {offsets = [0, 10], sizes = [4, 1], strides = [1, 1]} : vector<4x49xf32> to vector<4x1xf32>
    %241 = vector.broadcast %240 : vector<4x1xf32> to vector<4x256xf32>
    %242 = arith.mulf %241, %78 : vector<4x256xf32>
    %243 = arith.addf %239, %242 : vector<4x256xf32>
    %244 = vector.extract_strided_slice %2 {offsets = [0, 17], sizes = [4, 1], strides = [1, 1]} : vector<4x49xf32> to vector<4x1xf32>
    %245 = vector.broadcast %244 : vector<4x1xf32> to vector<4x256xf32>
    %246 = arith.mulf %245, %79 : vector<4x256xf32>
    %247 = arith.addf %243, %246 : vector<4x256xf32>
    %248 = vector.extract_strided_slice %2 {offsets = [0, 24], sizes = [4, 1], strides = [1, 1]} : vector<4x49xf32> to vector<4x1xf32>
    %249 = vector.broadcast %248 : vector<4x1xf32> to vector<4x256xf32>
    %250 = arith.mulf %249, %80 : vector<4x256xf32>
    %251 = arith.addf %247, %250 : vector<4x256xf32>
    %252 = vector.extract_strided_slice %2 {offsets = [0, 31], sizes = [4, 1], strides = [1, 1]} : vector<4x49xf32> to vector<4x1xf32>
    %253 = vector.broadcast %252 : vector<4x1xf32> to vector<4x256xf32>
    %254 = arith.mulf %253, %81 : vector<4x256xf32>
    %255 = arith.addf %251, %254 : vector<4x256xf32>
    %256 = vector.extract_strided_slice %2 {offsets = [0, 38], sizes = [4, 1], strides = [1, 1]} : vector<4x49xf32> to vector<4x1xf32>
    %257 = vector.broadcast %256 : vector<4x1xf32> to vector<4x256xf32>
    %258 = arith.mulf %257, %82 : vector<4x256xf32>
    %259 = arith.addf %255, %258 : vector<4x256xf32>
    %260 = vector.extract_strided_slice %2 {offsets = [0, 45], sizes = [4, 1], strides = [1, 1]} : vector<4x49xf32> to vector<4x1xf32>
    %261 = vector.broadcast %260 : vector<4x1xf32> to vector<4x256xf32>
    %262 = arith.mulf %261, %83 : vector<4x256xf32>
    %263 = arith.addf %259, %262 : vector<4x256xf32>
    %264 = arith.addf %234, %263 : vector<4x256xf32>
    %cst_81 = arith.constant 0.000000e+00 : f32
    %265 = vector.broadcast %cst_81 : f32 to vector<4x256xf32>
    %c255_i32 = arith.constant 255 : i32
    %266 = tpu.dynamic_rotate %77 by %c255_i32 dim 1 : vector<4x256xf32>, i32 -> vector<4x256xf32>
    %267 = vector.extract_strided_slice %2 {offsets = [0, 4], sizes = [4, 1], strides = [1, 1]} : vector<4x49xf32> to vector<4x1xf32>
    %268 = vector.broadcast %267 : vector<4x1xf32> to vector<4x256xf32>
    %269 = arith.mulf %268, %266 : vector<4x256xf32>
    %270 = arith.addf %265, %269 : vector<4x256xf32>
    %c255_i32_82 = arith.constant 255 : i32
    %271 = tpu.dynamic_rotate %78 by %c255_i32_82 dim 1 : vector<4x256xf32>, i32 -> vector<4x256xf32>
    %272 = vector.extract_strided_slice %2 {offsets = [0, 11], sizes = [4, 1], strides = [1, 1]} : vector<4x49xf32> to vector<4x1xf32>
    %273 = vector.broadcast %272 : vector<4x1xf32> to vector<4x256xf32>
    %274 = arith.mulf %273, %271 : vector<4x256xf32>
    %275 = arith.addf %270, %274 : vector<4x256xf32>
    %c255_i32_83 = arith.constant 255 : i32
    %276 = tpu.dynamic_rotate %79 by %c255_i32_83 dim 1 : vector<4x256xf32>, i32 -> vector<4x256xf32>
    %277 = vector.extract_strided_slice %2 {offsets = [0, 18], sizes = [4, 1], strides = [1, 1]} : vector<4x49xf32> to vector<4x1xf32>
    %278 = vector.broadcast %277 : vector<4x1xf32> to vector<4x256xf32>
    %279 = arith.mulf %278, %276 : vector<4x256xf32>
    %280 = arith.addf %275, %279 : vector<4x256xf32>
    %c255_i32_84 = arith.constant 255 : i32
    %281 = tpu.dynamic_rotate %80 by %c255_i32_84 dim 1 : vector<4x256xf32>, i32 -> vector<4x256xf32>
    %282 = vector.extract_strided_slice %2 {offsets = [0, 25], sizes = [4, 1], strides = [1, 1]} : vector<4x49xf32> to vector<4x1xf32>
    %283 = vector.broadcast %282 : vector<4x1xf32> to vector<4x256xf32>
    %284 = arith.mulf %283, %281 : vector<4x256xf32>
    %285 = arith.addf %280, %284 : vector<4x256xf32>
    %c255_i32_85 = arith.constant 255 : i32
    %286 = tpu.dynamic_rotate %81 by %c255_i32_85 dim 1 : vector<4x256xf32>, i32 -> vector<4x256xf32>
    %287 = vector.extract_strided_slice %2 {offsets = [0, 32], sizes = [4, 1], strides = [1, 1]} : vector<4x49xf32> to vector<4x1xf32>
    %288 = vector.broadcast %287 : vector<4x1xf32> to vector<4x256xf32>
    %289 = arith.mulf %288, %286 : vector<4x256xf32>
    %290 = arith.addf %285, %289 : vector<4x256xf32>
    %c255_i32_86 = arith.constant 255 : i32
    %291 = tpu.dynamic_rotate %82 by %c255_i32_86 dim 1 : vector<4x256xf32>, i32 -> vector<4x256xf32>
    %292 = vector.extract_strided_slice %2 {offsets = [0, 39], sizes = [4, 1], strides = [1, 1]} : vector<4x49xf32> to vector<4x1xf32>
    %293 = vector.broadcast %292 : vector<4x1xf32> to vector<4x256xf32>
    %294 = arith.mulf %293, %291 : vector<4x256xf32>
    %295 = arith.addf %290, %294 : vector<4x256xf32>
    %c255_i32_87 = arith.constant 255 : i32
    %296 = tpu.dynamic_rotate %83 by %c255_i32_87 dim 1 : vector<4x256xf32>, i32 -> vector<4x256xf32>
    %297 = vector.extract_strided_slice %2 {offsets = [0, 46], sizes = [4, 1], strides = [1, 1]} : vector<4x49xf32> to vector<4x1xf32>
    %298 = vector.broadcast %297 : vector<4x1xf32> to vector<4x256xf32>
    %299 = arith.mulf %298, %296 : vector<4x256xf32>
    %300 = arith.addf %295, %299 : vector<4x256xf32>
    %c1_i32_88 = arith.constant 1 : i32
    %301 = vector.broadcast %c1_i32_88 : i32 to vector<1x256xi32>
    %302 = arith.addi %19, %301 : vector<1x256xi32>
    %c0_i32_89 = arith.constant 0 : i32
    %303 = vector.broadcast %c0_i32_89 : i32 to vector<1x256xi32>
    %304 = arith.cmpi sge, %302, %303 : vector<1x256xi32>
    %c1_i32_90 = arith.constant 1 : i32
    %305 = vector.broadcast %c1_i32_90 : i32 to vector<1x256xi32>
    %306 = arith.addi %19, %305 : vector<1x256xi32>
    %c16_i32_91 = arith.constant 16 : i32
    %307 = vector.broadcast %c16_i32_91 : i32 to vector<1x256xi32>
    %308 = arith.cmpi slt, %306, %307 : vector<1x256xi32>
    %309 = arith.andi %304, %308 : vector<1x256xi1>
    %310 = arith.extui %309 : vector<1x256xi1> to vector<1x256xi32>
    %311 = arith.sitofp %310 : vector<1x256xi32> to vector<1x256xf32>
    %312 = vector.broadcast %311 : vector<1x256xf32> to vector<4x256xf32>
    %313 = arith.mulf %300, %312 : vector<4x256xf32>
    %314 = arith.addf %264, %313 : vector<4x256xf32>
    %cst_92 = arith.constant 0.000000e+00 : f32
    %315 = vector.broadcast %cst_92 : f32 to vector<4x256xf32>
    %c254_i32 = arith.constant 254 : i32
    %316 = tpu.dynamic_rotate %77 by %c254_i32 dim 1 : vector<4x256xf32>, i32 -> vector<4x256xf32>
    %317 = vector.extract_strided_slice %2 {offsets = [0, 5], sizes = [4, 1], strides = [1, 1]} : vector<4x49xf32> to vector<4x1xf32>
    %318 = vector.broadcast %317 : vector<4x1xf32> to vector<4x256xf32>
    %319 = arith.mulf %318, %316 : vector<4x256xf32>
    %320 = arith.addf %315, %319 : vector<4x256xf32>
    %c254_i32_93 = arith.constant 254 : i32
    %321 = tpu.dynamic_rotate %78 by %c254_i32_93 dim 1 : vector<4x256xf32>, i32 -> vector<4x256xf32>
    %322 = vector.extract_strided_slice %2 {offsets = [0, 12], sizes = [4, 1], strides = [1, 1]} : vector<4x49xf32> to vector<4x1xf32>
    %323 = vector.broadcast %322 : vector<4x1xf32> to vector<4x256xf32>
    %324 = arith.mulf %323, %321 : vector<4x256xf32>
    %325 = arith.addf %320, %324 : vector<4x256xf32>
    %c254_i32_94 = arith.constant 254 : i32
    %326 = tpu.dynamic_rotate %79 by %c254_i32_94 dim 1 : vector<4x256xf32>, i32 -> vector<4x256xf32>
    %327 = vector.extract_strided_slice %2 {offsets = [0, 19], sizes = [4, 1], strides = [1, 1]} : vector<4x49xf32> to vector<4x1xf32>
    %328 = vector.broadcast %327 : vector<4x1xf32> to vector<4x256xf32>
    %329 = arith.mulf %328, %326 : vector<4x256xf32>
    %330 = arith.addf %325, %329 : vector<4x256xf32>
    %c254_i32_95 = arith.constant 254 : i32
    %331 = tpu.dynamic_rotate %80 by %c254_i32_95 dim 1 : vector<4x256xf32>, i32 -> vector<4x256xf32>
    %332 = vector.extract_strided_slice %2 {offsets = [0, 26], sizes = [4, 1], strides = [1, 1]} : vector<4x49xf32> to vector<4x1xf32>
    %333 = vector.broadcast %332 : vector<4x1xf32> to vector<4x256xf32>
    %334 = arith.mulf %333, %331 : vector<4x256xf32>
    %335 = arith.addf %330, %334 : vector<4x256xf32>
    %c254_i32_96 = arith.constant 254 : i32
    %336 = tpu.dynamic_rotate %81 by %c254_i32_96 dim 1 : vector<4x256xf32>, i32 -> vector<4x256xf32>
    %337 = vector.extract_strided_slice %2 {offsets = [0, 33], sizes = [4, 1], strides = [1, 1]} : vector<4x49xf32> to vector<4x1xf32>
    %338 = vector.broadcast %337 : vector<4x1xf32> to vector<4x256xf32>
    %339 = arith.mulf %338, %336 : vector<4x256xf32>
    %340 = arith.addf %335, %339 : vector<4x256xf32>
    %c254_i32_97 = arith.constant 254 : i32
    %341 = tpu.dynamic_rotate %82 by %c254_i32_97 dim 1 : vector<4x256xf32>, i32 -> vector<4x256xf32>
    %342 = vector.extract_strided_slice %2 {offsets = [0, 40], sizes = [4, 1], strides = [1, 1]} : vector<4x49xf32> to vector<4x1xf32>
    %343 = vector.broadcast %342 : vector<4x1xf32> to vector<4x256xf32>
    %344 = arith.mulf %343, %341 : vector<4x256xf32>
    %345 = arith.addf %340, %344 : vector<4x256xf32>
    %c254_i32_98 = arith.constant 254 : i32
    %346 = tpu.dynamic_rotate %83 by %c254_i32_98 dim 1 : vector<4x256xf32>, i32 -> vector<4x256xf32>
    %347 = vector.extract_strided_slice %2 {offsets = [0, 47], sizes = [4, 1], strides = [1, 1]} : vector<4x49xf32> to vector<4x1xf32>
    %348 = vector.broadcast %347 : vector<4x1xf32> to vector<4x256xf32>
    %349 = arith.mulf %348, %346 : vector<4x256xf32>
    %350 = arith.addf %345, %349 : vector<4x256xf32>
    %c2_i32_99 = arith.constant 2 : i32
    %351 = vector.broadcast %c2_i32_99 : i32 to vector<1x256xi32>
    %352 = arith.addi %19, %351 : vector<1x256xi32>
    %c0_i32_100 = arith.constant 0 : i32
    %353 = vector.broadcast %c0_i32_100 : i32 to vector<1x256xi32>
    %354 = arith.cmpi sge, %352, %353 : vector<1x256xi32>
    %c2_i32_101 = arith.constant 2 : i32
    %355 = vector.broadcast %c2_i32_101 : i32 to vector<1x256xi32>
    %356 = arith.addi %19, %355 : vector<1x256xi32>
    %c16_i32_102 = arith.constant 16 : i32
    %357 = vector.broadcast %c16_i32_102 : i32 to vector<1x256xi32>
    %358 = arith.cmpi slt, %356, %357 : vector<1x256xi32>
    %359 = arith.andi %354, %358 : vector<1x256xi1>
    %360 = arith.extui %359 : vector<1x256xi1> to vector<1x256xi32>
    %361 = arith.sitofp %360 : vector<1x256xi32> to vector<1x256xf32>
    %362 = vector.broadcast %361 : vector<1x256xf32> to vector<4x256xf32>
    %363 = arith.mulf %350, %362 : vector<4x256xf32>
    %364 = arith.addf %314, %363 : vector<4x256xf32>
    %cst_103 = arith.constant 0.000000e+00 : f32
    %365 = vector.broadcast %cst_103 : f32 to vector<4x256xf32>
    %c253_i32 = arith.constant 253 : i32
    %366 = tpu.dynamic_rotate %77 by %c253_i32 dim 1 : vector<4x256xf32>, i32 -> vector<4x256xf32>
    %367 = vector.extract_strided_slice %2 {offsets = [0, 6], sizes = [4, 1], strides = [1, 1]} : vector<4x49xf32> to vector<4x1xf32>
    %368 = vector.broadcast %367 : vector<4x1xf32> to vector<4x256xf32>
    %369 = arith.mulf %368, %366 : vector<4x256xf32>
    %370 = arith.addf %365, %369 : vector<4x256xf32>
    %c253_i32_104 = arith.constant 253 : i32
    %371 = tpu.dynamic_rotate %78 by %c253_i32_104 dim 1 : vector<4x256xf32>, i32 -> vector<4x256xf32>
    %372 = vector.extract_strided_slice %2 {offsets = [0, 13], sizes = [4, 1], strides = [1, 1]} : vector<4x49xf32> to vector<4x1xf32>
    %373 = vector.broadcast %372 : vector<4x1xf32> to vector<4x256xf32>
    %374 = arith.mulf %373, %371 : vector<4x256xf32>
    %375 = arith.addf %370, %374 : vector<4x256xf32>
    %c253_i32_105 = arith.constant 253 : i32
    %376 = tpu.dynamic_rotate %79 by %c253_i32_105 dim 1 : vector<4x256xf32>, i32 -> vector<4x256xf32>
    %377 = vector.extract_strided_slice %2 {offsets = [0, 20], sizes = [4, 1], strides = [1, 1]} : vector<4x49xf32> to vector<4x1xf32>
    %378 = vector.broadcast %377 : vector<4x1xf32> to vector<4x256xf32>
    %379 = arith.mulf %378, %376 : vector<4x256xf32>
    %380 = arith.addf %375, %379 : vector<4x256xf32>
    %c253_i32_106 = arith.constant 253 : i32
    %381 = tpu.dynamic_rotate %80 by %c253_i32_106 dim 1 : vector<4x256xf32>, i32 -> vector<4x256xf32>
    %382 = vector.extract_strided_slice %2 {offsets = [0, 27], sizes = [4, 1], strides = [1, 1]} : vector<4x49xf32> to vector<4x1xf32>
    %383 = vector.broadcast %382 : vector<4x1xf32> to vector<4x256xf32>
    %384 = arith.mulf %383, %381 : vector<4x256xf32>
    %385 = arith.addf %380, %384 : vector<4x256xf32>
    %c253_i32_107 = arith.constant 253 : i32
    %386 = tpu.dynamic_rotate %81 by %c253_i32_107 dim 1 : vector<4x256xf32>, i32 -> vector<4x256xf32>
    %387 = vector.extract_strided_slice %2 {offsets = [0, 34], sizes = [4, 1], strides = [1, 1]} : vector<4x49xf32> to vector<4x1xf32>
    %388 = vector.broadcast %387 : vector<4x1xf32> to vector<4x256xf32>
    %389 = arith.mulf %388, %386 : vector<4x256xf32>
    %390 = arith.addf %385, %389 : vector<4x256xf32>
    %c253_i32_108 = arith.constant 253 : i32
    %391 = tpu.dynamic_rotate %82 by %c253_i32_108 dim 1 : vector<4x256xf32>, i32 -> vector<4x256xf32>
    %392 = vector.extract_strided_slice %2 {offsets = [0, 41], sizes = [4, 1], strides = [1, 1]} : vector<4x49xf32> to vector<4x1xf32>
    %393 = vector.broadcast %392 : vector<4x1xf32> to vector<4x256xf32>
    %394 = arith.mulf %393, %391 : vector<4x256xf32>
    %395 = arith.addf %390, %394 : vector<4x256xf32>
    %c253_i32_109 = arith.constant 253 : i32
    %396 = tpu.dynamic_rotate %83 by %c253_i32_109 dim 1 : vector<4x256xf32>, i32 -> vector<4x256xf32>
    %397 = vector.extract_strided_slice %2 {offsets = [0, 48], sizes = [4, 1], strides = [1, 1]} : vector<4x49xf32> to vector<4x1xf32>
    %398 = vector.broadcast %397 : vector<4x1xf32> to vector<4x256xf32>
    %399 = arith.mulf %398, %396 : vector<4x256xf32>
    %400 = arith.addf %395, %399 : vector<4x256xf32>
    %c3_i32_110 = arith.constant 3 : i32
    %401 = vector.broadcast %c3_i32_110 : i32 to vector<1x256xi32>
    %402 = arith.addi %19, %401 : vector<1x256xi32>
    %c0_i32_111 = arith.constant 0 : i32
    %403 = vector.broadcast %c0_i32_111 : i32 to vector<1x256xi32>
    %404 = arith.cmpi sge, %402, %403 : vector<1x256xi32>
    %c3_i32_112 = arith.constant 3 : i32
    %405 = vector.broadcast %c3_i32_112 : i32 to vector<1x256xi32>
    %406 = arith.addi %19, %405 : vector<1x256xi32>
    %c16_i32_113 = arith.constant 16 : i32
    %407 = vector.broadcast %c16_i32_113 : i32 to vector<1x256xi32>
    %408 = arith.cmpi slt, %406, %407 : vector<1x256xi32>
    %409 = arith.andi %404, %408 : vector<1x256xi1>
    %410 = arith.extui %409 : vector<1x256xi1> to vector<1x256xi32>
    %411 = arith.sitofp %410 : vector<1x256xi32> to vector<1x256xf32>
    %412 = vector.broadcast %411 : vector<1x256xf32> to vector<4x256xf32>
    %413 = arith.mulf %400, %412 : vector<4x256xf32>
    %414 = arith.addf %364, %413 : vector<4x256xf32>
    %415 = vector.extract_strided_slice %414 {offsets = [0, 0], sizes = [1, 256], strides = [1, 1]} : vector<4x256xf32> to vector<1x256xf32>
    %416 = vector.extract_strided_slice %414 {offsets = [2, 0], sizes = [1, 256], strides = [1, 1]} : vector<4x256xf32> to vector<1x256xf32>
    %417 = arith.addf %415, %416 : vector<1x256xf32>
    %418 = arith.negf %417 : vector<1x256xf32>
    %419 = math.exp %418 : vector<1x256xf32>
    %cst_114 = arith.constant 1.000000e+00 : f32
    %420 = vector.broadcast %cst_114 : f32 to vector<1x256xf32>
    %421 = arith.addf %420, %419 : vector<1x256xf32>
    %422 = arith.divf %420, %421 : vector<1x256xf32>
    %c0_115 = arith.constant 0 : index
    %c0_116 = arith.constant 0 : index
    %c0_117 = arith.constant 0 : index
    %423 = vector.load %arg1[%c0_115, %c0_116, %c0_117] : memref<2x32x256xf32, #tpu.memory_space<vmem>>, vector<1x32x256xf32>
    %424 = vector.shape_cast %423 : vector<1x32x256xf32> to vector<32x256xf32>
    %425 = vector.extract_strided_slice %48 {offsets = [0, 0], sizes = [32, 1], strides = [1, 1]} : vector<32x2xf32> to vector<32x1xf32>
    %426 = vector.broadcast %425 : vector<32x1xf32> to vector<32x256xf32>
    %427 = arith.mulf %424, %426 : vector<32x256xf32>
    %428 = vector.broadcast %422 : vector<1x256xf32> to vector<32x256xf32>
    %429 = arith.mulf %427, %428 : vector<32x256xf32>
    %c0_118 = arith.constant 0 : index
    %c0_119 = arith.constant 0 : index
    %c0_120 = arith.constant 0 : index
    %430 = vector.load %arg5[%c0_118, %c0_119, %c0_120] : memref<2x32x256xf32, #tpu.memory_space<vmem>>, vector<1x32x256xf32>
    %431 = vector.shape_cast %430 : vector<1x32x256xf32> to vector<32x256xf32>
    %432 = vector.shape_cast %429 : vector<32x256xf32> to vector<1x32x256xf32>
    tpu.vector_store %arg5[%c0_118, %c0_119, %c0_120], %432 {strides = array<i32>} : memref<2x32x256xf32, #tpu.memory_space<vmem>>, vector<1x32x256xf32>,
    %433 = vector.extract_strided_slice %414 {offsets = [1, 0], sizes = [1, 256], strides = [1, 1]} : vector<4x256xf32> to vector<1x256xf32>
    %434 = vector.extract_strided_slice %414 {offsets = [3, 0], sizes = [1, 256], strides = [1, 1]} : vector<4x256xf32> to vector<1x256xf32>
    %435 = arith.addf %433, %434 : vector<1x256xf32>
    %436 = arith.negf %435 : vector<1x256xf32>
    %437 = math.exp %436 : vector<1x256xf32>
    %cst_121 = arith.constant 1.000000e+00 : f32
    %438 = vector.broadcast %cst_121 : f32 to vector<1x256xf32>
    %439 = arith.addf %438, %437 : vector<1x256xf32>
    %440 = arith.divf %438, %439 : vector<1x256xf32>
    %c1_122 = arith.constant 1 : index
    %c0_123 = arith.constant 0 : index
    %c0_124 = arith.constant 0 : index
    %441 = vector.load %arg1[%c1_122, %c0_123, %c0_124] : memref<2x32x256xf32, #tpu.memory_space<vmem>>, vector<1x32x256xf32>
    %442 = vector.shape_cast %441 : vector<1x32x256xf32> to vector<32x256xf32>
    %443 = vector.extract_strided_slice %48 {offsets = [0, 1], sizes = [32, 1], strides = [1, 1]} : vector<32x2xf32> to vector<32x1xf32>
    %444 = vector.broadcast %443 : vector<32x1xf32> to vector<32x256xf32>
    %445 = arith.mulf %442, %444 : vector<32x256xf32>
    %446 = vector.broadcast %440 : vector<1x256xf32> to vector<32x256xf32>
    %447 = arith.mulf %445, %446 : vector<32x256xf32>
    %c1_125 = arith.constant 1 : index
    %c0_126 = arith.constant 0 : index
    %c0_127 = arith.constant 0 : index
    %448 = vector.load %arg5[%c1_125, %c0_126, %c0_127] : memref<2x32x256xf32, #tpu.memory_space<vmem>>, vector<1x32x256xf32>
    %449 = vector.shape_cast %448 : vector<1x32x256xf32> to vector<32x256xf32>
    %450 = vector.shape_cast %447 : vector<32x256xf32> to vector<1x32x256xf32>
    tpu.vector_store %arg5[%c1_125, %c0_126, %c0_127], %450 {strides = array<i32>} : memref<2x32x256xf32, #tpu.memory_space<vmem>>, vector<1x32x256xf32>,
    return
  }
  func.func @transform_0(%arg0: i32) -> (i32, i32, i32) {
    %c0_i32 = arith.constant 0 : i32
    %c0_i32_0 = arith.constant 0 : i32
    %c0_i32_1 = arith.constant 0 : i32
    return %arg0, %c0_i32, %c0_i32_0 : i32, i32, i32
  }
  func.func @transform_1(%arg0: i32) -> (i32, i32) {
    %c0_i32 = arith.constant 0 : i32
    %c0_i32_0 = arith.constant 0 : i32
    %c0_i32_1 = arith.constant 0 : i32
    return %c0_i32, %c0_i32_0 : i32, i32
  }
  func.func @transform_2(%arg0: i32) -> (i32, i32) {
    %c0_i32 = arith.constant 0 : i32
    %c0_i32_0 = arith.constant 0 : i32
    %c0_i32_1 = arith.constant 0 : i32
    return %c0_i32, %c0_i32_0 : i32, i32
  }
  func.func @transform_3(%arg0: i32) -> (i32, i32) {
    %c0_i32 = arith.constant 0 : i32
    %c0_i32_0 = arith.constant 0 : i32
    %c0_i32_1 = arith.constant 0 : i32
    return %c0_i32, %c0_i32_0 : i32, i32
  }
  func.func @transform_4(%arg0: i32) -> (i32, i32, i32) {
    %c0_i32 = arith.constant 0 : i32
    %c0_i32_0 = arith.constant 0 : i32
    %c0_i32_1 = arith.constant 0 : i32
    return %arg0, %c0_i32, %c0_i32_0 : i32, i32, i32
  }
}

</mosaic_0001>

<bundles_post_ra>
// kernel: cbam_forward.1
= control target key start
LH: loop header
LB: loop body
LE: loop exit
PB: predicated region body
PF: predicated region fallthrough
CT: control target
= control target key end

     0   :  { %v2261_v40 = vmov 0   ;;  %vm123_vm0 = vcmask 7168   ;;  %vm128_vm1 = vcmask 15360   ;;  %vm133_vm2 = vcmask 23552   ;;  %s2263_s25 = smov 126   ;;  %s2312_s7 = smov 32   ;;  %s4050_s0 = inlined_call_operand.vmem [shape: f32[2,32,256], index: 0, kind: input, shape index: {}]   ;;  %s4051_s3 = inlined_call_operand.vmem [shape: f32[4,49], index: 3, kind: input, shape index: {}]   ;;  %s4052_s1 = inlined_call_operand.vmem [shape: f32[4,32], index: 1, kind: input, shape index: {}]   ;;  %s4053_s2 = inlined_call_operand.vmem [shape: f32[32,4], index: 2, kind: input, shape index: {}]   ;;  %s4054_s4 = inlined_call_operand.vmem [shape: f32[2,32,256], index: 4, kind: output, shape index: {}]  }
   0x1   :  { %v2352_v0 = vld [vmem:[%s4050_s0 + $0x20] sm:$0xff]  ;;  %v2357_v1 = vld [vmem:[%s4050_s0 + $0x28] sm:$0xff]  ;;  %v2378_v7 = vld [vmem:[%s4050_s0 + $0x30] sm:$0xff]  ;;  %2168 = vset.pattern.permute.xlu1 %v2261_v40  ;;  %vm138_vm3 = vcmask 261120   ;;  %vm181_vm4 = vcmask 1043456   ;;  %vm168_vm5 = vcmask 31744  }
   0x2   :  { %v2362_v2 = vld [vmem:[%s4050_s0] sm:$0xff]  ;;  %v64_v3 = vadd.f32 %v2357_v1, %v2352_v0  ;;  %v2369_v4 = vld [vmem:[%s4050_s0 + $0x8] sm:$0xff]  ;;  %v2383_v8 = vld [vmem:[%s4050_s0 + $0x38] sm:$0xff]  ;;  %v80_v18 = vmax.f32 %v2352_v0, %v2357_v1  ;;  %s2313_s8 = smov 16   ;;  %s2314_s9 = smov 3  }
   0x3   :  { %v74_v5 = vmax.f32 %v2362_v2, %v2369_v4  ;;  %v58_v6 = vadd.f32 %v2369_v4, %v2362_v2  ;;  %v2388_v9 = vld [vmem:[%s4050_s0 + $0x10] sm:$0xff]  ;;  %v2393_v10 = vld [vmem:[%s4050_s0 + $0x18] sm:$0xff]  ;;  %v67_v11 = vadd.f32 %v2383_v8, %v2378_v7  ;;  %v2404_v14 = vld [vmem:[%s4050_s0 + $0x40] sm:$0xff]  ;;  %v83_v16 = vmax.f32 %v2378_v7, %v2383_v8  ;;  %s2315_s10 = smov 112   ;;  %s2316_s11 = smov 96  }
   0x4   :  { %65 = vadd.xlane.f32.xlu1 %v64_v3  ;;  %v77_v12 = vmax.f32 %v2388_v9, %v2393_v10  ;;  %v61_v13 = vadd.f32 %v2393_v10, %v2388_v9  ;;  %v2409_v15 = vld [vmem:[%s4050_s0 + $0x48] sm:$0xff]  ;;  %v2420_v19 = vld [vmem:[%s4050_s0 + $0x60] sm:$0xff]  ;;  %v2430_v21 = vld [vmem:[%s4050_s0 + $0x70] sm:$0xff]  ;;  %s2317_s12 = smov 80   ;;  %s2318_s13 = smov 2  }
   0x5   :  { %75 = vmax.xlane.f32.xlu2 %v74_v5  ;;  %59 = vadd.xlane.f32.xlu0 %v58_v6  ;;  %v95_v17 = vadd.f32 %v2409_v15, %v2404_v14  ;;  %v2425_v20 = vld [vmem:[%s4050_s0 + $0x68] sm:$0xff]  ;;  %v2435_v22 = vld [vmem:[%s4050_s0 + $0x78] sm:$0xff]  ;;  %v2440_v23 = vld [vmem:[%s4050_s0 + $0x50] sm:$0xff]  ;;  %v111_v30 = vmax.f32 %v2404_v14, %v2409_v15  ;;  %s2319_s14 = smov 1   ;;  %s2320_s15 = smov 127  }
   0x6   :  { %v2445_v24 = vld [vmem:[%s4050_s0 + $0x58] sm:$0xff]  ;;  %v101_v25 = vadd.f32 %v2425_v20, %v2420_v19  ;;  %v104_v26 = vadd.f32 %v2435_v22, %v2430_v21  ;;  %v117_v29 = vmax.f32 %v2420_v19, %v2425_v20  ;;  %v120_v31 = vmax.f32 %v2430_v21, %v2435_v22  ;;  %v2464_v39 = vld [vmem:[%s4051_s3] sm:$0xf]  ;;  %s2321_s16 = smov 125  }
   0x7   :  { %v98_v27 = vadd.f32 %v2445_v24, %v2440_v23  ;;  %v114_v28 = vmax.f32 %v2440_v23, %v2445_v24 }
   0xc   :  { %68 = vadd.xlane.f32.xlu1 %v67_v11 }
   0xd   :  { %78 = vmax.xlane.f32.xlu2 %v77_v12  ;;  %62 = vadd.xlane.f32.xlu0 %v61_v13  ;;  %v17_v13 = vld [vmem:[%s4052_s1] sm:$0xf] }
  0x14   :  { %84 = vmax.xlane.f32.xlu1 %v83_v16 }
  0x15   :  { %96 = vadd.xlane.f32.xlu2 %v95_v17  ;;  %81 = vmax.xlane.f32.xlu0 %v80_v18  ;;  %v2262_v17 = vmov 7  }
  0x1c   :  { %102 = vadd.xlane.f32.xlu1 %v101_v25 }
  0x1d   :  { %105 = vadd.xlane.f32.xlu2 %v104_v26  ;;  %99 = vadd.xlane.f32.xlu0 %v98_v27  ;;  %v2264_v26 = vmov 14   ;;  %v2265_v27 = vmov 21  }
  0x24   :  { %115 = vmax.xlane.f32.xlu1 %v114_v28  ;;  %v2266_v28 = vmov 28  }
  0x25   :  { %118 = vmax.xlane.f32.xlu2 %v117_v29  ;;  %112 = vmax.xlane.f32.xlu0 %v111_v30  ;;  %v2267_v29 = vmov 35   ;;  %v2268_v30 = vmov 42  }
  0x2d   :  { %121 = vmax.xlane.f32.xlu0 %v120_v31  ;;  %v2269_v31 = vmov 1  }
  0x3d   :  { %491 = vperm.xlu1 %2168, %v2464_v39  }
  0x45   :  { %2169 = vset.pattern.permute.xlu1 %v2262_v17  ;;  %v2295_v17 = vmov 33  }
  0x77   :  { %v66_v34 = vpop.xlane.xlu1 %65 }
  0x78   :  { %v76_v32 = vpop.xlane.xlu2 %75  ;;  %v60_v33 = vpop.xlane.xlu0 %59  ;;  %v72_v50 = vmul.f32 0.00390625, %v66_v34  ;;  %v2272_v34 = vmov 15  }
  0x79   :  { %v70_v59 = vmul.f32 0.00390625, %v60_v33  ;;  %v2271_v33 = vmov 4  }
  0x7a   :  { %2196 = vset.pattern.permute.xlu2 %v2271_v33  ;;  %v2301_v33 = vmov 47  }
  0x7b   :  { %1304 = vperm.xlu2 %2196, %v2464_v39  }
  0x7f   :  { %v69_v37 = vpop.xlane.xlu1 %68 }
  0x80   :  { %v63_v35 = vpop.xlane.xlu0 %62  ;;  %v79_v36 = vpop.xlane.xlu2 %78  ;;  %v73_v48 = vmul.f32 0.00390625, %v69_v37  ;;  %v2274_v37 = vmov 22  }
  0x81   :  { %v71_v53 = vmul.f32 0.00390625, %v63_v35 }
  0x87   :  { %v85_v42 = vpop.xlane.xlu1 %84 }
  0x88   :  { %v82_v38 = vpop.xlane.xlu0 %81  ;;  %v97_v41 = vpop.xlane.xlu2 %96 }
  0x89   :  { %v107_v54 = vmul.f32 0.00390625, %v97_v41  ;;  %v2275_v41 = vmov 18  }
  0x8b   :  { %v124_v5 = vsel %vm123_vm0, %v70_v59, %v107_v54  ;;  %v2283_v54 = vmov 46   ;;  %v2286_v59 = vmov 16  }
  0x8c   :  { %v129_v12 = vsel %vm128_vm1, %v124_v5, %v76_v32  ;;  %v2270_v32 = vmov 8   ;;  %v2291_v5 = vmov 19  }
  0x8f   :  { %v103_v45 = vpop.xlane.xlu1 %102 }
  0x90   :  { %v100_v43 = vpop.xlane.xlu0 %99  ;;  %v106_v44 = vpop.xlane.xlu2 %105  ;;  %v109_v49 = vmul.f32 0.00390625, %v103_v45  ;;  %v21_v45 = vld [vmem:[%s4053_s2 + $0x18] sm:$0xff] }
  0x91   :  { %v110_v47 = vmul.f32 0.00390625, %v106_v44  ;;  %v108_v51 = vmul.f32 0.00390625, %v100_v43  ;;  %v18_v43 = vld [vmem:[%s4053_s2] sm:$0xff]  ;;  %v19_v44 = vld [vmem:[%s4053_s2 + $0x8] sm:$0xff] }
  0x92   :  { %v126_v55 = vsel %vm123_vm0, %v72_v50, %v109_v49  ;;  %v2278_v49 = vmov 36   ;;  %v2279_v50 = vmov 32  }
  0x93   :  { %v127_v52 = vsel %vm123_vm0, %v73_v48, %v110_v47  ;;  %v125_v61 = vsel %vm123_vm0, %v71_v53, %v108_v51  ;;  %v131_v63 = vsel %vm128_vm1, %v126_v55, %v82_v38  ;;  %v2277_v47 = vmov 25   ;;  %v20_v48 = vld [vmem:[%s4053_s2 + $0x10] sm:$0xff]  ;;  %s2311_s2 = smov 48  }
  0x94   :  { %v132_v58 = vsel %vm128_vm1, %v127_v52, %v85_v42  ;;  %v130_v6 = vsel %vm128_vm1, %v125_v61, %v79_v36  ;;  %v2273_v36 = vmov 11   ;;  %v2280_v51 = vmov 43  }
  0x95   :  { %2197 = vset.pattern.permute.xlu2 %v2273_v36  ;;  %v2281_v52 = vmov 39   ;;  %v2282_v53 = vmov 2   ;;  %v2288_v61 = vmov 12   ;;  %v2302_v36 = vmov 45  }
  0x96   :  { %1334 = vperm.xlu2 %2197, %v2464_v39  }
  0x97   :  { %v116_v62 = vpop.xlane.xlu1 %115 }
  0x98   :  { %v113_v46 = vpop.xlane.xlu0 %112  ;;  %v119_v56 = vpop.xlane.xlu2 %118  ;;  %v135_v11 = vsel %vm133_vm2, %v130_v6, %v116_v62  ;;  %v2292_v6 = vmov 30  }
  0x99   :  { %v136_v3 = vsel %vm133_vm2, %v131_v63, %v119_v56  ;;  %v134_v16 = vsel %vm133_vm2, %v129_v12, %v113_v46  ;;  %v2276_v46 = vmov 29   ;;  %v2284_v56 = vmov 9  }
  0x9a   :  { %v2289_v63 = vmov 23   ;;  %v2293_v12 = vmov 26  }
  0x9e   :  { %2198 = vset.pattern.permute.xlu2 %v2275_v41 }
  0x9f   :  { %1364 = vperm.xlu2 %2198, %v2464_v39  }
  0xa0   :  { %v122_v57 = vpop.xlane.xlu0 %121 }
  0xa1   :  { %v137_v60 = vsel %vm133_vm2, %v132_v58, %v122_v57  ;;  %v2285_v57 = vmov 5  }
  0xa2   :  { %154 = vmatpush.msra.mxu0 %v137_v60  ;;  %v2287_v60 = vmov 3  }
  0xa3   :  { %2189 = vset.pattern.permute.xlu0 %v2287_v60 }
  0xa4   :  { %155 = vmatpush.msra.mxu0 %v136_v3  ;;  %1122 = vperm.xlu0 %2189, %v2464_v39   ;;  %v2290_v3 = vmov 17  }
  0xa6   :  { %156 = vmatpush.msra.mxu0 %v135_v11 }
  0xa7   :  { %2199 = vset.pattern.permute.xlu2 %v2277_v47 }
  0xa8   :  { %157 = vmatpush.msra.mxu0 %v134_v16  ;;  %1383 = vperm.xlu2 %2199, %v2464_v39  }
  0xa9   :  { %2055 = vmatmul.msk.f32.vlgmr.msra.gmra.mxu0 %vm138_vm3, %v17_v13  ;;  %v2294_v13 = vmov 37  }
  0xac   :  { %2191 = vset.pattern.permute.xlu0 %v2290_v3 }
  0xad   :  { %1170 = vperm.xlu0 %2191, %v2464_v39  }
  0xaf   :  { %v2496_v35 = vpop.permute.xlu1 %491 }
  0xb0   :  { %2200 = vset.pattern.permute.xlu2 %v2279_v50 }
  0xb1   :  { %1413 = vperm.xlu2 %2200, %v2464_v39  }
  0xb9   :  { %2201 = vset.pattern.permute.xlu2 %v2281_v52 }
  0xba   :  { %1443 = vperm.xlu2 %2201, %v2464_v39  }
  0xc2   :  { %2202 = vset.pattern.permute.xlu2 %v2283_v54 }
  0xc3   :  { %1473 = vperm.xlu2 %2202, %v2464_v39  }
  0xcb   :  { %2203 = vset.pattern.permute.xlu2 %v2285_v57 }
  0xcc   :  { %1520 = vperm.xlu2 %2203, %v2464_v39  }
  0xd4   :  { %2204 = vset.pattern.permute.xlu2 %v2288_v61 }
  0xd5   :  { %1550 = vperm.xlu2 %2204, %v2464_v39  }
  0xdd   :  { %2205 = vset.pattern.permute.xlu2 %v2291_v5 }
  0xde   :  { %1580 = vperm.xlu2 %2205, %v2464_v39  }
  0xe6   :  { %2206 = vset.pattern.permute.xlu2 %v2293_v12 }
  0xe7   :  { %1599 = vperm.xlu2 %2206, %v2464_v39  }
  0xef   :  { %2207 = vset.pattern.permute.xlu2 %v2295_v17 }
  0xf0   :  { %1629 = vperm.xlu2 %2207, %v2464_v39  }
 0x126   :  { %v159_v18 = vpop.f32.mrf.mxu0 }
 0x127   :  { %v162_v25 = vmax.f32 %v159_v18, 0.0  ;;  %v2296_v18 = vmov 44  }
 0x129   :  { %164 = vrot.lane.b32.xlu1 %v162_v25, %s2263_s25 }
 0x131   :  { %521 = vperm.xlu1 %2169, %v2464_v39  }
 0x139   :  { %2170 = vset.pattern.permute.xlu1 %v2264_v26  ;;  %v2297_v26 = vmov 10  }
 0x13a   :  { %552 = vperm.xlu1 %2170, %v2464_v39  }
 0x142   :  { %2171 = vset.pattern.permute.xlu1 %v2265_v27  ;;  %v2298_v27 = vmov 40  }
 0x143   :  { %572 = vperm.xlu1 %2171, %v2464_v39   ;;  %2208 = vset.pattern.permute.xlu2 %v2298_v27 }
 0x144   :  { %1659 = vperm.xlu2 %2208, %v2464_v39  }
 0x14b   :  { %2172 = vset.pattern.permute.xlu1 %v2266_v28 }
 0x14c   :  { %604 = vperm.xlu1 %2172, %v2464_v39   ;;  %2209 = vset.pattern.permute.xlu2 %v2301_v33 }
 0x14d   :  { %1689 = vperm.xlu2 %2209, %v2464_v39  }
 0x154   :  { %2173 = vset.pattern.permute.xlu1 %v2267_v29  ;;  %v2299_v29 = vmov 31  }
 0x155   :  { %635 = vperm.xlu1 %2173, %v2464_v39   ;;  %2193 = vset.pattern.permute.xlu0 %v2299_v29 }
 0x156   :  { %1207 = vperm.xlu0 %2193, %v2464_v39  }
 0x15d   :  { %2174 = vset.pattern.permute.xlu1 %v2268_v30  ;;  %v2300_v30 = vmov 24  }
 0x15e   :  { %666 = vperm.xlu1 %2174, %v2464_v39   ;;  %2195 = vset.pattern.permute.xlu0 %v2302_v36 }
 0x15f   :  { %1255 = vperm.xlu0 %2195, %v2464_v39  }
 0x166   :  { %2175 = vset.pattern.permute.xlu1 %v2269_v31 }
 0x167   :  { %713 = vperm.xlu1 %2175, %v2464_v39  }
 0x16f   :  { %2176 = vset.pattern.permute.xlu1 %v2270_v32  ;;  %v2559_v32 = vpop.permute.xlu2 %1304 }
 0x170   :  { %743 = vperm.xlu1 %2176, %v2464_v39   ;;  %4116 = vst [vmem:[#allocation4_spill] sm:$0xff] %v2559_v32  ;;  %v2309_v32 = vmov 27  }
 0x177   :  { %v2566_v41 = vpop.permute.xlu2 %1334 }
 0x178   :  { %2177 = vset.pattern.permute.xlu1 %v2272_v34  ;;  %4118 = vst [vmem:[#allocation6_spill] sm:$0xff] %v2566_v41 }
 0x179   :  { %773 = vperm.xlu1 %2177, %v2464_v39  }
 0x181   :  { %2178 = vset.pattern.permute.xlu1 %v2274_v37  ;;  %v2303_v37 = vmov 38  }
 0x182   :  { %792 = vperm.xlu1 %2178, %v2464_v39  }
 0x18a   :  { %2179 = vset.pattern.permute.xlu1 %v2276_v46  ;;  %v2574_v46 = vpop.permute.xlu2 %1364 }
 0x18b   :  { %822 = vperm.xlu1 %2179, %v2464_v39   ;;  %4120 = vst [vmem:[#allocation8_spill] sm:$0xff] %v2574_v46 }
 0x193   :  { %2180 = vset.pattern.permute.xlu1 %v2278_v49 }
 0x194   :  { %852 = vperm.xlu1 %2180, %v2464_v39  }
 0x19b   :  { %v165_v38 = vpop.permute.xlu1 %164 }
 0x19c   :  { %v167_v42 = vadd.f32 %v165_v38, %v162_v25  ;;  %2181 = vset.pattern.permute.xlu1 %v2280_v51  ;;  %v2304_v38 = vmov 13  }
 0x19d   :  { %882 = vperm.xlu1 %2181, %v2464_v39   ;;  %2211 = vset.pattern.permute.xlu2 %v2304_v38 }
 0x19e   :  { %2056 = vmatpush.msk.msra.mxu1 %vm181_vm4, %v167_v42  ;;  %2103 = vmatpush.msk.msra.mxu2 %vm181_vm4, %v167_v42 }
 0x19f   :  { %2104 = vmatpush.msk.msra.mxu3 %vm181_vm4, %v167_v42  ;;  %2057 = vmatmul.msk.f32.vlgmr.msra.gmra.mxu1 %vm168_vm5, %v18_v43  ;;  %v2305_v43 = vmov 6  }
 0x1a0   :  { %2058 = vmatmul.msk.f32.vlgmr.msra.gmra.mxu2 %vm168_vm5, %v19_v44  ;;  %2060 = vmatmul.msk.f32.vlgmr.msra.gmra.mxu3 %vm168_vm5, %v21_v45  ;;  %v2306_v44 = vmov 20  }
 0x1a1   :  { %1766 = vperm.xlu2 %2211, %v2464_v39   ;;  %2210 = vset.pattern.permute.xlu0 %v2305_v43 }
 0x1a2   :  { %1736 = vperm.xlu0 %2210, %v2464_v39  }
 0x1a3   :  { %v2528_v55 = vpop.permute.xlu1 %521 }
 0x1a5   :  { %2182 = vset.pattern.permute.xlu1 %v2282_v53 }
 0x1a6   :  { %929 = vperm.xlu1 %2182, %v2464_v39  }
 0x1a8   :  { %2059 = vmatmul.msk.f32.gmra.mxu2 %vm168_vm5, %v20_v48 }
 0x1a9   :  { %2213 = vset.pattern.permute.xlu2 %v2261_v40 }
 0x1aa   :  { %2215 = vset.pattern.permute.xlu0 %v2261_v40 }
 0x1ac   :  { %v2532_v58 = vpop.permute.xlu1 %552 }
 0x1ae   :  { %2183 = vset.pattern.permute.xlu1 %v2284_v56  ;;  %v2580_v56 = vpop.permute.xlu2 %1383 }
 0x1af   :  { %959 = vperm.xlu1 %2183, %v2464_v39   ;;  %4122 = vst [vmem:[#allocation10_spill] sm:$0xff] %v2580_v56 }
 0x1b5   :  { %v2537_v62 = vpop.permute.xlu1 %572 }
 0x1b6   :  { %v2584_v17 = vpop.permute.xlu2 %1413 }
 0x1b7   :  { %2184 = vset.pattern.permute.xlu1 %v2286_v59  ;;  %4124 = vst [vmem:[#allocation12_spill] sm:$0xff] %v2584_v17 }
 0x1b8   :  { %989 = vperm.xlu1 %2184, %v2464_v39  }
 0x1be   :  { %v2542_v11 = vpop.permute.xlu1 %604 }
 0x1c0   :  { %2185 = vset.pattern.permute.xlu1 %v2289_v63 }
 0x1c1   :  { %1008 = vperm.xlu1 %2185, %v2464_v39  }
 0x1c7   :  { %v2547_v16 = vpop.permute.xlu1 %635 }
 0x1c9   :  { %2186 = vset.pattern.permute.xlu1 %v2292_v6 }
 0x1ca   :  { %1038 = vperm.xlu1 %2186, %v2464_v39  }
 0x1d0   :  { %v2551_v25 = vpop.permute.xlu1 %666 }
 0x1d2   :  { %2187 = vset.pattern.permute.xlu1 %v2294_v13 }
 0x1d3   :  { %1068 = vperm.xlu1 %2187, %v2464_v39  }
 0x1d9   :  { %v2554_v28 = vpop.permute.xlu1 %713 }
 0x1da   :  { %4115 = vst [vmem:[#allocation3_spill] sm:$0xff] %v2554_v28 }
 0x1db   :  { %2188 = vset.pattern.permute.xlu1 %v2296_v18 }
 0x1dc   :  { %1098 = vperm.xlu1 %2188, %v2464_v39  }
 0x1e2   :  { %v2561_v34 = vpop.permute.xlu1 %743 }
 0x1e3   :  { %4117 = vst [vmem:[#allocation5_spill] sm:$0xff] %v2561_v34 }
 0x1e4   :  { %2190 = vset.pattern.permute.xlu1 %v2297_v26 }
 0x1e5   :  { %1146 = vperm.xlu1 %2190, %v2464_v39  }
 0x1eb   :  { %v2569_v42 = vpop.permute.xlu1 %773 }
 0x1ec   :  { %4119 = vst [vmem:[#allocation7_spill] sm:$0xff] %v2569_v42 }
 0x1ed   :  { %2192 = vset.pattern.permute.xlu1 %v2300_v30 }
 0x1ee   :  { %1194 = vperm.xlu1 %2192, %v2464_v39  }
 0x1f4   :  { %v2576_v48 = vpop.permute.xlu1 %792 }
 0x1f5   :  { %4121 = vst [vmem:[#allocation9_spill] sm:$0xff] %v2576_v48 }
 0x1f6   :  { %2194 = vset.pattern.permute.xlu1 %v2303_v37 }
 0x1f7   :  { %1231 = vperm.xlu1 %2194, %v2464_v39  }
 0x1fd   :  { %v2582_v57 = vpop.permute.xlu1 %822 }
 0x1fe   :  { %4123 = vst [vmem:[#allocation11_spill] sm:$0xff] %v2582_v57 }
 0x1ff   :  { %2212 = vset.pattern.permute.xlu1 %v2306_v44 }
 0x200   :  { %1796 = vperm.xlu1 %2212, %v2464_v39  }
 0x206   :  { %v2586_v27 = vpop.permute.xlu1 %852 }
 0x207   :  { %4125 = vst [vmem:[#allocation13_spill] sm:$0xff] %v2586_v27 }
 0x208   :  { %2216 = vset.pattern.permute.xlu1 %v2261_v40 }
 0x21c   :  { %v202_v45 = vpop.f32.mrf.mxu1 }
 0x21d   :  { %v2061_v47 = vmul.f32 -1.442695, %v202_v45 }
 0x21f   :  { %2225 = vpow2.f32 %v2061_v47 }
 0x223   :  { %v205_v49 = vpop.f32.mrf.mxu2  ;;  %v211_v50 = vpop.f32.mrf.mxu3 }
 0x224   :  { %v2062_v51 = vmul.f32 -1.442695, %v205_v49  ;;  %v2064_v52 = vmul.f32 -1.442695, %v211_v50 }
 0x225   :  { %v2226_v53 = vpop.eup %2225 }
 0x226   :  { %v226_v54 = vadd.f32 1.0, %v2226_v53  ;;  %2227 = vpow2.f32 %v2062_v51 }
 0x227   :  { %2229 = vpow2.f32 %v2064_v52 }
 0x228   :  { %2231 = vrcp.f32 %v226_v54  ;;  %v241_v13 = vand.u32 2147483648, %v226_v54  ;;  %vm235_vm6 = vweird.f32 %v226_v54  ;;  %v239_v26 = vand.u32 2147483647, %v226_v54 }
 0x22a   :  { %v242_v33 = vor.u32 1.1754944e-38, %v241_v13  ;;  %vm240_vm9 = vcmp.eq.f32.partialorder %v239_v26, 8.507059e+37 }
 0x22b   :  { %v208_v59 = vpop.f32.mrf.mxu2 }
 0x22c   :  { %v2228_v60 = vpop.eup %2227  ;;  %v2063_v61 = vmul.f32 -1.442695, %v208_v59 }
 0x22d   :  { %v2230_v63 = vpop.eup %2229  ;;  %v227_v3 = vadd.f32 1.0, %v2228_v60  ;;  %v2588_v60 = vpop.permute.xlu2 %1443 }
 0x22e   :  { %v2232_v5 = vpop.eup %2231  ;;  %v229_v6 = vadd.f32 1.0, %v2230_v63  ;;  %2233 = vpow2.f32 %v2063_v61  ;;  %4126 = vst [vmem:[#allocation14_spill] sm:$0xff] %v2588_v60 }
 0x22f   :  { %2235 = vrcp.f32 %v227_v3  ;;  %v231_v12 = vmul.f32 %v2232_v5, %v226_v54  ;;  %vm236_vm7 = vweird.f32 %v2232_v5  ;;  %vm250_vm10 = vweird.f32 %v227_v3 }
 0x230   :  { %2237 = vrcp.f32 %v229_v6  ;;  %vm237_vm8 = vmor %vm235_vm6, %vm236_vm7  ;;  %v256_v52 = vand.u32 2147483648, %v227_v3  ;;  %v286_v53 = vand.u32 2147483648, %v229_v6  ;;  %v254_v59 = vand.u32 2147483647, %v227_v3 }
 0x231   :  { %v232_v18 = vsub.f32 1.0, %v231_v12  ;;  %v284_v63 = vand.u32 2147483647, %v229_v6  ;;  %v2590_v12 = vpop.permute.xlu1 %882  ;;  %vm280_vm13 = vweird.f32 %v229_v6 }
 0x232   :  { %4127 = vst [vmem:[#allocation15_spill] sm:$0xff] %v2590_v12  ;;  %v257_v26 = vor.u32 1.1754944e-38, %v256_v52  ;;  %vm255_vm0 = vcmp.eq.f32.partialorder %v254_v59, 8.507059e+37 }
 0x233   :  { %v233_v29 = vmul.f32 %v2232_v5, %v232_v18  ;;  %vm285_vm1 = vcmp.eq.f32.partialorder %v284_v63, 8.507059e+37 }
 0x234   :  { %v2234_v30 = vpop.eup %2233 }
 0x235   :  { %v2236_v36 = vpop.eup %2235  ;;  %v228_v37 = vadd.f32 1.0, %v2234_v30  ;;  %v234_v38 = vadd.f32 %v2232_v5, %v233_v29  ;;  %v287_v29 = vor.u32 1.1754944e-38, %v286_v53  ;;  %v2594_v52 = vpop.permute.xlu2 %1473 }
 0x236   :  { %v2238_v43 = vpop.eup %2237  ;;  %v246_v44 = vmul.f32 %v2236_v36, %v227_v3  ;;  %vm251_vm11 = vweird.f32 %v2236_v36  ;;  %4128 = vst [vmem:[#allocation16_spill] sm:$0xff] %v2594_v52 }
 0x237   :  { %2239 = vrcp.f32 %v228_v37  ;;  %v238_v45 = vsel %vm237_vm8, %v2232_v5, %v234_v38  ;;  %v276_v47 = vmul.f32 %v2238_v43, %v229_v6  ;;  %vm281_vm12 = vweird.f32 %v2238_v43  ;;  %vm252_vm14 = vmor %vm250_vm10, %vm251_vm11 }
 0x238   :  { %v243_v49 = vsel %vm240_vm9, %v242_v33, %v238_v45  ;;  %v247_v50 = vsub.f32 1.0, %v246_v44  ;;  %vm282_vm15 = vmor %vm280_vm13, %vm281_vm12  ;;  %vm265_vm2 = vweird.f32 %v228_v37  ;;  %v269_v3 = vand.u32 2147483647, %v228_v37 }
 0x239   :  { %303 = vperm.xlu2 %2213, %v243_v49   ;;  %v277_v51 = vsub.f32 1.0, %v276_v47  ;;  %vm291_vm8 = vcmask 412672   ;;  %vm444_vm10 = vcmask 1040384   ;;  %vm447_vm11 = vcmask 1041408  }
 0x23a   :  { %v248_v54 = vmul.f32 %v2236_v36, %v247_v50  ;;  %v271_v50 = vand.u32 2147483648, %v228_v37  ;;  %vm270_vm7 = vcmp.eq.f32.partialorder %v269_v3, 8.507059e+37  ;;  %vm450_vm12 = vcmask 1042432  }
 0x23b   :  { %v278_v61 = vmul.f32 %v2238_v43, %v277_v51  ;;  %vm540_vm13 = vcmask 130048  }
 0x23c   :  { %v249_v13 = vadd.f32 %v2236_v36, %v248_v54 }
 0x23d   :  { %v2240_v5 = vpop.eup %2239  ;;  %v279_v18 = vadd.f32 %v2238_v43, %v278_v61  ;;  %v2600_v59 = vpop.permute.xlu2 %1520 }
 0x23e   :  { %v253_v30 = vsel %vm252_vm14, %v2236_v36, %v249_v13  ;;  %v261_v33 = vmul.f32 %v2240_v5, %v228_v37  ;;  %vm266_vm5 = vweird.f32 %v2240_v5  ;;  %v272_v36 = vor.u32 1.1754944e-38, %v271_v50  ;;  %4130 = vst [vmem:[#allocation18_spill] sm:$0xff] %v2600_v59 }
 0x23f   :  { %v283_v38 = vsel %vm282_vm15, %v2238_v43, %v279_v18  ;;  %v258_v44 = vsel %vm255_vm0, %v257_v26, %v253_v30  ;;  %vm267_vm6 = vmor %vm265_vm2, %vm266_vm5  ;;  %v2596_v43 = vpop.permute.xlu1 %929  ;;  %vm592_vm14 = vcmask 916480   ;;  %vm623_vm15 = vcmask 785408  }
 0x240   :  { %v288_v45 = vsel %vm285_vm1, %v287_v29, %v283_v38  ;;  %308 = vperm.xlu0 %2215, %v258_v44   ;;  %v262_v47 = vsub.f32 1.0, %v261_v33  ;;  %4129 = vst [vmem:[#allocation17_spill] sm:$0xff] %v2596_v43  ;;  %vm654_vm0 = vcmask 654336  }
 0x241   :  { %318 = vperm.xlu1 %2216, %v288_v45   ;;  %2214 = vset.pattern.permute.xlu2 %v2269_v31 }
 0x242   :  { %383 = vperm.xlu2 %2214, %v243_v49   ;;  %v263_v6 = vmul.f32 %v2240_v5, %v262_v47 }
 0x244   :  { %v264_v51 = vadd.f32 %v2240_v5, %v263_v6 }
 0x245   :  { %v2605_v49 = vpop.permute.xlu2 %1550 }
 0x246   :  { %v268_v53 = vsel %vm267_vm6, %v2240_v5, %v264_v51  ;;  %4132 = vst [vmem:[#allocation20_spill] sm:$0xff] %v2605_v49 }
 0x247   :  { %v273_v54 = vsel %vm270_vm7, %v272_v36, %v268_v53  ;;  %v2602_v37 = vpop.permute.xlu1 %959 }
 0x248   :  { %4131 = vst [vmem:[#allocation19_spill] sm:$0xff] %v2602_v37 }
 0x249   :  { %2217 = vset.pattern.permute.xlu1 %v2269_v31 }
 0x24a   :  { %387 = vperm.xlu1 %2217, %v258_v44   ;;  %2220 = vset.pattern.permute.xlu2 %v2261_v40 }
 0x24b   :  { %313 = vperm.xlu2 %2220, %v273_v54  }
 0x24d   :  { %v2609_v63 = vpop.permute.xlu2 %1580 }
 0x24e   :  { %4134 = vst [vmem:[#allocation22_spill] sm:$0xff] %v2609_v63 }
 0x24f   :  { %v2607_v61 = vpop.permute.xlu1 %989 }
 0x250   :  { %4133 = vst [vmem:[#allocation21_spill] sm:$0xff] %v2607_v61 }
 0x252   :  { %395 = vperm.xlu1 %2217, %v288_v45  }
 0x253   :  { %2221 = vset.pattern.permute.xlu2 %v2269_v31  ;;  %v2623_v31 = vpop.permute.xlu0 %1122 }
 0x254   :  { %391 = vperm.xlu2 %2221, %v273_v54   ;;  %v4063_v54 = vmov 0.0  }
 0x255   :  { %v2613_v5 = vpop.permute.xlu2 %1599  ;;  %290 = vst [vmem:[#allocation2] sm:$0xf] %v4063_v54 }
 0x256   :  { %4136 = vst [vmem:[#allocation24_spill] sm:$0xff] %v2613_v5 }
 0x257   :  { %v2611_v13 = vpop.permute.xlu1 %1008  ;;  %292 = vst.msk [vmem:[#allocation2 + $0xc] sm:$0xf] %vm291_vm8, %v4063_v54 }
 0x258   :  { %4135 = vst [vmem:[#allocation23_spill] sm:$0xff] %v2611_v13 }
 0x25a   :  { %2218 = vset.pattern.permute.xlu1 %v2309_v32 }
 0x25b   :  { %v2629_v38 = vpop.permute.xlu0 %1170  ;;  %1815 = vperm.xlu1 %2218, %v2464_v39  }
 0x25d   :  { %v2617_v18 = vpop.permute.xlu2 %1629 }
 0x25e   :  { %4138 = vst [vmem:[#allocation26_spill] sm:$0xff] %v2617_v18 }
 0x25f   :  { %v2615_v40 = vpop.permute.xlu1 %1038 }
 0x260   :  { %4137 = vst [vmem:[#allocation25_spill] sm:$0xff] %v2615_v40 }
 0x263   :  { %v2635_v47 = vpop.permute.xlu0 %1207 }
 0x265   :  { %v2621_v29 = vpop.permute.xlu2 %1659 }
 0x266   :  { %4140 = vst [vmem:[#allocation28_spill] sm:$0xff] %v2621_v29 }
 0x267   :  { %v2619_v26 = vpop.permute.xlu1 %1068 }
 0x268   :  { %4139 = vst [vmem:[#allocation27_spill] sm:$0xff] %v2619_v26 }
 0x26b   :  { %v2641_v6 = vpop.permute.xlu0 %1255 }
 0x26c   :  { %4145 = vst [vmem:[#allocation33_spill] sm:$0xff] %v2641_v6 }
 0x26d   :  { %v2627_v33 = vpop.permute.xlu2 %1689 }
 0x26e   :  { %4142 = vst [vmem:[#allocation30_spill] sm:$0xff] %v2627_v33 }
 0x26f   :  { %v2625_v30 = vpop.permute.xlu1 %1098 }
 0x270   :  { %4141 = vst [vmem:[#allocation29_spill] sm:$0xff] %v2625_v30 }
 0x273   :  { %v2645_v53 = vpop.permute.xlu0 %1736 }
 0x274   :  { %4147 = vst [vmem:[#allocation35_spill] sm:$0xff] %v2645_v53 }
 0x275   :  { %v2633_v45 = vpop.permute.xlu2 %1766 }
 0x276   :  { %4143 = vst [vmem:[#allocation31_spill] sm:$0xff] %v2633_v45 }
 0x277   :  { %v2631_v44 = vpop.permute.xlu1 %1146 }
 0x27f   :  { %v2637_v50 = vpop.permute.xlu1 %1194 }
 0x287   :  { %v2643_v51 = vpop.permute.xlu1 %1231 }
 0x288   :  { %4146 = vst [vmem:[#allocation34_spill] sm:$0xff] %v2643_v51 }
 0x28f   :  { %v2648_v33 = vpop.permute.xlu1 %1796 }
 0x290   :  { %4148 = vst [vmem:[#allocation36_spill] sm:$0xff] %v2648_v33 }
 0x293   :  { %v2639_v3 = vpop.permute.xlu2 %303 }
 0x294   :  { %4144 = vst [vmem:[#allocation32_spill] sm:$0xff] %v2639_v3  ;;  %v321_v18 = vmul.f32 %v2639_v3, %v2362_v2  ;;  %v322_v5 = vmul.f32 %v2639_v3, %v2369_v4  ;;  %v2308_v3 = vmov 32.0  }
 0x295   :  { %2241 = vrcp.f32 %v2308_v3 }
 0x29b   :  { %v2673_v30 = vpop.eup %2241 }
 0x29c   :  { %v384_v36 = vpop.permute.xlu2 %383  ;;  %v348_v32 = vmul.f32 32.0, %v2673_v30  ;;  %vm352_vm9 = vweird.f32 %v2673_v30 }
 0x2a5   :  { %v2651_v45 = vpop.permute.xlu2 %313 }
 0x2a6   :  { %4149 = vst [vmem:[#allocation37_spill] sm:$0xff] %v2651_v45  ;;  %v325_v54 = vmul.f32 %v2651_v45, %v2352_v0  ;;  %v326_v59 = vmul.f32 %v2651_v45, %v2357_v1 }
 0x2a8   :  { %v356_v0 = vmax.f32 %v321_v18, %v325_v54  ;;  %v365_v46 = vmax.f32 %v322_v5, %v326_v59 }
 0x2b2   :  { %v2653_v29 = vpop.permute.xlu0 %308 }
 0x2b3   :  { %4150 = vst [vmem:[#allocation38_spill] sm:$0xff] %v2653_v29  ;;  %v2659_v63 = vpop.permute.xlu1 %318  ;;  %v323_v53 = vmul.f32 %v2653_v29, %v2388_v9  ;;  %v324_v33 = vmul.f32 %v2653_v29, %v2393_v10 }
 0x2b4   :  { %4151 = vst [vmem:[#allocation39_spill] sm:$0xff] %v2659_v63  ;;  %v327_v2 = vmul.f32 %v2659_v63, %v2378_v7  ;;  %v328_v4 = vmul.f32 %v2659_v63, %v2383_v8 }
 0x2b5   :  { %v329_v49 = vadd.f32 %v323_v53, %v321_v18  ;;  %v338_v52 = vadd.f32 %v324_v33, %v322_v5  ;;  %v392_v5 = vpop.permute.xlu2 %391 }
 0x2b6   :  { %v357_v29 = vmax.f32 %v323_v53, %v327_v2  ;;  %v366_v56 = vmax.f32 %v324_v33, %v328_v4 }
 0x2b7   :  { %v330_v9 = vadd.f32 %v329_v49, %v325_v54  ;;  %v339_v60 = vadd.f32 %v338_v52, %v326_v59  ;;  %v2683_v49 = vmul.f32 %v2404_v14, %v384_v36  ;;  %v2686_v59 = vmul.f32 %v2409_v15, %v384_v36 }
 0x2b8   :  { %v367_v52 = vmax.f32 %v365_v46, %v366_v56  ;;  %v2694_v46 = vmul.f32 %v2420_v19, %v392_v5  ;;  %v2697_v14 = vmul.f32 %v2425_v20, %v392_v5  ;;  %v349_v15 = vsub.f32 1.0, %v348_v32 }
 0x2b9   :  { %v331_v17 = vadd.f32 %v330_v9, %v327_v2  ;;  %v340_v10 = vadd.f32 %v339_v60, %v328_v4  ;;  %v358_v60 = vmax.f32 %v356_v0, %v357_v29  ;;  %4154 = vst [vmem:[#allocation42_spill] sm:$0xff] %v2683_v49  ;;  %v2310_v2 = vmov 34  }
 0x2ba   :  { %4155 = vst [vmem:[#allocation43_spill] sm:$0xff] %v2686_v59  ;;  %v368_v29 = vrot.slane %v367_v52, 4  ;;  %2219 = vset.pattern.permute.xlu1 %v2310_v2  ;;  %v426_v20 = vmax.f32 %v2683_v49, %v2694_v46 }
 0x2bb   :  { %v332_v41 = vrot.slane %v331_v17, 4  ;;  %v341_v1 = vrot.slane %v340_v10, 4  ;;  %4156 = vst [vmem:[#allocation44_spill] sm:$0xff] %v2694_v46  ;;  %1845 = vperm.xlu1 %2219, %v2464_v39  }
 0x2bc   :  { %v388_v45 = vpop.permute.xlu1 %387  ;;  %4157 = vst [vmem:[#allocation45_spill] sm:$0xff] %v2697_v14  ;;  %v369_v4 = vmax.f32 %v367_v52, %v368_v29 }
 0x2bd   :  { %v2676_v7 = vmul.f32 %v2440_v23, %v388_v45  ;;  %v2679_v8 = vmul.f32 %v2445_v24, %v388_v45  ;;  %v333_v18 = vadd.f32 %v332_v41, %v331_v17  ;;  %v342_v33 = vadd.f32 %v341_v1, %v340_v10 }
 0x2be   :  { %v359_v45 = vrot.slane %v358_v60, 4 }
 0x2bf   :  { %4152 = vst [vmem:[#allocation40_spill] sm:$0xff] %v2676_v7  ;;  %v406_v23 = vadd.f32 %v2676_v7, %v2683_v49  ;;  %v415_v24 = vadd.f32 %v2679_v8, %v2686_v59  ;;  %v334_v56 = vrot.slane %v333_v18, 2  ;;  %v343_v3 = vrot.slane %v342_v33, 2 }
 0x2c0   :  { %4153 = vst [vmem:[#allocation41_spill] sm:$0xff] %v2679_v8  ;;  %v360_v19 = vmax.f32 %v358_v60, %v359_v45  ;;  %v350_v60 = vmul.f32 %v2673_v30, %v349_v15 }
 0x2c1   :  { %v407_v41 = vadd.f32 %v406_v23, %v2694_v46  ;;  %v416_v17 = vadd.f32 %v415_v24, %v2697_v14  ;;  %v335_v0 = vadd.f32 %v334_v56, %v333_v18  ;;  %v344_v39 = vadd.f32 %v343_v3, %v342_v33 }
 0x2c2   :  { %v361_v32 = vrot.slane %v360_v19, 2  ;;  %v370_v23 = vrot.slane %v369_v4, 2 }
 0x2c3   :  { %v336_v18 = vrot.slane %v335_v0, 1  ;;  %v345_v2 = vrot.slane %v344_v39, 1 }
 0x2c4   :  { %v396_v36 = vpop.permute.xlu1 %395  ;;  %v362_v15 = vmax.f32 %v360_v19, %v361_v32  ;;  %v371_v33 = vmax.f32 %v369_v4, %v370_v23 }
 0x2c5   :  { %v2702_v53 = vmul.f32 %v2430_v21, %v396_v36  ;;  %v2705_v54 = vmul.f32 %v2435_v22, %v396_v36  ;;  %v435_v21 = vmax.f32 %v2686_v59, %v2697_v14 }
 0x2c7   :  { %4158 = vst [vmem:[#allocation46_spill] sm:$0xff] %v2702_v53  ;;  %v408_v9 = vadd.f32 %v407_v41, %v2702_v53  ;;  %v417_v10 = vadd.f32 %v416_v17, %v2705_v54  ;;  %v427_v22 = vmax.f32 %v2676_v7, %v2702_v53  ;;  %v436_v1 = vmax.f32 %v2679_v8, %v2705_v54 }
 0x2c8   :  { %4159 = vst [vmem:[#allocation47_spill] sm:$0xff] %v2705_v54  ;;  %v351_v17 = vadd.f32 %v2673_v30, %v350_v60  ;;  %v363_v60 = vrot.slane %v362_v15, 1 }
 0x2c9   :  { %v409_v52 = vrot.slane %v408_v9, 4  ;;  %v418_v5 = vrot.slane %v417_v10, 4  ;;  %v428_v24 = vmax.f32 %v426_v20, %v427_v22  ;;  %v437_v45 = vmax.f32 %v435_v21, %v436_v1 }
 0x2ca   :  { %v337_v20 = vadd.f32 %v336_v18, %v335_v0  ;;  %v346_v22 = vadd.f32 %v345_v2, %v344_v39 }
 0x2cb   :  { %v410_v29 = vadd.f32 %v409_v52, %v408_v9  ;;  %v419_v36 = vadd.f32 %v418_v5, %v417_v10  ;;  %v429_v56 = vrot.slane %v428_v24, 4  ;;  %v438_v41 = vrot.slane %v437_v45, 4 }
 0x2cc   :  { %v353_v10 = vsel %vm352_vm9, %v2673_v30, %v351_v17  ;;  %v372_v5 = vrot.slane %v371_v33, 1 }
 0x2cd   :  { %v411_v54 = vrot.slane %v410_v29, 2  ;;  %v420_v53 = vrot.slane %v419_v36, 2  ;;  %v430_v3 = vmax.f32 %v428_v24, %v429_v56  ;;  %v439_v14 = vmax.f32 %v437_v45, %v438_v41 }
 0x2ce   :  { %v354_v32 = vmul.f32 %v353_v10, %v337_v20  ;;  %v364_v45 = vmax.f32 %v362_v15, %v363_v60 }
 0x2cf   :  { %v412_v46 = vadd.f32 %v411_v54, %v410_v29  ;;  %v421_v8 = vadd.f32 %v420_v53, %v419_v36  ;;  %v431_v21 = vrot.slane %v430_v3, 2  ;;  %v440_v9 = vrot.slane %v439_v14, 2 }
 0x2d0   :  { %v355_v54 = vmul.f32 %v353_v10, %v346_v22  ;;  %v373_v29 = vmax.f32 %v371_v33, %v372_v5 }
 0x2d1   :  { %v413_v1 = vrot.slane %v412_v46, 1  ;;  %v422_v52 = vrot.slane %v421_v8, 1  ;;  %v432_v7 = vmax.f32 %v430_v3, %v431_v21  ;;  %v441_v59 = vmax.f32 %v439_v14, %v440_v9  ;;  %v2744_v9 = vld [vmem:[#allocation2 + $0xc] sm:$0xf] }
 0x2d2   :  { %4160 = vst [vmem:[#allocation48_spill] sm:$0xff] %v2744_v9 }
 0x2d3   :  { %v414_v19 = vadd.f32 %v413_v1, %v412_v46  ;;  %v423_v4 = vadd.f32 %v422_v52, %v421_v8  ;;  %v442_v53 = vrot.slane %v441_v59, 1  ;;  %v433_v24 = vrot.slane %v432_v7, 1 }
 0x2d5   :  { %v424_v0 = vmul.f32 %v414_v19, %v353_v10  ;;  %v425_v23 = vmul.f32 %v423_v4, %v353_v10  ;;  %v443_v30 = vmax.f32 %v441_v59, %v442_v53  ;;  %v434_v41 = vmax.f32 %v432_v7, %v433_v24 }
 0x2d7   :  { %v445_v39 = vsel %vm444_vm10, %v354_v32, %v424_v0  ;;  %v446_v36 = vsel %vm444_vm10, %v355_v54, %v425_v23 }
 0x2d8   :  { %v448_v18 = vsel %vm447_vm11, %v445_v39, %v364_v45  ;;  %v449_v56 = vsel %vm447_vm11, %v446_v36, %v373_v29 }
 0x2d9   :  { %v452_v14 = vsel %vm450_vm12, %v449_v56, %v443_v30  ;;  %v451_v8 = vsel %vm450_vm12, %v448_v18, %v434_v41 }
 0x2da   :  { %v455_v46 = vrot.slane %v452_v14, 4 }
 0x2dc   :  { %v2725_v17 = vsel %vm181_vm4, %v451_v8, %v455_v46  ;;  %vm477_vm4 = vcmask 392192  }
 0x2dd   :  { %458 = vst [vmem:[#allocation2 + $0x4] sm:$0xff] %v2725_v17 }
 0x2e4   :  { %v2728_v2 = vld [vmem:[#allocation2] sm:$0xff]  ;;  %v2730_v3 = vld [vmem:[#allocation2 + $0x8] sm:$0xf] }
 0x2e5   :  { %465 = vst [vmem:[#allocation1] ss:$2 sm:$0xff] %v2728_v2 }
 0x2e6   :  { %467 = vst [vmem:[#allocation1 + $0x10] ss:$2 sm:$0xff] %v2730_v3 }
 0x2ec   :  { %v468_v59 = vld.sshfl [vmem:[#allocation1] sm:$0xff pattern:$0x75316420]  ;;  %v469_v15 = vld.sshfl [vmem:[#allocation1 + $0x8] sm:$0xff pattern:$0x75316420] }
 0x2ed   :  { %v470_v33 = vld.sshfl [vmem:[#allocation1 + $0x10] sm:$0xff pattern:$0x75316420]  ;;  %498 = vst [vmem:[#allocation1] ss:$2 sm:$0xff] %v2728_v2  ;;  %473 = vrot.lane.b32.xlu2 %v469_v15, %s2311_s2  ;;  %471 = vrot.lane.b32.xlu0 %v468_v59, %s2311_s2 }
 0x2ee   :  { %500 = vst [vmem:[#allocation1 + $0x10] ss:$2 sm:$0xff] %v2730_v3  ;;  %475 = vrot.lane.b32.xlu1 %v470_v33, %s2311_s2 }
 0x2f4   :  { %v501_v7 = vld.sshfl [vmem:[#allocation1] sm:$0xff pattern:$0x75316420]  ;;  %v502_v20 = vld.sshfl [vmem:[#allocation1 + $0x8] sm:$0xff pattern:$0x75316420] }
 0x2f5   :  { %v503_v21 = vld.sshfl [vmem:[#allocation1 + $0x10] sm:$0xff pattern:$0x75316420]  ;;  %528 = vst [vmem:[#allocation1] ss:$2 sm:$0xff] %v2728_v2  ;;  %506 = vrot.lane.b32.xlu2 %v502_v20, %s2312_s7  ;;  %504 = vrot.lane.b32.xlu0 %v501_v7, %s2312_s7 }
 0x2f6   :  { %530 = vst [vmem:[#allocation1 + $0x10] ss:$2 sm:$0xff] %v2730_v3  ;;  %508 = vrot.lane.b32.xlu1 %v503_v21, %s2312_s7 }
 0x2fc   :  { %v531_v10 = vld.sshfl [vmem:[#allocation1] sm:$0xff pattern:$0x75316420]  ;;  %v532_v22 = vld.sshfl [vmem:[#allocation1 + $0x8] sm:$0xff pattern:$0x75316420] }
 0x2fd   :  { %v533_v1 = vld.sshfl [vmem:[#allocation1 + $0x10] sm:$0xff pattern:$0x75316420]  ;;  %560 = vst [vmem:[#allocation1] ss:$2 sm:$0xff] %v2725_v17  ;;  %536 = vrot.lane.b32.xlu2 %v532_v22, %s2313_s8  ;;  %534 = vrot.lane.b32.xlu0 %v531_v10, %s2313_s8 }
 0x2fe   :  { %582 = vst [vmem:[#allocation1 + $0x10] ss:$2 sm:$0xff] %v2744_v9  ;;  %538 = vrot.lane.b32.xlu1 %v533_v1, %s2313_s8  ;;  %v2796_v1 = vpop.permute.xlu1 %1815 }
 0x2ff   :  { %4161 = vst [vmem:[#allocation49_spill] sm:$0xff] %v2796_v1 }
 0x304   :  { %v561_v52 = vld.sshfl [vmem:[#allocation1] sm:$0xff pattern:$0x75316420]  ;;  %v562_v60 = vld.sshfl [vmem:[#allocation1 + $0x8] sm:$0xff pattern:$0x75316420] }
 0x305   :  { %580 = vst [vmem:[#allocation1] ss:$2 sm:$0xff] %v2725_v17  ;;  %v585_v5 = vld.sshfl [vmem:[#allocation1 + $0x10] sm:$0xff pattern:$0x75316420]  ;;  %567 = vrot.lane.b32.xlu2 %v562_v60, %s2314_s9  ;;  %565 = vrot.lane.b32.xlu0 %v561_v52, %s2314_s9 }
 0x306   :  { %613 = vst [vmem:[#allocation1 + $0x10] ss:$2 sm:$0xff] %v2744_v9  ;;  %590 = vrot.lane.b32.xlu1 %v585_v5, %s2315_s10 }
 0x30c   :  { %v583_v19 = vld.sshfl [vmem:[#allocation1] sm:$0xff pattern:$0x75316420]  ;;  %v584_v4 = vld.sshfl [vmem:[#allocation1 + $0x8] sm:$0xff pattern:$0x75316420] }
 0x30d   :  { %611 = vst [vmem:[#allocation1] ss:$2 sm:$0xff] %v2725_v17  ;;  %v616_v32 = vld.sshfl [vmem:[#allocation1 + $0x10] sm:$0xff pattern:$0x75316420]  ;;  %588 = vrot.lane.b32.xlu2 %v584_v4, %s2315_s10  ;;  %586 = vrot.lane.b32.xlu0 %v583_v19, %s2315_s10 }
 0x30e   :  { %644 = vst [vmem:[#allocation1 + $0x10] ss:$2 sm:$0xff] %v2744_v9  ;;  %621 = vrot.lane.b32.xlu1 %v616_v32, %s2316_s11 }
 0x314   :  { %v614_v53 = vld.sshfl [vmem:[#allocation1] sm:$0xff pattern:$0x75316420]  ;;  %v615_v54 = vld.sshfl [vmem:[#allocation1 + $0x8] sm:$0xff pattern:$0x75316420] }
 0x315   :  { %642 = vst [vmem:[#allocation1] ss:$2 sm:$0xff] %v2725_v17  ;;  %v647_v0 = vld.sshfl [vmem:[#allocation1 + $0x10] sm:$0xff pattern:$0x75316420]  ;;  %619 = vrot.lane.b32.xlu2 %v615_v54, %s2316_s11  ;;  %617 = vrot.lane.b32.xlu0 %v614_v53, %s2316_s11 }
 0x316   :  { %691 = vst [vmem:[#allocation1 + $0x10] ss:$2 sm:$0xff] %v2730_v3  ;;  %652 = vrot.lane.b32.xlu1 %v647_v0, %s2317_s12 }
 0x31c   :  { %v645_v23 = vld.sshfl [vmem:[#allocation1] sm:$0xff pattern:$0x75316420]  ;;  %v646_v24 = vld.sshfl [vmem:[#allocation1 + $0x8] sm:$0xff pattern:$0x75316420] }
 0x31d   :  { %689 = vst [vmem:[#allocation1] ss:$2 sm:$0xff] %v2728_v2  ;;  %v694_v45 = vld.sshfl [vmem:[#allocation1 + $0x10] sm:$0xff pattern:$0x75316420]  ;;  %650 = vrot.lane.b32.xlu2 %v646_v24, %s2317_s12  ;;  %648 = vrot.lane.b32.xlu0 %v645_v23, %s2317_s12 }
 0x31e   :  { %722 = vst [vmem:[#allocation1 + $0x10] ss:$2 sm:$0xff] %v2730_v3  ;;  %699 = vrot.lane.b32.xlu1 %v694_v45, %s2311_s2 }
 0x324   :  { %v692_v29 = vld.sshfl [vmem:[#allocation1] sm:$0xff pattern:$0x75316420]  ;;  %v693_v30 = vld.sshfl [vmem:[#allocation1 + $0x8] sm:$0xff pattern:$0x75316420] }
 0x325   :  { %720 = vst [vmem:[#allocation1] ss:$2 sm:$0xff] %v2728_v2  ;;  %v725_v39 = vld.sshfl [vmem:[#allocation1 + $0x10] sm:$0xff pattern:$0x75316420]  ;;  %697 = vrot.lane.b32.xlu2 %v693_v30, %s2311_s2  ;;  %695 = vrot.lane.b32.xlu0 %v692_v29, %s2311_s2 }
 0x326   :  { %752 = vst [vmem:[#allocation1 + $0x10] ss:$2 sm:$0xff] %v2730_v3  ;;  %730 = vrot.lane.b32.xlu1 %v725_v39, %s2312_s7 }
 0x32c   :  { %v723_v36 = vld.sshfl [vmem:[#allocation1] sm:$0xff pattern:$0x75316420]  ;;  %v724_v18 = vld.sshfl [vmem:[#allocation1 + $0x8] sm:$0xff pattern:$0x75316420] }
 0x32d   :  { %750 = vst [vmem:[#allocation1] ss:$2 sm:$0xff] %v2728_v2  ;;  %v755_v56 = vld.sshfl [vmem:[#allocation1 + $0x10] sm:$0xff pattern:$0x75316420]  ;;  %728 = vrot.lane.b32.xlu2 %v724_v18, %s2312_s7  ;;  %726 = vrot.lane.b32.xlu0 %v723_v36, %s2312_s7  ;;  %v2808_v32 = vpop.permute.xlu1 %1845 }
 0x32e   :  { %801 = vst [vmem:[#allocation1 + $0x10] ss:$2 sm:$0xff] %v2744_v9  ;;  %760 = vrot.lane.b32.xlu1 %v755_v56, %s2313_s8 }
 0x32f   :  { %4162 = vst [vmem:[#allocation50_spill] sm:$0xff] %v2808_v32 }
 0x334   :  { %v753_v41 = vld.sshfl [vmem:[#allocation1] sm:$0xff pattern:$0x75316420]  ;;  %v754_v14 = vld.sshfl [vmem:[#allocation1 + $0x8] sm:$0xff pattern:$0x75316420] }
 0x335   :  { %780 = vst [vmem:[#allocation1] ss:$2 sm:$0xff] %v2725_v17  ;;  %v804_v46 = vld.sshfl [vmem:[#allocation1 + $0x10] sm:$0xff pattern:$0x75316420]  ;;  %758 = vrot.lane.b32.xlu2 %v754_v14, %s2313_s8  ;;  %756 = vrot.lane.b32.xlu0 %v753_v41, %s2313_s8 }
 0x336   :  { %831 = vst [vmem:[#allocation1 + $0x10] ss:$2 sm:$0xff] %v2744_v9  ;;  %809 = vrot.lane.b32.xlu1 %v804_v46, %s2315_s10 }
 0x33c   :  { %v781_v8 = vld.sshfl [vmem:[#allocation1] sm:$0xff pattern:$0x75316420]  ;;  %v782_v59 = vld.sshfl [vmem:[#allocation1 + $0x8] sm:$0xff pattern:$0x75316420] }
 0x33d   :  { %799 = vst [vmem:[#allocation1] ss:$2 sm:$0xff] %v2725_v17  ;;  %v834_v15 = vld.sshfl [vmem:[#allocation1 + $0x10] sm:$0xff pattern:$0x75316420]  ;;  %787 = vrot.lane.b32.xlu2 %v782_v59, %s2318_s13  ;;  %785 = vrot.lane.b32.xlu0 %v781_v8, %s2318_s13 }
 0x33e   :  { %861 = vst [vmem:[#allocation1 + $0x10] ss:$2 sm:$0xff] %v2744_v9  ;;  %839 = vrot.lane.b32.xlu1 %v834_v15, %s2316_s11 }
 0x344   :  { %v802_v33 = vld.sshfl [vmem:[#allocation1] sm:$0xff pattern:$0x75316420]  ;;  %v803_v7 = vld.sshfl [vmem:[#allocation1 + $0x8] sm:$0xff pattern:$0x75316420] }
 0x345   :  { %829 = vst [vmem:[#allocation1] ss:$2 sm:$0xff] %v2725_v17  ;;  %v864_v20 = vld.sshfl [vmem:[#allocation1 + $0x10] sm:$0xff pattern:$0x75316420]  ;;  %807 = vrot.lane.b32.xlu2 %v803_v7, %s2315_s10  ;;  %805 = vrot.lane.b32.xlu0 %v802_v33, %s2315_s10 }
 0x346   :  { %907 = vst [vmem:[#allocation1 + $0x10] ss:$2 sm:$0xff] %v2730_v3  ;;  %869 = vrot.lane.b32.xlu1 %v864_v20, %s2317_s12 }
 0x347   :  { %v474_v21 = vpop.permute.xlu2 %473 }
 0x34c   :  { %v832_v10 = vld.sshfl [vmem:[#allocation1] sm:$0xff pattern:$0x75316420]  ;;  %v833_v22 = vld.sshfl [vmem:[#allocation1 + $0x8] sm:$0xff pattern:$0x75316420] }
 0x34d   :  { %859 = vst [vmem:[#allocation1] ss:$2 sm:$0xff] %v2725_v17  ;;  %v910_v52 = vld.sshfl [vmem:[#allocation1 + $0x10] sm:$0xff pattern:$0x75316420]  ;;  %837 = vrot.lane.b32.xlu2 %v833_v22, %s2316_s11  ;;  %835 = vrot.lane.b32.xlu0 %v832_v10, %s2316_s11 }
 0x34e   :  { %938 = vst [vmem:[#allocation1 + $0x10] ss:$2 sm:$0xff] %v2730_v3  ;;  %915 = vrot.lane.b32.xlu1 %v910_v52, %s2311_s2 }
 0x34f   :  { %v507_v60 = vpop.permute.xlu2 %506 }
 0x354   :  { %v862_v5 = vld.sshfl [vmem:[#allocation1] sm:$0xff pattern:$0x75316420]  ;;  %v863_v19 = vld.sshfl [vmem:[#allocation1 + $0x8] sm:$0xff pattern:$0x75316420] }
 0x355   :  { %905 = vst [vmem:[#allocation1] ss:$2 sm:$0xff] %v2728_v2  ;;  %v941_v4 = vld.sshfl [vmem:[#allocation1 + $0x10] sm:$0xff pattern:$0x75316420]  ;;  %867 = vrot.lane.b32.xlu2 %v863_v19, %s2317_s12  ;;  %865 = vrot.lane.b32.xlu0 %v862_v5, %s2317_s12 }
 0x356   :  { %968 = vst [vmem:[#allocation1 + $0x10] ss:$2 sm:$0xff] %v2730_v3  ;;  %946 = vrot.lane.b32.xlu1 %v941_v4, %s2312_s7 }
 0x357   :  { %v2810_v53 = vpop.permute.xlu2 %536 }
 0x35c   :  { %v908_v54 = vld.sshfl [vmem:[#allocation1] sm:$0xff pattern:$0x75316420]  ;;  %v909_v0 = vld.sshfl [vmem:[#allocation1 + $0x8] sm:$0xff pattern:$0x75316420] }
 0x35d   :  { %936 = vst [vmem:[#allocation1] ss:$2 sm:$0xff] %v2728_v2  ;;  %v971_v23 = vld.sshfl [vmem:[#allocation1 + $0x10] sm:$0xff pattern:$0x75316420]  ;;  %913 = vrot.lane.b32.xlu2 %v909_v0, %s2311_s2  ;;  %911 = vrot.lane.b32.xlu0 %v908_v54, %s2311_s2 }
 0x35e   :  { %976 = vrot.lane.b32.xlu1 %v971_v23, %s2313_s8  ;;  %1017 = vst [vmem:[#allocation1 + $0x10] ss:$2 sm:$0xff] %v2744_v9 }
 0x35f   :  { %v472_v24 = vpop.permute.xlu0 %471  ;;  %v2817_v45 = vpop.permute.xlu2 %567 }
 0x360   :  { %v476_v29 = vpop.permute.xlu1 %475  ;;  %v478_v18 = vsel %vm477_vm4, %v472_v24, %v474_v21 }
 0x361   :  { %v479_v36 = vsel %vm477_vm4, %v474_v21, %v476_v29 }
 0x364   :  { %v939_v30 = vld.sshfl [vmem:[#allocation1] sm:$0xff pattern:$0x75316420]  ;;  %v940_v39 = vld.sshfl [vmem:[#allocation1 + $0x8] sm:$0xff pattern:$0x75316420] }
 0x365   :  { %966 = vst [vmem:[#allocation1] ss:$2 sm:$0xff] %v2728_v2  ;;  %484 = vrot.lane.b32.xlu2 %v479_v36, %s2314_s9  ;;  %482 = vrot.lane.b32.xlu0 %v478_v18, %s2314_s9  ;;  %v1020_v56 = vld.sshfl [vmem:[#allocation1 + $0x10] sm:$0xff pattern:$0x75316420] }
 0x366   :  { %1025 = vrot.lane.b32.xlu1 %v1020_v56, %s2315_s10  ;;  %1047 = vst [vmem:[#allocation1 + $0x10] ss:$2 sm:$0xff] %v2744_v9 }
 0x367   :  { %v505_v41 = vpop.permute.xlu0 %504  ;;  %v2826_v14 = vpop.permute.xlu2 %588 }
 0x368   :  { %v509_v46 = vpop.permute.xlu1 %508  ;;  %v510_v52 = vsel %vm138_vm3, %v505_v41, %v507_v60 }
 0x369   :  { %v511_v22 = vsel %vm138_vm3, %v507_v60, %v509_v46 }
 0x36c   :  { %v969_v8 = vld.sshfl [vmem:[#allocation1] sm:$0xff pattern:$0x75316420]  ;;  %v970_v59 = vld.sshfl [vmem:[#allocation1 + $0x8] sm:$0xff pattern:$0x75316420] }
 0x36d   :  { %996 = vst [vmem:[#allocation1] ss:$2 sm:$0xff] %v2725_v17  ;;  %944 = vrot.lane.b32.xlu2 %v940_v39, %s2312_s7  ;;  %942 = vrot.lane.b32.xlu0 %v939_v30, %s2312_s7  ;;  %v1050_v15 = vld.sshfl [vmem:[#allocation1 + $0x10] sm:$0xff pattern:$0x75316420] }
 0x36e   :  { %1055 = vrot.lane.b32.xlu1 %v1050_v15, %s2316_s11  ;;  %1077 = vst [vmem:[#allocation1 + $0x10] ss:$2 sm:$0xff] %v2744_v9 }
 0x36f   :  { %v535_v33 = vpop.permute.xlu0 %534  ;;  %v2833_v7 = vpop.permute.xlu2 %619 }
 0x370   :  { %v539_v20 = vpop.permute.xlu1 %538  ;;  %v541_v56 = vsel %vm540_vm13, %v535_v33, %v2810_v53 }
 0x371   :  { %v542_v18 = vsel %vm540_vm13, %v2810_v53, %v539_v20 }
 0x374   :  { %v997_v21 = vld.sshfl [vmem:[#allocation1] sm:$0xff pattern:$0x75316420]  ;;  %v998_v10 = vld.sshfl [vmem:[#allocation1 + $0x8] sm:$0xff pattern:$0x75316420] }
 0x375   :  { %1015 = vst [vmem:[#allocation1] ss:$2 sm:$0xff] %v2725_v17  ;;  %516 = vrot.lane.b32.xlu2 %v511_v22, %s2314_s9  ;;  %514 = vrot.lane.b32.xlu0 %v510_v52, %s2314_s9  ;;  %v1080_v5 = vld.sshfl [vmem:[#allocation1 + $0x10] sm:$0xff pattern:$0x75316420] }
 0x376   :  { %1085 = vrot.lane.b32.xlu1 %v1080_v5, %s2317_s12  ;;  %1127 = vst [vmem:[#allocation1 + $0x10] ss:$2 sm:$0xff] %v2730_v3 }
 0x377   :  { %v2842_v19 = vpop.permute.xlu0 %565  ;;  %v2844_v4 = vpop.permute.xlu2 %650 }
 0x378   :  { %v2846_v54 = vpop.permute.xlu1 %590 }
 0x37c   :  { %v1018_v0 = vld.sshfl [vmem:[#allocation1] sm:$0xff pattern:$0x75316420]  ;;  %v1019_v23 = vld.sshfl [vmem:[#allocation1 + $0x8] sm:$0xff pattern:$0x75316420] }
 0x37d   :  { %1045 = vst [vmem:[#allocation1] ss:$2 sm:$0xff] %v2725_v17  ;;  %974 = vrot.lane.b32.xlu2 %v970_v59, %s2313_s8  ;;  %972 = vrot.lane.b32.xlu0 %v969_v8, %s2313_s8  ;;  %v1130_v60 = vld.sshfl [vmem:[#allocation1 + $0x10] sm:$0xff pattern:$0x75316420] }
 0x37e   :  { %1151 = vst [vmem:[#allocation1 + $0x10] ss:$2 sm:$0xff] %v2730_v3 }
 0x37f   :  { %v587_v24 = vpop.permute.xlu0 %586  ;;  %v2852_v29 = vpop.permute.xlu2 %697 }
 0x380   :  { %v2854_v30 = vpop.permute.xlu1 %621 }
 0x384   :  { %v1048_v39 = vld.sshfl [vmem:[#allocation1] sm:$0xff pattern:$0x75316420]  ;;  %v2856_v36 = vld.sshfl [vmem:[#allocation1 + $0x8] sm:$0xff pattern:$0x75316420] }
 0x385   :  { %1075 = vst [vmem:[#allocation1] ss:$2 sm:$0xff] %v2725_v17  ;;  %v1154_v41 = vld.sshfl [vmem:[#allocation1 + $0x10] sm:$0xff pattern:$0x75316420]  ;;  %547 = vrot.lane.b32.xlu2 %v542_v18, %s2314_s9  ;;  %545 = vrot.lane.b32.xlu0 %v541_v56, %s2314_s9 }
 0x386   :  { %1159 = vrot.lane.b32.xlu1 %v1154_v41, %s2312_s7  ;;  %1175 = vst [vmem:[#allocation1 + $0x10] ss:$2 sm:$0xff] %v2730_v3 }
 0x387   :  { %v618_v46 = vpop.permute.xlu0 %617  ;;  %v2867_v8 = vpop.permute.xlu2 %728 }
 0x388   :  { %v2869_v59 = vpop.permute.xlu1 %652 }
 0x38c   :  { %v2871_v15 = vld.sshfl [vmem:[#allocation1] sm:$0xff pattern:$0x75316420]  ;;  %v2873_v20 = vld.sshfl [vmem:[#allocation1 + $0x8] sm:$0xff pattern:$0x75316420] }
 0x38d   :  { %1125 = vst [vmem:[#allocation1] ss:$2 sm:$0xff] %v2728_v2  ;;  %1003 = vrot.lane.b32.xlu2 %v998_v10, %s2319_s14  ;;  %1001 = vrot.lane.b32.xlu0 %v997_v21, %s2319_s14  ;;  %v2878_v53 = vld.sshfl [vmem:[#allocation1 + $0x10] sm:$0xff pattern:$0x75316420] }
 0x38e   :  { %1212 = vst [vmem:[#allocation1 + $0x10] ss:$2 sm:$0xff] %v2744_v9 }
 0x38f   :  { %v2881_v33 = vpop.permute.xlu0 %648  ;;  %v2883_v22 = vpop.permute.xlu2 %758 }
 0x390   :  { %v2885_v52 = vpop.permute.xlu1 %699 }
 0x394   :  { %v2887_v5 = vld.sshfl [vmem:[#allocation1] sm:$0xff pattern:$0x75316420]  ;;  %v1129_v18 = vld.sshfl [vmem:[#allocation1 + $0x8] sm:$0xff pattern:$0x75316420] }
 0x395   :  { %1149 = vst [vmem:[#allocation1] ss:$2 sm:$0xff] %v2728_v2  ;;  %1023 = vrot.lane.b32.xlu2 %v1019_v23, %s2315_s10  ;;  %1021 = vrot.lane.b32.xlu0 %v1018_v0, %s2315_s10  ;;  %v2892_v21 = vld.sshfl [vmem:[#allocation1 + $0x10] sm:$0xff pattern:$0x75316420]  ;;  %v593_v0 = vsel %vm592_vm14, %v587_v24, %v2826_v14 }
 0x396   :  { %1133 = vrot.lane.b32.xlu1 %v1129_v18, %s2311_s2  ;;  %1236 = vst [vmem:[#allocation1 + $0x10] ss:$2 sm:$0xff] %v2744_v9 }
 0x397   :  { %v2896_v10 = vpop.permute.xlu0 %695  ;;  %v2898_v56 = vpop.permute.xlu2 %787 }
 0x398   :  { %4163 = vst [vmem:[#allocation51_spill] sm:$0xff] %v2898_v56  ;;  %v2900_v41 = vpop.permute.xlu1 %730  ;;  %v701_v48 = vsel %vm477_vm4, %v2896_v10, %v2852_v29 }
 0x39c   :  { %v2902_v49 = vld.sshfl [vmem:[#allocation1] sm:$0xff pattern:$0x75316420]  ;;  %v2904_v63 = vld.sshfl [vmem:[#allocation1 + $0x8] sm:$0xff pattern:$0x75316420] }
 0x39d   :  { %1173 = vst [vmem:[#allocation1] ss:$2 sm:$0xff] %v2728_v2  ;;  %1135 = vrot.lane.b32.xlu2 %v1130_v60, %s2311_s2  ;;  %597 = vrot.lane.b32.xlu0 %v593_v0, %s2314_s9  ;;  %v1239_v23 = vld.sshfl [vmem:[#allocation1 + $0x10] sm:$0xff pattern:$0x75316420]  ;;  %v594_v60 = vsel %vm592_vm14, %v2826_v14, %v2846_v54 }
 0x39e   :  { %1244 = vrot.lane.b32.xlu1 %v1239_v23, %s2316_s11  ;;  %1260 = vst [vmem:[#allocation1 + $0x10] ss:$2 sm:$0xff] %v2744_v9 }
 0x39f   :  { %v2913_v18 = vpop.permute.xlu0 %726  ;;  %v2915_v32 = vpop.permute.xlu2 %807 }
 0x3a0   :  { %v2917_v1 = vpop.permute.xlu1 %760 }
 0x3a4   :  { %v2919_v26 = vld.sshfl [vmem:[#allocation1] sm:$0xff pattern:$0x75316420]  ;;  %v1177_v24 = vld.sshfl [vmem:[#allocation1 + $0x8] sm:$0xff pattern:$0x75316420] }
 0x3a5   :  { %1197 = vst [vmem:[#allocation1] ss:$2 sm:$0xff] %v2725_v17  ;;  %599 = vrot.lane.b32.xlu2 %v594_v60, %s2314_s9  ;;  %1051 = vrot.lane.b32.xlu0 %v1048_v39, %s2316_s11  ;;  %v2927_v0 = vld.sshfl [vmem:[#allocation1 + $0x10] sm:$0xff pattern:$0x75316420]  ;;  %v624_v39 = vsel %vm623_vm15, %v618_v46, %v2833_v7  ;;  %v625_v46 = vsel %vm623_vm15, %v2833_v7, %v2854_v30 }
 0x3a6   :  { %1181 = vrot.lane.b32.xlu1 %v1177_v24, %s2313_s8  ;;  %1282 = vst [vmem:[#allocation1 + $0x10] ss:$2 sm:$0xff] %v2730_v3 }
 0x3a7   :  { %v2931_v23 = vpop.permute.xlu0 %756  ;;  %v2933_v40 = vpop.permute.xlu2 %837 }
 0x3a8   :  { %v2935_v13 = vpop.permute.xlu1 %809 }
 0x3ac   :  { %v2937_v14 = vld.sshfl [vmem:[#allocation1] sm:$0xff pattern:$0x75316420]  ;;  %v2939_v54 = vld.sshfl [vmem:[#allocation1 + $0x8] sm:$0xff pattern:$0x75316420] }
 0x3ad   :  { %4164 = vst [vmem:[#allocation52_spill] sm:$0xff] %v2937_v14  ;;  %1053 = vrot.lane.b32.xlu2 %v2856_v36, %s2316_s11  ;;  %628 = vrot.lane.b32.xlu0 %v624_v39, %s2314_s9  ;;  %v2947_v24 = vld.sshfl [vmem:[#allocation1 + $0x10] sm:$0xff pattern:$0x75316420] }
 0x3ae   :  { %1210 = vst [vmem:[#allocation1] ss:$2 sm:$0xff] %v2725_v17 }
 0x3af   :  { %1313 = vst [vmem:[#allocation1 + $0x10] ss:$2 sm:$0xff] %v2730_v3  ;;  %v2950_v60 = vpop.permute.xlu0 %785  ;;  %v2952_v61 = vpop.permute.xlu2 %867 }
 0x3b0   :  { %4165 = vst [vmem:[#allocation53_spill] sm:$0xff] %v2950_v60  ;;  %v2959_v12 = vpop.permute.xlu1 %839 }
 0x3b5   :  { %v2954_v37 = vld.sshfl [vmem:[#allocation1] sm:$0xff pattern:$0x75316420]  ;;  %v1214_v43 = vld.sshfl [vmem:[#allocation1 + $0x8] sm:$0xff pattern:$0x75316420]  ;;  %630 = vrot.lane.b32.xlu2 %v625_v46, %s2314_s9  ;;  %1081 = vrot.lane.b32.xlu0 %v2871_v15, %s2317_s12  ;;  %v655_v46 = vsel %vm654_vm0, %v2881_v33, %v2844_v4 }
 0x3b6   :  { %1234 = vst [vmem:[#allocation1] ss:$2 sm:$0xff] %v2725_v17  ;;  %v2965_v36 = vld.sshfl [vmem:[#allocation1 + $0x10] sm:$0xff pattern:$0x75316420]  ;;  %1218 = vrot.lane.b32.xlu1 %v1214_v43, %s2315_s10 }
 0x3b7   :  { %1343 = vst [vmem:[#allocation1 + $0x10] ss:$2 sm:$0xff] %v2730_v3  ;;  %v2969_v39 = vpop.permute.xlu0 %805  ;;  %v2971_v27 = vpop.permute.xlu2 %913 }
 0x3b8   :  { %v2986_v15 = vpop.permute.xlu1 %869 }
 0x3b9   :  { %4166 = vst [vmem:[#allocation54_spill] sm:$0xff] %v2986_v15 }
 0x3bd   :  { %v2973_v7 = vld.sshfl [vmem:[#allocation1] sm:$0xff pattern:$0x75316420]  ;;  %v2975_v30 = vld.sshfl [vmem:[#allocation1 + $0x8] sm:$0xff pattern:$0x75316420]  ;;  %1083 = vrot.lane.b32.xlu2 %v2873_v20, %s2317_s12  ;;  %659 = vrot.lane.b32.xlu0 %v655_v46, %s2314_s9 }
 0x3be   :  { %1258 = vst [vmem:[#allocation1] ss:$2 sm:$0xff] %v2725_v17  ;;  %v2984_v43 = vld.sshfl [vmem:[#allocation1 + $0x10] sm:$0xff pattern:$0x75316420] }
 0x3bf   :  { %1392 = vst [vmem:[#allocation1 + $0x10] ss:$2 sm:$0xff] %v2744_v9  ;;  %v2989_v6 = vpop.permute.xlu0 %835  ;;  %v2991_v51 = vpop.permute.xlu2 %484 }
 0x3c0   :  { %v3010_v56 = vpop.permute.xlu1 %915 }
 0x3c1   :  { %4169 = vst [vmem:[#allocation57_spill] sm:$0xff] %v3010_v56 }
 0x3c5   :  { %v2993_v57 = vld.sshfl [vmem:[#allocation1] sm:$0xff pattern:$0x75316420]  ;;  %v1262_v33 = vld.sshfl [vmem:[#allocation1 + $0x8] sm:$0xff pattern:$0x75316420]  ;;  %1183 = vrot.lane.b32.xlu2 %v2878_v53, %s2313_s8  ;;  %705 = vrot.lane.b32.xlu0 %v701_v48, %s2318_s13  ;;  %v656_v53 = vsel %vm654_vm0, %v2844_v4, %v2869_v59 }
 0x3c6   :  { %1280 = vst [vmem:[#allocation1] ss:$2 sm:$0xff] %v2728_v2  ;;  %v3002_v20 = vld.sshfl [vmem:[#allocation1 + $0x10] sm:$0xff pattern:$0x75316420]  ;;  %1266 = vrot.lane.b32.xlu1 %v1262_v33, %s2317_s12 }
 0x3c7   :  { %4167 = vst [vmem:[#allocation55_spill] sm:$0xff] %v3002_v20  ;;  %v3006_v46 = vpop.permute.xlu0 %865  ;;  %v3008_v60 = vpop.permute.xlu2 %944 }
 0x3c8   :  { %1422 = vst [vmem:[#allocation1 + $0x10] ss:$2 sm:$0xff] %v2744_v9  ;;  %v3029_v42 = vpop.permute.xlu1 %946 }
 0x3c9   :  { %4168 = vst [vmem:[#allocation56_spill] sm:$0xff] %v3008_v60 }
 0x3ca   :  { %4171 = vst [vmem:[#allocation59_spill] sm:$0xff] %v3029_v42 }
 0x3cd   :  { %v1283_v10 = vld.sshfl [vmem:[#allocation1] sm:$0xff pattern:$0x75316420]  ;;  %v3012_v14 = vld.sshfl [vmem:[#allocation1 + $0x8] sm:$0xff pattern:$0x75316420]  ;;  %661 = vrot.lane.b32.xlu2 %v656_v53, %s2314_s9  ;;  %1155 = vrot.lane.b32.xlu0 %v2902_v49, %s2312_s7  ;;  %v732_v53 = vsel %vm138_vm3, %v2913_v18, %v2867_v8 }
 0x3ce   :  { %1311 = vst [vmem:[#allocation1] ss:$2 sm:$0xff] %v2728_v2  ;;  %1286 = vrot.lane.b32.xlu1 %v1283_v10, %s2311_s2 }
 0x3cf   :  { %v3021_v48 = vld.sshfl [vmem:[#allocation1 + $0x10] sm:$0xff pattern:$0x75316420]  ;;  %v3025_v33 = vpop.permute.xlu0 %911  ;;  %v3027_v56 = vpop.permute.xlu2 %516 }
 0x3d0   :  { %4170 = vst [vmem:[#allocation58_spill] sm:$0xff] %v3021_v48  ;;  %v3050_v18 = vpop.permute.xlu1 %976 }
 0x3d1   :  { %1452 = vst [vmem:[#allocation1 + $0x10] ss:$2 sm:$0xff] %v2744_v9 }
 0x3d2   :  { %4173 = vst [vmem:[#allocation61_spill] sm:$0xff] %v3050_v18 }
 0x3d5   :  { %v1314_v4 = vld.sshfl [vmem:[#allocation1] sm:$0xff pattern:$0x75316420]  ;;  %v3031_v59 = vld.sshfl [vmem:[#allocation1 + $0x8] sm:$0xff pattern:$0x75316420]  ;;  %1131 = vrot.lane.b32.xlu2 %v2887_v5, %s2311_s2  ;;  %736 = vrot.lane.b32.xlu0 %v732_v53, %s2318_s13  ;;  %v762_v5 = vsel %vm540_vm13, %v2931_v23, %v2883_v22  ;;  %v702_v23 = vsel %vm477_vm4, %v2852_v29, %v2885_v52 }
 0x3d6   :  { %1341 = vst [vmem:[#allocation1] ss:$2 sm:$0xff] %v2728_v2  ;;  %1317 = vrot.lane.b32.xlu1 %v1314_v4, %s2312_s7 }
 0x3d7   :  { %v3044_v10 = vpop.permute.xlu0 %482  ;;  %v3046_v42 = vpop.permute.xlu2 %974 }
 0x3d8   :  { %v3040_v49 = vld.sshfl [vmem:[#allocation1 + $0x10] sm:$0xff pattern:$0x75316420] }
 0x3d9   :  { %4172 = vst [vmem:[#allocation60_spill] sm:$0xff] %v3040_v49 }
 0x3da   :  { %1498 = vst [vmem:[#allocation1 + $0x10] ss:$2 sm:$0xff] %v2730_v3 }
 0x3dd   :  { %v1344_v48 = vld.sshfl [vmem:[#allocation1] sm:$0xff pattern:$0x75316420]  ;;  %v3048_v15 = vld.sshfl [vmem:[#allocation1 + $0x8] sm:$0xff pattern:$0x75316420]  ;;  %1220 = vrot.lane.b32.xlu2 %v2892_v21, %s2315_s10  ;;  %766 = vrot.lane.b32.xlu0 %v762_v5, %s2318_s13  ;;  %v3072_v21 = vpop.permute.xlu1 %1025  ;;  %v811_v5 = vsel %vm592_vm14, %v2969_v39, %v2915_v32 }
 0x3de   :  { %1371 = vst [vmem:[#allocation1] ss:$2 sm:$0xff] %v2725_v17  ;;  %1347 = vrot.lane.b32.xlu1 %v1344_v48, %s2313_s8 }
 0x3df   :  { %v3063_v53 = vpop.permute.xlu0 %942  ;;  %v3065_v18 = vpop.permute.xlu2 %547  ;;  %4175 = vst [vmem:[#allocation63_spill] sm:$0xff] %v3072_v21 }
 0x3e1   :  { %v3059_v4 = vld.sshfl [vmem:[#allocation1 + $0x10] sm:$0xff pattern:$0x75316420] }
 0x3e2   :  { %4174 = vst [vmem:[#allocation62_spill] sm:$0xff] %v3059_v4 }
 0x3e3   :  { %1529 = vst [vmem:[#allocation1 + $0x10] ss:$2 sm:$0xff] %v2730_v3 }
 0x3e5   :  { %v1372_v49 = vld.sshfl [vmem:[#allocation1] sm:$0xff pattern:$0x75316420]  ;;  %v3067_v20 = vld.sshfl [vmem:[#allocation1 + $0x8] sm:$0xff pattern:$0x75316420]  ;;  %707 = vrot.lane.b32.xlu2 %v702_v23, %s2318_s13  ;;  %815 = vrot.lane.b32.xlu0 %v811_v5, %s2318_s13 }
 0x3e6   :  { %1390 = vst [vmem:[#allocation1] ss:$2 sm:$0xff] %v2725_v17  ;;  %1376 = vrot.lane.b32.xlu1 %v1372_v49, %s2320_s15  ;;  %v1056_v49 = vpop.permute.xlu1 %1055 }
 0x3e7   :  { %v3084_v29 = vpop.permute.xlu0 %514  ;;  %v3086_v52 = vpop.permute.xlu2 %1003 }
 0x3e8   :  { %4177 = vst [vmem:[#allocation65_spill] sm:$0xff] %v3086_v52 }
 0x3ea   :  { %v3080_v48 = vld.sshfl [vmem:[#allocation1 + $0x10] sm:$0xff pattern:$0x75316420] }
 0x3eb   :  { %4176 = vst [vmem:[#allocation64_spill] sm:$0xff] %v3080_v48 }
 0x3ec   :  { %1559 = vst [vmem:[#allocation1 + $0x10] ss:$2 sm:$0xff] %v2730_v3 }
 0x3ed   :  { %v1393_v21 = vld.sshfl [vmem:[#allocation1] sm:$0xff pattern:$0x75316420]  ;;  %v3088_v4 = vld.sshfl [vmem:[#allocation1 + $0x8] sm:$0xff pattern:$0x75316420]  ;;  %1157 = vrot.lane.b32.xlu2 %v2904_v63, %s2312_s7  ;;  %1240 = vrot.lane.b32.xlu0 %v2973_v7, %s2316_s11  ;;  %v733_v63 = vsel %vm138_vm3, %v2867_v8, %v2900_v41  ;;  %v841_v7 = vsel %vm623_vm15, %v2989_v6, %v2933_v40  ;;  %v871_v6 = vsel %vm654_vm0, %v3006_v46, %v2952_v61 }
 0x3ee   :  { %1420 = vst [vmem:[#allocation1] ss:$2 sm:$0xff] %v2725_v17  ;;  %1396 = vrot.lane.b32.xlu1 %v1393_v21, %s2315_s10  ;;  %v1086_v8 = vpop.permute.xlu1 %1085 }
 0x3ef   :  { %v3099_v23 = vpop.permute.xlu0 %972  ;;  %v3101_v5 = vpop.permute.xlu2 %1023 }
 0x3f3   :  { %v3095_v39 = vld.sshfl [vmem:[#allocation1 + $0x10] sm:$0xff pattern:$0x75316420] }
 0x3f4   :  { %4178 = vst [vmem:[#allocation66_spill] sm:$0xff] %v3095_v39 }
 0x3f5   :  { %1608 = vst [vmem:[#allocation1 + $0x10] ss:$2 sm:$0xff] %v2744_v9  ;;  %v1423_v52 = vld.sshfl [vmem:[#allocation1] sm:$0xff pattern:$0x75316420]  ;;  %738 = vrot.lane.b32.xlu2 %v733_v63, %s2318_s13  ;;  %845 = vrot.lane.b32.xlu0 %v841_v7, %s2318_s13 }
 0x3f6   :  { %v3103_v48 = vld.sshfl [vmem:[#allocation1 + $0x8] sm:$0xff pattern:$0x75316420]  ;;  %1426 = vrot.lane.b32.xlu1 %v1423_v52, %s2316_s11 }
 0x3f7   :  { %1450 = vst [vmem:[#allocation1] ss:$2 sm:$0xff] %v2725_v17  ;;  %v3118_v39 = vpop.permute.xlu0 %545  ;;  %v3120_v34 = vpop.permute.xlu2 %1135 }
 0x3fc   :  { %v3114_v21 = vld.sshfl [vmem:[#allocation1 + $0x10] sm:$0xff pattern:$0x75316420] }
 0x3fd   :  { %4179 = vst [vmem:[#allocation67_spill] sm:$0xff] %v3114_v21  ;;  %1179 = vrot.lane.b32.xlu2 %v2919_v26, %s2313_s8  ;;  %875 = vrot.lane.b32.xlu0 %v871_v6, %s2318_s13  ;;  %v3139_v21 = vpop.permute.xlu1 %1159 }
 0x3fe   :  { %1638 = vst [vmem:[#allocation1 + $0x10] ss:$2 sm:$0xff] %v2744_v9  ;;  %v1453_v41 = vld.sshfl [vmem:[#allocation1] sm:$0xff pattern:$0x75316420] }
 0x3ff   :  { %v3122_v28 = vld.sshfl [vmem:[#allocation1 + $0x8] sm:$0xff pattern:$0x75316420]  ;;  %1456 = vrot.lane.b32.xlu1 %v1453_v41, %s2317_s12  ;;  %v3135_v63 = vpop.permute.xlu0 %1001  ;;  %v3137_v7 = vpop.permute.xlu2 %599 }
 0x400   :  { %4180 = vst [vmem:[#allocation68_spill] sm:$0xff] %v3122_v28 }
 0x401   :  { %1496 = vst [vmem:[#allocation1] ss:$2 sm:$0xff] %v2728_v2 }
 0x402   :  { %4182 = vst [vmem:[#allocation70_spill] sm:$0xff] %v3135_v63 }
 0x405   :  { %v3131_v52 = vld.sshfl [vmem:[#allocation1 + $0x10] sm:$0xff pattern:$0x75316420]  ;;  %1268 = vrot.lane.b32.xlu2 %v2927_v0, %s2317_s12  ;;  %1288 = vrot.lane.b32.xlu0 %v3012_v14, %s2311_s2  ;;  %v763_v14 = vsel %vm540_vm13, %v2883_v22, %v2917_v1 }
 0x406   :  { %4181 = vst [vmem:[#allocation69_spill] sm:$0xff] %v3131_v52 }
 0x407   :  { %1668 = vst [vmem:[#allocation1 + $0x10] ss:$2 sm:$0xff] %v2744_v9  ;;  %v3152_v41 = vpop.permute.xlu0 %1021  ;;  %v3154_v6 = vpop.permute.xlu2 %1053 }
 0x408   :  { %v1499_v46 = vld.sshfl [vmem:[#allocation1] sm:$0xff pattern:$0x75316420]  ;;  %v3141_v28 = vld.sshfl [vmem:[#allocation1 + $0x8] sm:$0xff pattern:$0x75316420]  ;;  %v3158_v63 = vsel %vm623_vm15, %v3154_v6, %v1056_v49  ;;  %v3160_v52 = vpop.permute.xlu1 %1133 }
 0x409   :  { %4183 = vst [vmem:[#allocation71_spill] sm:$0xff] %v3141_v28  ;;  %1502 = vrot.lane.b32.xlu1 %v1499_v46, %s2311_s2  ;;  %v917_v46 = vsel %vm477_vm4, %v3025_v33, %v2971_v27  ;;  %v23_v33 = vlaneseq }
 0x40a   :  { %1527 = vst [vmem:[#allocation1] ss:$2 sm:$0xff] %v2728_v2 }
 0x40b   :  { %4185 = vst [vmem:[#allocation73_spill] sm:$0xff] %v3158_v63 }
 0x40d   :  { %768 = vrot.lane.b32.xlu2 %v763_v14, %s2318_s13  ;;  %921 = vrot.lane.b32.xlu0 %v917_v46, %s2319_s14 }
 0x40e   :  { %v3148_v26 = vld.sshfl [vmem:[#allocation1 + $0x10] sm:$0xff pattern:$0x75316420] }
 0x40f   :  { %4184 = vst [vmem:[#allocation72_spill] sm:$0xff] %v3148_v26  ;;  %v598_v26 = vpop.permute.xlu0 %597  ;;  %v631_v63 = vpop.permute.xlu2 %630 }
 0x410   :  { %1714 = vst [vmem:[#allocation1 + $0x10] ss:$2 sm:$0xff] %v2730_v3  ;;  %v3179_v22 = vpop.permute.xlu1 %1244 }
 0x411   :  { %v1530_v0 = vld.sshfl [vmem:[#allocation1] sm:$0xff pattern:$0x75316420]  ;;  %v3162_v28 = vld.sshfl [vmem:[#allocation1 + $0x8] sm:$0xff pattern:$0x75316420] }
 0x412   :  { %4186 = vst [vmem:[#allocation74_spill] sm:$0xff] %v3162_v28  ;;  %1533 = vrot.lane.b32.xlu1 %v1530_v0, %s2312_s7 }
 0x413   :  { %1557 = vst [vmem:[#allocation1] ss:$2 sm:$0xff] %v2728_v2 }
 0x414   :  { %4189 = vst [vmem:[#allocation77_spill] sm:$0xff] %v3179_v22  ;;  %v3198_v22 = vand.u32 127, %v23_v33 }
 0x415   :  { %1290 = vrot.lane.b32.xlu2 %v2947_v24, %s2311_s2  ;;  %1319 = vrot.lane.b32.xlu0 %v3031_v59, %s2312_s7 }
 0x416   :  { %vm486_vm1 = vcmp.lt.s32.totalorder %v3198_v22, 3  ;;  %vm709_vm2 = vcmp.lt.s32.totalorder %v3198_v22, 2  ;;  %vm925_vm9 = vcmp.lt.s32.totalorder %v3198_v22, 1  ;;  %vm1300_vm10 = vcmp.lt.s32.totalorder %v3198_v22, 127 }
 0x417   :  { %v3173_v49 = vld.sshfl [vmem:[#allocation1 + $0x10] sm:$0xff pattern:$0x75316420]  ;;  %v3189_v14 = vpop.permute.xlu0 %1051  ;;  %v3191_v46 = vpop.permute.xlu2 %1083 }
 0x418   :  { %4187 = vst [vmem:[#allocation75_spill] sm:$0xff] %v3173_v49  ;;  %v3196_v49 = vsel %vm654_vm0, %v3191_v46, %v1086_v8 }
 0x419   :  { %1745 = vst [vmem:[#allocation1 + $0x10] ss:$2 sm:$0xff] %v2730_v3 }
 0x41a   :  { %v1560_v28 = vld.sshfl [vmem:[#allocation1] sm:$0xff pattern:$0x75316420]  ;;  %v3177_v1 = vld.sshfl [vmem:[#allocation1 + $0x8] sm:$0xff pattern:$0x75316420] }
 0x41b   :  { %4188 = vst [vmem:[#allocation76_spill] sm:$0xff] %v3177_v1  ;;  %1563 = vrot.lane.b32.xlu1 %v1560_v28, %s2313_s8  ;;  %v948_v28 = vsel %vm138_vm3, %v3063_v53, %v3008_v60  ;;  %v519_v53 = vsel %vm486_vm1, %v3027_v56, %v3084_v29 }
 0x41c   :  { %1587 = vst [vmem:[#allocation1] ss:$2 sm:$0xff] %v2725_v17 }
 0x41d   :  { %4191 = vst [vmem:[#allocation79_spill] sm:$0xff] %v3196_v49  ;;  %1216 = vrot.lane.b32.xlu2 %v2954_v37, %s2315_s10  ;;  %952 = vrot.lane.b32.xlu0 %v948_v28, %s2319_s14  ;;  %v518_v37 = vsel %vm486_vm1, %v3084_v29, %v3027_v56  ;;  %v524_v56 = vmul.f32 %v2528_v55, %v519_v53 }
 0x41e   :  { %v549_v29 = vsel %vm486_vm1, %v3118_v39, %v3065_v18 }
 0x41f   :  { %v629_v8 = vpop.permute.xlu0 %628  ;;  %v1184_v33 = vpop.permute.xlu2 %1183 }
 0x420   :  { %v3187_v0 = vld.sshfl [vmem:[#allocation1 + $0x10] sm:$0xff pattern:$0x75316420] }
 0x421   :  { %4190 = vst [vmem:[#allocation78_spill] sm:$0xff] %v3187_v0  ;;  %v487_v0 = vsel %vm486_vm1, %v3044_v10, %v2991_v51 }
 0x422   :  { %1775 = vst [vmem:[#allocation1 + $0x10] ss:$2 sm:$0xff] %v2730_v3  ;;  %v3210_v3 = vpop.permute.xlu1 %1181 }
 0x423   :  { %v1588_v24 = vld.sshfl [vmem:[#allocation1] sm:$0xff pattern:$0x75316420]  ;;  %v3200_v1 = vld.sshfl [vmem:[#allocation1 + $0x8] sm:$0xff pattern:$0x75316420]  ;;  %v3226_v28 = vsel %vm540_vm13, %v3210_v3, %v1184_v33  ;;  %v525_v33 = vmul.f32 %v2528_v55, %v518_v37  ;;  %v633_v37 = vsel %vm486_vm1, %v631_v63, %v629_v8 }
 0x424   :  { %4192 = vst [vmem:[#allocation80_spill] sm:$0xff] %v3200_v1  ;;  %1592 = vrot.lane.b32.xlu1 %v1588_v24, %s2263_s25  ;;  %v488_v24 = vsel %vm486_vm1, %v2991_v51, %v3044_v10  ;;  %v495_v51 = vmul.f32 %v2496_v35, %v487_v0  ;;  %v556_v10 = vmul.f32 %v2532_v58, %v549_v29 }
 0x425   :  { %1606 = vst [vmem:[#allocation1] ss:$2 sm:$0xff] %v2725_v17  ;;  %v494_v1 = vmul.f32 %v2496_v35, %v488_v24  ;;  %1321 = vrot.lane.b32.xlu2 %v2965_v36, %s2312_s7  ;;  %1349 = vrot.lane.b32.xlu0 %v3048_v15, %s2313_s8  ;;  %v569_v35 = vsel %vm486_vm1, %v2842_v19, %v2817_v45 }
 0x426   :  { %v601_v36 = vsel %vm486_vm1, %v598_v26, %v3137_v7  ;;  %v632_v0 = vsel %vm486_vm1, %v629_v8, %v631_v63 }
 0x427   :  { %v526_v55 = vadd.f32 %v524_v56, %v494_v1  ;;  %v3262_v53 = vpop.permute.xlu0 %1081  ;;  %v639_v8 = vmul.f32 %v2547_v16, %v632_v0 }
 0x429   :  { %v3213_v59 = vld.sshfl [vmem:[#allocation1 + $0x10] sm:$0xff pattern:$0x75316420] }
 0x42a   :  { %4193 = vst [vmem:[#allocation81_spill] sm:$0xff] %v3213_v59  ;;  %v550_v59 = vsel %vm486_vm1, %v3065_v18, %v3118_v39  ;;  %v570_v18 = vsel %vm486_vm1, %v2817_v45, %v2842_v19  ;;  %v527_v39 = vadd.f32 %v525_v33, %v495_v51  ;;  %v576_v45 = vmul.f32 %v2537_v62, %v569_v35 }
 0x42b   :  { %1824 = vst [vmem:[#allocation1 + $0x10] ss:$2 sm:$0xff] %v2744_v9  ;;  %v555_v60 = vmul.f32 %v2532_v58, %v550_v59  ;;  %v662_v59 = vpop.permute.xlu2 %661  ;;  %v575_v1 = vmul.f32 %v2537_v62, %v570_v18  ;;  %v638_v62 = vmul.f32 %v2547_v16, %v633_v37 }
 0x42c   :  { %v1609_v9 = vld.sshfl [vmem:[#allocation1] sm:$0xff pattern:$0x75316420]  ;;  %v3246_v49 = vld.sshfl [vmem:[#allocation1 + $0x8] sm:$0xff pattern:$0x75316420]  ;;  %v558_v15 = vadd.f32 %v556_v10, %v527_v39 }
 0x42d   :  { %1636 = vst [vmem:[#allocation1] ss:$2 sm:$0xff] %v2725_v17  ;;  %1612 = vrot.lane.b32.xlu1 %v1609_v9, %s2315_s10  ;;  %v557_v58 = vadd.f32 %v555_v60, %v526_v55  ;;  %v602_v9 = vsel %vm486_vm1, %v3137_v7, %v598_v26  ;;  %v608_v60 = vmul.f32 %v2542_v11, %v601_v36 }
 0x42e   :  { %v607_v19 = vmul.f32 %v2542_v11, %v602_v9  ;;  %v812_v7 = vsel %vm592_vm14, %v2915_v32, %v2935_v13  ;;  %v978_v26 = vsel %vm540_vm13, %v3099_v23, %v3046_v42  ;;  %v578_v63 = vadd.f32 %v576_v45, %v558_v15 }
 0x42f   :  { %v577_v29 = vadd.f32 %v575_v1, %v557_v58  ;;  %817 = vrot.lane.b32.xlu2 %v812_v7, %s2318_s13  ;;  %982 = vrot.lane.b32.xlu0 %v978_v26, %s2319_s14  ;;  %v660_v32 = vpop.permute.xlu0 %659 }
 0x430   :  { %v610_v13 = vadd.f32 %v608_v60, %v578_v63  ;;  %v663_v23 = vsel %vm486_vm1, %v660_v32, %v662_v59  ;;  %v1027_v60 = vsel %vm592_vm14, %v3152_v41, %v3101_v5 }
 0x431   :  { %v609_v11 = vadd.f32 %v607_v19, %v577_v29  ;;  %v670_v18 = vmul.f32 %v2551_v25, %v663_v23  ;;  %v842_v19 = vsel %vm623_vm15, %v2933_v40, %v2959_v12  ;;  %v4194_v23 = vld [vmem:[#allocation3_spill] sm:$0xff] }
 0x432   :  { %v641_v10 = vadd.f32 %v639_v8, %v610_v13 }
 0x433   :  { %v1132_v33 = vpop.permute.xlu2 %1131  ;;  %v640_v16 = vadd.f32 %v638_v62, %v609_v11 }
 0x434   :  { %v1639_v24 = vld.sshfl [vmem:[#allocation1] sm:$0xff pattern:$0x75316420]  ;;  %v3282_v56 = vld.sshfl [vmem:[#allocation1 + $0x8] sm:$0xff pattern:$0x75316420]  ;;  %v1137_v51 = vsel %vm477_vm4, %v1132_v33, %v3160_v52  ;;  %v3306_v35 = vadd.f32 %v670_v18, %v641_v10 }
 0x435   :  { %1666 = vst [vmem:[#allocation1] ss:$2 sm:$0xff] %v2725_v17  ;;  %1642 = vrot.lane.b32.xlu1 %v1639_v24, %s2316_s11  ;;  %v664_v17 = vsel %vm486_vm1, %v662_v59, %v660_v32  ;;  %v3315_v59 = vpop.permute.xlu1 %1218  ;;  %v1141_v41 = vmul.f32 %v1137_v51, %v2623_v31 }
 0x436   :  { %v669_v55 = vmul.f32 %v2551_v25, %v664_v17 }
 0x437   :  { %1242 = vrot.lane.b32.xlu2 %v2975_v30, %s2316_s11  ;;  %1378 = vrot.lane.b32.xlu0 %v3067_v20, %s2320_s15  ;;  %v706_v25 = vpop.permute.xlu0 %705 }
 0x438   :  { %v3304_v39 = vadd.f32 %v669_v55, %v640_v16  ;;  %v4195_v16 = vld [vmem:[#allocation5_spill] sm:$0xff] }
 0x43b   :  { %v1221_v9 = vpop.permute.xlu2 %1220 }
 0x43c   :  { %v1669_v58 = vld.sshfl [vmem:[#allocation1] sm:$0xff pattern:$0x75316420]  ;;  %v3308_v36 = vld.sshfl [vmem:[#allocation1 + $0x8] sm:$0xff pattern:$0x75316420]  ;;  %v1223_v15 = vsel %vm592_vm14, %v3315_v59, %v1221_v9 }
 0x43d   :  { %1712 = vst [vmem:[#allocation1] ss:$2 sm:$0xff] %v2728_v2  ;;  %1672 = vrot.lane.b32.xlu1 %v1669_v58, %s2317_s12  ;;  %v1227_v11 = vmul.f32 %v1223_v15, %v2635_v47  ;;  %v1057_v15 = vsel %vm623_vm15, %v3189_v14, %v3154_v6  ;;  %v4198_v14 = vld [vmem:[#allocation68_spill] sm:$0xff] }
 0x43f   :  { %1351 = vrot.lane.b32.xlu2 %v2984_v43, %s2313_s8  ;;  %1398 = vrot.lane.b32.xlu0 %v3088_v4, %s2315_s10  ;;  %v1156_v20 = vpop.permute.xlu0 %1155  ;;  %v1138_v43 = vsel %vm477_vm4, %v3160_v52, %v3120_v34  ;;  %v1190_v34 = vmul.f32 %v3226_v28, %v2629_v38 }
 0x440   :  { %v1142_v40 = vmul.f32 %v1138_v43, %v2623_v31 }
 0x443   :  { %v708_v30 = vpop.permute.xlu2 %707 }
 0x444   :  { %v1715_v1 = vld.sshfl [vmem:[#allocation1] sm:$0xff pattern:$0x75316420]  ;;  %v3320_v0 = vld.sshfl [vmem:[#allocation1 + $0x8] sm:$0xff pattern:$0x75316420]  ;;  %v711_v31 = vsel %vm709_vm2, %v708_v30, %v706_v25  ;;  %v710_v28 = vsel %vm709_vm2, %v706_v25, %v708_v30 }
 0x445   :  { %1743 = vst [vmem:[#allocation1] ss:$2 sm:$0xff] %v2728_v2  ;;  %1718 = vrot.lane.b32.xlu1 %v1715_v1, %s2311_s2  ;;  %v716_v17 = vmul.f32 %v4194_v23, %v711_v31  ;;  %v4196_v1 = vld [vmem:[#allocation55_spill] sm:$0xff] }
 0x447   :  { %847 = vrot.lane.b32.xlu2 %v842_v19, %s2318_s13  ;;  %1031 = vrot.lane.b32.xlu0 %v1027_v60, %s2319_s14  ;;  %v737_v24 = vpop.permute.xlu0 %736 }
 0x44b   :  { %v1158_v4 = vpop.permute.xlu2 %1157 }
 0x44c   :  { %v3328_v37 = vld.sshfl [vmem:[#allocation1] sm:$0xff pattern:$0x75316420]  ;;  %v3330_v45 = vld.sshfl [vmem:[#allocation1 + $0x8] sm:$0xff pattern:$0x75316420]  ;;  %v1161_v7 = vsel %vm138_vm3, %v1156_v20, %v1158_v4  ;;  %v1162_v12 = vsel %vm138_vm3, %v1158_v4, %v3139_v21 }
 0x44d   :  { %1773 = vst [vmem:[#allocation1] ss:$2 sm:$0xff] %v2728_v2  ;;  %v1165_v2 = vmul.f32 %v1161_v7, %v2631_v44  ;;  %v1166_v26 = vmul.f32 %v1162_v12, %v2631_v44  ;;  %v2251_v21 = vld [vmem:[#allocation2 + $0x4] sm:$0xff]  ;;  %v1203_v44 = vmul.f32 %v2939_v54, %v2637_v50 }
 0x44e   :  { %v4197_v7 = vld [vmem:[#allocation54_spill] sm:$0xff] }
 0x44f   :  { %v1167_v52 = vadd.f32 %v1165_v2, %v1141_v41  ;;  %v1168_v29 = vadd.f32 %v1166_v26, %v1142_v40  ;;  %1264 = vrot.lane.b32.xlu2 %v2993_v57, %s2317_s12  ;;  %1428 = vrot.lane.b32.xlu0 %v3103_v48, %s2316_s11  ;;  %v767_v32 = vpop.permute.xlu0 %766  ;;  %v717_v48 = vmul.f32 %v4194_v23, %v710_v28  ;;  %v4204_v23 = vld [vmem:[#allocation74_spill] sm:$0xff] }
 0x450   :  { %v872_v6 = vsel %vm654_vm0, %v2952_v61, %v4197_v7  ;;  %v1087_v40 = vsel %vm654_vm0, %v3262_v53, %v3191_v46  ;;  %v4199_v61 = vld [vmem:[#allocation58_spill] sm:$0xff] }
 0x451   :  { %v1192_v8 = vadd.f32 %v1190_v34, %v1168_v29  ;;  %v4200_v29 = vld [vmem:[#allocation7_spill] sm:$0xff] }
 0x453   :  { %v739_v13 = vpop.permute.xlu2 %738  ;;  %v1205_v33 = vadd.f32 %v1203_v44, %v1192_v8  ;;  %v4201_v44 = vld [vmem:[#allocation57_spill] sm:$0xff] }
 0x454   :  { %v3354_v63 = vld.sshfl [vmem:[#allocation1] sm:$0xff pattern:$0x75316420]  ;;  %v3356_v62 = vld.sshfl [vmem:[#allocation1 + $0x8] sm:$0xff pattern:$0x75316420]  ;;  %v740_v51 = vsel %vm709_vm2, %v737_v24, %v739_v13  ;;  %v741_v57 = vsel %vm709_vm2, %v739_v13, %v737_v24  ;;  %v918_v28 = vsel %vm477_vm4, %v2971_v27, %v4201_v44 }
 0x455   :  { %1803 = vst [vmem:[#allocation1] ss:$2 sm:$0xff] %v2251_v21  ;;  %v746_v54 = vmul.f32 %v4195_v16, %v741_v57  ;;  %v747_v10 = vmul.f32 %v4195_v16, %v740_v51  ;;  %v3377_v55 = vadd.f32 %v1227_v11, %v1205_v33  ;;  %v4202_v11 = vld [vmem:[#allocation71_spill] sm:$0xff]  ;;  %v4203_v33 = vld [vmem:[#allocation60_spill] sm:$0xff] }
 0x456   :  { %v4205_v27 = vld [vmem:[#allocation52_spill] sm:$0xff] }
 0x457   :  { %v748_v18 = vadd.f32 %v746_v54, %v716_v17  ;;  %v749_v58 = vadd.f32 %v747_v10, %v717_v48  ;;  %1400 = vrot.lane.b32.xlu2 %v4196_v1, %s2315_s10  ;;  %1061 = vrot.lane.b32.xlu0 %v1057_v15, %s2319_s14  ;;  %v816_v30 = vpop.permute.xlu0 %815  ;;  %v1202_v57 = vmul.f32 %v4205_v27, %v2637_v50  ;;  %v4206_v15 = vld [vmem:[#allocation59_spill] sm:$0xff]  ;;  %v4207_v1 = vld [vmem:[#allocation56_spill] sm:$0xff] }
 0x458   :  { %v4208_v50 = vld [vmem:[#allocation76_spill] sm:$0xff] }
 0x45b   :  { %v1180_v20 = vpop.permute.xlu2 %1179 }
 0x45c   :  { %v3379_v25 = vld.sshfl [vmem:[#allocation1] sm:$0xff pattern:$0x75316420]  ;;  %v3381_v9 = vld.sshfl [vmem:[#allocation1 + $0x8] sm:$0xff pattern:$0x75316420]  ;;  %v1185_v19 = vsel %vm540_vm13, %v1180_v20, %v3210_v3  ;;  %v949_v20 = vsel %vm138_vm3, %v4207_v1, %v4206_v15 }
 0x45d   :  { %1822 = vst [vmem:[#allocation1] ss:$2 sm:$0xff] %v2251_v21  ;;  %v1189_v60 = vmul.f32 %v1185_v19, %v2629_v38  ;;  %v4217_v15 = vld [vmem:[#allocation34_spill] sm:$0xff] }
 0x45f   :  { %v1191_v43 = vadd.f32 %v1189_v60, %v1167_v52  ;;  %877 = vrot.lane.b32.xlu2 %v872_v6, %s2318_s13  ;;  %1458 = vrot.lane.b32.xlu0 %v4198_v14, %s2317_s12  ;;  %v3404_v3 = vpop.permute.xlu0 %1240  ;;  %v4209_v60 = vld [vmem:[#allocation51_spill] sm:$0xff]  ;;  %v4211_v14 = vld [vmem:[#allocation62_spill] sm:$0xff] }
 0x461   :  { %v1204_v10 = vadd.f32 %v1202_v57, %v1191_v43  ;;  %v4210_v43 = vld [vmem:[#allocation53_spill] sm:$0xff] }
 0x462   :  { %v789_v7 = vsel %vm709_vm2, %v4210_v43, %v4209_v60  ;;  %v790_v6 = vsel %vm709_vm2, %v4209_v60, %v4210_v43  ;;  %v4215_v57 = vld [vmem:[#allocation61_spill] sm:$0xff] }
 0x463   :  { %v3402_v12 = vpop.permute.xlu2 %1268 }
 0x464   :  { %v3392_v4 = vld.sshfl [vmem:[#allocation1] sm:$0xff pattern:$0x75316420]  ;;  %v3394_v24 = vld.sshfl [vmem:[#allocation1 + $0x8] sm:$0xff pattern:$0x75316420] }
 0x465   :  { %1852 = vst [vmem:[#allocation1] ss:$2 sm:$0xff] %v2251_v21 }
 0x467   :  { %1430 = vrot.lane.b32.xlu2 %v4199_v61, %s2316_s11  ;;  %1091 = vrot.lane.b32.xlu0 %v1087_v40, %s2319_s14  ;;  %v3416_v26 = vpop.permute.xlu0 %845  ;;  %v4212_v40 = vld [vmem:[#allocation80_spill] sm:$0xff]  ;;  %v4213_v61 = vld [vmem:[#allocation9_spill] sm:$0xff] }
 0x46b   :  { %v769_v2 = vpop.permute.xlu2 %768 }
 0x46c   :  { %v3406_v38 = vld.sshfl [vmem:[#allocation1 + $0x8] sm:$0xff pattern:$0x75316420]  ;;  %v3411_v41 = vld.sshfl [vmem:[#allocation1] sm:$0xff pattern:$0x75316420]  ;;  %v770_v34 = vsel %vm709_vm2, %v767_v32, %v769_v2  ;;  %v771_v52 = vsel %vm709_vm2, %v769_v2, %v767_v32  ;;  %v795_v2 = vmul.f32 %v4213_v61, %v790_v6 }
 0x46d   :  { %1882 = vst [vmem:[#allocation1] ss:$2 sm:$0xff] %v2251_v21  ;;  %v776_v31 = vmul.f32 %v4200_v29, %v771_v52  ;;  %v777_v46 = vmul.f32 %v4200_v29, %v770_v34  ;;  %v3427_v21 = vpop.permute.xlu1 %1266 }
 0x46f   :  { %v778_v53 = vadd.f32 %v776_v31, %v748_v18  ;;  %v779_v8 = vadd.f32 %v777_v46, %v749_v58  ;;  %923 = vrot.lane.b32.xlu2 %v918_v28, %s2319_s14  ;;  %1504 = vrot.lane.b32.xlu0 %v4202_v11, %s2311_s2  ;;  %v3434_v32 = vpop.permute.xlu0 %875  ;;  %v4214_v11 = vld [vmem:[#allocation11_spill] sm:$0xff] }
 0x471   :  { %v797_v44 = vadd.f32 %v795_v2, %v778_v53 }
 0x473   :  { %v3432_v13 = vpop.permute.xlu2 %1290 }
 0x475   :  { %v1287_v17 = vpop.permute.xlu1 %1286 }
 0x477   :  { %1460 = vrot.lane.b32.xlu2 %v4203_v33, %s2317_s12  ;;  %1535 = vrot.lane.b32.xlu0 %v4204_v23, %s2312_s7  ;;  %v3442_v48 = vpop.permute.xlu0 %1288 }
 0x478   :  { %v1292_v54 = vsel %vm477_vm4, %v1287_v17, %v3442_v48 }
 0x479   :  { %1296 = vrot.lane.b32.xlu1 %v1292_v54, %s2320_s15 }
 0x47b   :  { %v1217_v51 = vpop.permute.xlu2 %1216 }
 0x47c   :  { %v1222_v16 = vsel %vm592_vm14, %v1217_v51, %v3315_v59 }
 0x47d   :  { %v1226_v18 = vmul.f32 %v1222_v16, %v2635_v47  ;;  %v1318_v47 = vpop.permute.xlu1 %1317  ;;  %v979_v16 = vsel %vm540_vm13, %v3046_v42, %v4215_v57 }
 0x47f   :  { %v1228_v58 = vadd.f32 %v1226_v18, %v1204_v10  ;;  %954 = vrot.lane.b32.xlu2 %v949_v20, %s2319_s14  ;;  %1565 = vrot.lane.b32.xlu0 %v4208_v50, %s2313_s8  ;;  %v3458_v59 = vpop.permute.xlu0 %921  ;;  %v4216_v10 = vld [vmem:[#allocation77_spill] sm:$0xff] }
 0x481   :  { %1749 = vrot.lane.b32.xlu1 %v3328_v37, %s2312_s7  ;;  %v796_v37 = vmul.f32 %v4213_v61, %v789_v7  ;;  %v4221_v61 = vld [vmem:[#allocation13_spill] sm:$0xff] }
 0x483   :  { %v3456_v19 = vpop.permute.xlu2 %1321  ;;  %v798_v28 = vadd.f32 %v796_v37, %v779_v8  ;;  %v1271_v8 = vsel %vm654_vm0, %v3427_v21, %v3402_v12  ;;  %v4219_v12 = vld [vmem:[#allocation64_spill] sm:$0xff] }
 0x485   :  { %v1348_v27 = vpop.permute.xlu1 %1347 }
 0x487   :  { %1506 = vrot.lane.b32.xlu2 %v4211_v14, %s2311_s2  ;;  %1594 = vrot.lane.b32.xlu0 %v4212_v40, %s2263_s25  ;;  %v3476_v52 = vpop.permute.xlu0 %1319 }
 0x488   :  { %v1323_v46 = vsel %vm138_vm3, %v1318_v47, %v3476_v52 }
 0x489   :  { %1327 = vrot.lane.b32.xlu1 %v1323_v46, %s2320_s15 }
 0x48b   :  { %v818_v34 = vpop.permute.xlu2 %817 }
 0x48c   :  { %v819_v29 = vsel %vm709_vm2, %v816_v30, %v818_v34  ;;  %v820_v31 = vsel %vm709_vm2, %v818_v34, %v816_v30 }
 0x48d   :  { %v825_v33 = vmul.f32 %v4214_v11, %v820_v31  ;;  %v826_v23 = vmul.f32 %v4214_v11, %v819_v29  ;;  %v4222_v29 = vld [vmem:[#allocation63_spill] sm:$0xff]  ;;  %v25_v11 = vadd.s32 128, %v3198_v22 }
 0x48e   :  { %v1028_v31 = vsel %vm592_vm14, %v3101_v5, %v4222_v29  ;;  %v1293_v5 = vsel %vm477_vm4, %v3442_v48, %v3432_v13 }
 0x48f   :  { %v827_v17 = vadd.f32 %v825_v33, %v797_v44  ;;  %v828_v51 = vadd.f32 %v826_v23, %v798_v28  ;;  %984 = vrot.lane.b32.xlu2 %v979_v16, %s2319_s14  ;;  %1614 = vrot.lane.b32.xlu0 %v3246_v49, %s2315_s10  ;;  %v3493_v53 = vpop.permute.xlu0 %952  ;;  %v4218_v49 = vld [vmem:[#allocation33_spill] sm:$0xff]  ;;  %v4223_v23 = vld [vmem:[#allocation67_spill] sm:$0xff] }
 0x490   :  { %v1275_v20 = vmul.f32 %v1271_v8, %v4218_v49  ;;  %v4224_v8 = vld [vmem:[#allocation73_spill] sm:$0xff] }
 0x491   :  { %1779 = vrot.lane.b32.xlu1 %v3354_v63, %s2313_s8 }
 0x493   :  { %v1243_v30 = vpop.permute.xlu2 %1242 }
 0x494   :  { %v1246_v54 = vsel %vm623_vm15, %v3404_v3, %v1243_v30  ;;  %v1247_v18 = vsel %vm623_vm15, %v1243_v30, %v4216_v10  ;;  %v3514_v3 = vpop.permute.xlu1 %1376 }
 0x495   :  { %v1250_v42 = vmul.f32 %v1246_v54, %v4217_v15  ;;  %v1251_v1 = vmul.f32 %v1247_v18, %v4217_v15 }
 0x497   :  { %v1252_v50 = vadd.f32 %v1250_v42, %v1228_v58  ;;  %v1253_v47 = vadd.f32 %v1251_v1, %v3377_v55  ;;  %1537 = vrot.lane.b32.xlu2 %v4219_v12, %s2312_s7  ;;  %1644 = vrot.lane.b32.xlu0 %v3282_v56, %s2316_s11  ;;  %v3518_v7 = vpop.permute.xlu0 %1349  ;;  %v4220_v55 = vld [vmem:[#allocation66_spill] sm:$0xff]  ;;  %v4225_v42 = vmov 0.0  }
 0x498   :  { %v1353_v63 = vsel %vm540_vm13, %v1348_v27, %v3518_v7 }
 0x499   :  { %v3508_v60 = vadd.f32 %v1275_v20, %v1253_v47  ;;  %1357 = vrot.lane.b32.xlu1 %v1353_v63, %s2320_s15 }
 0x49b   :  { %v3516_v43 = vpop.permute.xlu2 %1351 }
 0x49c   :  { %v1397_v56 = vpop.permute.xlu1 %1396 }
 0x49f   :  { %1567 = vrot.lane.b32.xlu2 %v4220_v55, %s2313_s8  ;;  %1674 = vrot.lane.b32.xlu0 %v3308_v36, %s2317_s12 }
 0x4a1   :  { %v3527_v6 = vpop.permute.xlu0 %982  ;;  %1828 = vrot.lane.b32.xlu1 %v3392_v4, %s2315_s10 }
 0x4a3   :  { %v848_v58 = vpop.permute.xlu2 %847 }
 0x4a4   :  { %v849_v14 = vsel %vm709_vm2, %v3416_v26, %v848_v58  ;;  %v850_v40 = vsel %vm709_vm2, %v848_v58, %v3416_v26  ;;  %v1427_v4 = vpop.permute.xlu1 %1426 }
 0x4a5   :  { %v855_v2 = vmul.f32 %v4221_v61, %v850_v40  ;;  %v856_v37 = vmul.f32 %v4221_v61, %v849_v14 }
 0x4a7   :  { %v857_v36 = vadd.f32 %v855_v2, %v827_v17  ;;  %v858_v34 = vadd.f32 %v856_v37, %v828_v51  ;;  %1033 = vrot.lane.b32.xlu2 %v1028_v31, %s2319_s14  ;;  %1720 = vrot.lane.b32.xlu0 %v3320_v0, %s2311_s2  ;;  %v3560_v0 = vand.u32 15, %v3198_v22  ;;  %v1885_v31 = vld.sshfl [vmem:[#allocation1] sm:$0xff pattern:$0x75316420] }
 0x4a9   :  { %v3545_v26 = vpop.permute.xlu0 %1378  ;;  %v673_v13 = vadd.s32 4294967293, %v3560_v0  ;;  %v889_v57 = vadd.s32 4294967294, %v3560_v0 }
 0x4ab   :  { %v1265_v46 = vpop.permute.xlu2 %1264  ;;  %vm675_vm5 = vcmp.ge.s32.totalorder %v673_v13, 0  ;;  %vm891_vm7 = vcmp.ge.s32.totalorder %v889_v57, 0 }
 0x4ac   :  { %v1270_v44 = vsel %vm654_vm0, %v1265_v46, %v3427_v21  ;;  %v3562_v21 = vand.u32 15, %v25_v11  ;;  %v1457_v30 = vpop.permute.xlu1 %1456  ;;  %v2073_v1 = vsel %vm675_vm5, 1.0, %v4225_v42  ;;  %v2075_v47 = vsel %vm891_vm7, 1.0, %v4225_v42  ;;  %v1827_v46 = vld.sshfl [vmem:[#allocation1 + $0x10] sm:$0xff pattern:$0x75316420] }
 0x4ad   :  { %v1274_v28 = vmul.f32 %v1270_v44, %v4218_v49  ;;  %v4226_v49 = vld [vmem:[#allocation15_spill] sm:$0xff]  ;;  %v685_v58 = vmul.f32 %v2073_v1, %v3304_v39  ;;  %v1354_v44 = vsel %vm540_vm13, %v3518_v7, %v3516_v43 }
 0x4ae   :  { %v674_v48 = vadd.s32 4294967293, %v3562_v21  ;;  %v890_v16 = vadd.s32 4294967294, %v3562_v21  ;;  %v4231_v43 = vld [vmem:[#allocation75_spill] sm:$0xff] }
 0x4af   :  { %v3551_v33 = vadd.f32 %v1274_v28, %v1252_v50  ;;  %1616 = vrot.lane.b32.xlu2 %v4223_v23, %s2315_s10  ;;  %1298 = vrot.lane.b32.xlu0 %v1293_v5, %s2320_s15  ;;  %v4229_v28 = vld [vmem:[#allocation48_spill] sm:$0xff] }
 0x4b0   :  { %vm676_vm6 = vcmp.ge.s32.totalorder %v674_v48, 0  ;;  %vm892_vm8 = vcmp.ge.s32.totalorder %v890_v16, 0  ;;  %1854 = vst [vmem:[#allocation1 + $0x10] ss:$2 sm:$0xff] %v4229_v28 }
 0x4b1   :  { %v3566_v51 = vpop.permute.xlu0 %1398  ;;  %v2074_v50 = vsel %vm676_vm6, 1.0, %v4225_v42  ;;  %v2076_v12 = vsel %vm892_vm8, 1.0, %v4225_v42 }
 0x4b2   :  { %v1402_v27 = vsel %vm592_vm14, %v1397_v56, %v3566_v51  ;;  %v686_v56 = vmul.f32 %v2074_v50, %v3306_v35  ;;  %v4228_v35 = vld [vmem:[#allocation79_spill] sm:$0xff] }
 0x4b3   :  { %v3564_v17 = vpop.permute.xlu2 %1400  ;;  %1406 = vrot.lane.b32.xlu1 %v1402_v27, %s2320_s15 }
 0x4b4   :  { %v1503_v61 = vpop.permute.xlu1 %1502 }
 0x4b7   :  { %1063 = vrot.lane.b32.xlu2 %v4224_v8, %s2319_s14  ;;  %1751 = vrot.lane.b32.xlu0 %v3330_v45, %s2312_s7  ;;  %v1857_v27 = vld.sshfl [vmem:[#allocation1 + $0x10] sm:$0xff pattern:$0x75316420] }
 0x4b8   :  { %1884 = vst [vmem:[#allocation1 + $0x10] ss:$2 sm:$0xff] %v4229_v28  ;;  %v4237_v28 = vld [vmem:[#allocation65_spill] sm:$0xff] }
 0x4b9   :  { %v3579_v10 = vpop.permute.xlu0 %1031 }
 0x4bb   :  { %v878_v54 = vpop.permute.xlu2 %877  ;;  %1858 = vrot.lane.b32.xlu1 %v3411_v41, %s2316_s11  ;;  %v4227_v41 = vld [vmem:[#allocation69_spill] sm:$0xff] }
 0x4bc   :  { %v879_v18 = vsel %vm709_vm2, %v3434_v32, %v878_v54  ;;  %v880_v15 = vsel %vm709_vm2, %v878_v54, %v3434_v32  ;;  %v1324_v32 = vsel %vm138_vm3, %v3476_v52, %v3456_v19  ;;  %v1534_v29 = vpop.permute.xlu1 %1533 }
 0x4bd   :  { %v885_v20 = vmul.f32 %v4226_v49, %v880_v15  ;;  %v886_v45 = vmul.f32 %v4226_v49, %v879_v18  ;;  %v4233_v18 = vld [vmem:[#allocation19_spill] sm:$0xff] }
 0x4bf   :  { %v887_v63 = vadd.f32 %v885_v20, %v857_v36  ;;  %v888_v55 = vadd.f32 %v886_v45, %v858_v34  ;;  %1646 = vrot.lane.b32.xlu2 %v4227_v41, %s2316_s11  ;;  %1329 = vrot.lane.b32.xlu0 %v1324_v32, %s2320_s15  ;;  %v4234_v45 = vld [vmem:[#allocation78_spill] sm:$0xff] }
 0x4c1   :  { %v901_v14 = vmul.f32 %v2075_v47, %v887_v63  ;;  %v902_v40 = vmul.f32 %v2076_v12, %v888_v55  ;;  %v3609_v39 = vpop.permute.xlu0 %1428  ;;  %v1403_v12 = vsel %vm592_vm14, %v3566_v51, %v3564_v17  ;;  %v4235_v63 = vld [vmem:[#allocation81_spill] sm:$0xff] }
 0x4c2   :  { %v1432_v19 = vsel %vm623_vm15, %v1427_v4, %v3609_v39  ;;  %v4230_v4 = vld [vmem:[#allocation72_spill] sm:$0xff]  ;;  %v4236_v51 = vld [vmem:[#allocation21_spill] sm:$0xff] }
 0x4c3   :  { %v3603_v2 = vadd.f32 %v901_v14, %v685_v58  ;;  %v3605_v37 = vadd.f32 %v902_v40, %v686_v56  ;;  %v3607_v36 = vpop.permute.xlu2 %1430  ;;  %1436 = vrot.lane.b32.xlu1 %v1432_v19, %s2320_s15 }
 0x4c4   :  { %v1564_v23 = vpop.permute.xlu1 %1563 }
 0x4c7   :  { %1093 = vrot.lane.b32.xlu2 %v4228_v35, %s2319_s14  ;;  %1781 = vrot.lane.b32.xlu0 %v3356_v62, %s2313_s8 }
 0x4c9   :  { %v3618_v34 = vpop.permute.xlu0 %1061 }
 0x4cb   :  { %v924_v52 = vpop.permute.xlu2 %923  ;;  %1888 = vrot.lane.b32.xlu1 %v1885_v31, %s2317_s12 }
 0x4cc   :  { %v926_v7 = vsel %vm925_vm9, %v3458_v59, %v924_v52  ;;  %v927_v13 = vsel %vm925_vm9, %v924_v52, %v3458_v59  ;;  %v3659_v20 = vpop.permute.xlu1 %1592 }
 0x4cf   :  { %1676 = vrot.lane.b32.xlu2 %v4230_v4, %s2317_s12  ;;  %1359 = vrot.lane.b32.xlu0 %v1354_v44, %s2320_s15  ;;  %v4238_v4 = vld [vmem:[#allocation70_spill] sm:$0xff] }
 0x4d1   :  { %v3630_v11 = vpop.permute.xlu0 %1458 }
 0x4d2   :  { %v1462_v5 = vsel %vm654_vm0, %v1457_v30, %v3630_v11 }
 0x4d3   :  { %v3628_v62 = vpop.permute.xlu2 %1460  ;;  %1466 = vrot.lane.b32.xlu1 %v1462_v5, %s2320_s15  ;;  %v1005_v5 = vsel %vm925_vm9, %v4238_v4, %v4237_v28 }
 0x4d4   :  { %v1613_v55 = vpop.permute.xlu1 %1612 }
 0x4d7   :  { %1722 = vrot.lane.b32.xlu2 %v4231_v43, %s2311_s2  ;;  %1808 = vrot.lane.b32.xlu0 %v3379_v25, %s2321_s16  ;;  %v4232_v25 = vld [vmem:[#allocation17_spill] sm:$0xff] }
 0x4d8   :  { %v932_v8 = vmul.f32 %v4232_v25, %v927_v13  ;;  %v933_v54 = vmul.f32 %v4232_v25, %v926_v7 }
 0x4d9   :  { %v3647_v57 = vpop.permute.xlu0 %1091 }
 0x4db   :  { %v955_v48 = vpop.permute.xlu2 %954 }
 0x4dc   :  { %v956_v16 = vsel %vm925_vm9, %v3493_v53, %v955_v48  ;;  %v957_v30 = vsel %vm925_vm9, %v955_v48, %v3493_v53  ;;  %v1643_v52 = vpop.permute.xlu1 %1642 }
 0x4dd   :  { %v962_v15 = vmul.f32 %v4233_v18, %v957_v30  ;;  %v963_v1 = vmul.f32 %v4233_v18, %v956_v16 }
 0x4df   :  { %v964_v59 = vadd.f32 %v962_v15, %v932_v8  ;;  %v965_v49 = vadd.f32 %v963_v1, %v933_v54  ;;  %1753 = vrot.lane.b32.xlu2 %v4234_v45, %s2312_s7  ;;  %1830 = vrot.lane.b32.xlu0 %v3394_v24, %s2315_s10  ;;  %v4240_v54 = vld [vmem:[#allocation25_spill] sm:$0xff]  ;;  %v1463_v45 = vsel %vm654_vm0, %v3630_v11, %v3628_v62 }
 0x4e1   :  { %v1505_v53 = vpop.permute.xlu0 %1504 }
 0x4e2   :  { %v1508_v47 = vsel %vm477_vm4, %v1503_v61, %v1505_v53 }
 0x4e3   :  { %v1507_v50 = vpop.permute.xlu2 %1506  ;;  %1512 = vrot.lane.b32.xlu1 %v1508_v47, %s2263_s25 }
 0x4e4   :  { %v1673_v44 = vpop.permute.xlu1 %1672 }
 0x4e7   :  { %1783 = vrot.lane.b32.xlu2 %v4235_v63, %s2313_s8  ;;  %1408 = vrot.lane.b32.xlu0 %v1403_v12, %s2320_s15  ;;  %v1509_v63 = vsel %vm477_vm4, %v1505_v53, %v1507_v50 }
 0x4e9   :  { %v3673_v32 = vpop.permute.xlu0 %1535 }
 0x4ea   :  { %v1539_v17 = vsel %vm138_vm3, %v1534_v29, %v3673_v32  ;;  %v1433_v29 = vsel %vm623_vm15, %v3609_v39, %v3607_v36  ;;  %v1886_v36 = vld.sshfl [vmem:[#allocation1 + $0x8] sm:$0xff pattern:$0x75316420]  ;;  %v4239_v39 = vld [vmem:[#allocation23_spill] sm:$0xff] }
 0x4eb   :  { %v985_v58 = vpop.permute.xlu2 %984  ;;  %1543 = vrot.lane.b32.xlu1 %v1539_v17, %s2263_s25  ;;  %v1012_v43 = vmul.f32 %v4239_v39, %v1005_v5 }
 0x4ec   :  { %v986_v24 = vsel %vm925_vm9, %v3527_v6, %v985_v58  ;;  %v987_v56 = vsel %vm925_vm9, %v985_v58, %v3527_v6 }
 0x4ed   :  { %v992_v14 = vmul.f32 %v4236_v51, %v987_v56  ;;  %v993_v40 = vmul.f32 %v4236_v51, %v986_v24  ;;  %v4241_v56 = vld [vmem:[#allocation27_spill] sm:$0xff] }
 0x4ef   :  { %v994_v41 = vadd.f32 %v992_v14, %v964_v59  ;;  %v995_v61 = vadd.f32 %v993_v40, %v965_v49  ;;  %1832 = vrot.lane.b32.xlu2 %v1827_v46, %s2315_s10  ;;  %1860 = vrot.lane.b32.xlu0 %v3406_v38, %s2316_s11  ;;  %v1887_v38 = vld.sshfl [vmem:[#allocation1 + $0x10] sm:$0xff pattern:$0x75316420]  ;;  %v1719_v49 = vpop.permute.xlu1 %1718 }
 0x4f1   :  { %v1566_v35 = vpop.permute.xlu0 %1565  ;;  %v1014_v8 = vadd.f32 %v1012_v43, %v995_v61 }
 0x4f2   :  { %v1569_v6 = vsel %vm540_vm13, %v1564_v23, %v1566_v35  ;;  %v1006_v23 = vsel %vm925_vm9, %v4237_v28, %v4238_v4  ;;  %v4242_v4 = vld [vmem:[#allocation29_spill] sm:$0xff] }
 0x4f3   :  { %v1538_v19 = vpop.permute.xlu2 %1537  ;;  %1573 = vrot.lane.b32.xlu1 %v1569_v6, %s2263_s25  ;;  %v1106_v6 = vadd.s32 4294967295, %v3562_v21 }
 0x4f4   :  { %v1540_v14 = vsel %vm138_vm3, %v3673_v32, %v1538_v19 }
 0x4f5   :  { %vm1108_vm12 = vcmp.ge.s32.totalorder %v1106_v6, 0 }
 0x4f7   :  { %1862 = vrot.lane.b32.xlu2 %v1857_v27, %s2316_s11  ;;  %1438 = vrot.lane.b32.xlu0 %v1433_v29, %s2320_s15  ;;  %v1011_v27 = vmul.f32 %v4239_v39, %v1006_v23  ;;  %v2078_v39 = vsel %vm1108_vm12, 1.0, %v4225_v42 }
 0x4f9   :  { %v3696_v46 = vpop.permute.xlu0 %1594  ;;  %v1013_v25 = vadd.f32 %v1011_v27, %v994_v41 }
 0x4fb   :  { %v1568_v31 = vpop.permute.xlu2 %1567 }
 0x4fc   :  { %v1570_v29 = vsel %vm540_vm13, %v1566_v35, %v1568_v31 }
 0x4ff   :  { %1892 = vrot.lane.b32.xlu2 %v1887_v38, %s2317_s12  ;;  %1890 = vrot.lane.b32.xlu0 %v1886_v36, %s2317_s12 }
 0x501   :  { %v1615_v13 = vpop.permute.xlu0 %1614 }
 0x502   :  { %v1618_v30 = vsel %vm592_vm14, %v1613_v55, %v1615_v13  ;;  %v1297_v55 = vpop.permute.xlu1 %1296 }
 0x503   :  { %v1034_v7 = vpop.permute.xlu2 %1033  ;;  %1622 = vrot.lane.b32.xlu1 %v1618_v30, %s2263_s25 }
 0x504   :  { %v1035_v48 = vsel %vm925_vm9, %v3579_v10, %v1034_v7  ;;  %v1036_v16 = vsel %vm925_vm9, %v1034_v7, %v3579_v10 }
 0x505   :  { %v1041_v18 = vmul.f32 %v4240_v54, %v1036_v16  ;;  %v1042_v15 = vmul.f32 %v4240_v54, %v1035_v48 }
 0x507   :  { %v1043_v1 = vadd.f32 %v1041_v18, %v1013_v25  ;;  %v1044_v59 = vadd.f32 %v1042_v15, %v1014_v8  ;;  %1810 = vrot.lane.b32.xlu2 %v3381_v9, %s2321_s16  ;;  %1468 = vrot.lane.b32.xlu0 %v1463_v45, %s2320_s15  ;;  %v4243_v45 = vld [vmem:[#allocation4_spill] sm:$0xff] }
 0x509   :  { %v1645_v47 = vpop.permute.xlu0 %1644 }
 0x50a   :  { %v1648_v12 = vsel %vm623_vm15, %v1643_v52, %v1645_v47  ;;  %v1750_v40 = vpop.permute.xlu1 %1749  ;;  %v1105_v52 = vadd.s32 4294967295, %v3560_v0 }
 0x50b   :  { %v1617_v10 = vpop.permute.xlu2 %1616  ;;  %1652 = vrot.lane.b32.xlu1 %v1648_v12, %s2263_s25  ;;  %v4244_v12 = vld [vmem:[#allocation6_spill] sm:$0xff] }
 0x50c   :  { %vm1107_vm11 = vcmp.ge.s32.totalorder %v1105_v52, 0  ;;  %v1619_v7 = vsel %vm592_vm14, %v1615_v13, %v1617_v10  ;;  %v4245_v52 = vld [vmem:[#allocation8_spill] sm:$0xff] }
 0x50d   :  { %v2077_v36 = vsel %vm1107_vm11, 1.0, %v4225_v42 }
 0x50f   :  { %1514 = vrot.lane.b32.xlu0 %v1509_v63, %s2263_s25 }
 0x511   :  { %v3730_v24 = vpop.permute.xlu0 %1674 }
 0x512   :  { %v1678_v11 = vsel %vm654_vm0, %v1673_v44, %v3730_v24  ;;  %v1328_v44 = vpop.permute.xlu1 %1327 }
 0x513   :  { %v1064_v58 = vpop.permute.xlu2 %1063  ;;  %1682 = vrot.lane.b32.xlu1 %v1678_v11, %s2263_s25 }
 0x514   :  { %v1065_v9 = vsel %vm925_vm9, %v3618_v34, %v1064_v58  ;;  %v1066_v62 = vsel %vm925_vm9, %v1064_v58, %v3618_v34 }
 0x515   :  { %v1071_v17 = vmul.f32 %v4241_v56, %v1066_v62  ;;  %v1072_v50 = vmul.f32 %v4241_v56, %v1065_v9 }
 0x517   :  { %v1073_v53 = vadd.f32 %v1071_v17, %v1043_v1  ;;  %v1074_v51 = vadd.f32 %v1072_v50, %v1044_v59  ;;  %1545 = vrot.lane.b32.xlu0 %v1540_v14, %s2263_s25 }
 0x519   :  { %v1721_v61 = vpop.permute.xlu0 %1720 }
 0x51a   :  { %v1724_v34 = vsel %vm477_vm4, %v1719_v49, %v1721_v61  ;;  %v1780_v13 = vpop.permute.xlu1 %1779 }
 0x51b   :  { %v1647_v41 = vpop.permute.xlu2 %1646  ;;  %1728 = vrot.lane.b32.xlu1 %v1724_v34, %s2321_s16 }
 0x51c   :  { %v1649_v1 = vsel %vm623_vm15, %v1645_v47, %v1647_v41 }
 0x51f   :  { %1575 = vrot.lane.b32.xlu0 %v1570_v29, %s2263_s25 }
 0x521   :  { %v1299_v19 = vpop.permute.xlu0 %1298 }
 0x522   :  { %v1301_v35 = vsel %vm1300_vm10, %v1297_v55, %v1299_v19  ;;  %v1302_v31 = vsel %vm1300_vm10, %v1299_v19, %v1297_v55  ;;  %v1358_v58 = vpop.permute.xlu1 %1357 }
 0x523   :  { %v1094_v32 = vpop.permute.xlu2 %1093  ;;  %v1307_v10 = vmul.f32 %v4243_v45, %v1301_v35 }
 0x524   :  { %v1095_v38 = vsel %vm925_vm9, %v3647_v57, %v1094_v32  ;;  %v1096_v28 = vsel %vm925_vm9, %v1094_v32, %v3647_v57 }
 0x525   :  { %v1101_v5 = vmul.f32 %v4242_v4, %v1096_v28  ;;  %v1102_v23 = vmul.f32 %v4242_v4, %v1095_v38 }
 0x527   :  { %v1103_v27 = vadd.f32 %v1101_v5, %v1073_v53  ;;  %v1104_v43 = vadd.f32 %v1102_v23, %v1074_v51  ;;  %1624 = vrot.lane.b32.xlu0 %v1619_v7, %s2263_s25  ;;  %v1380_v53 = vsel %vm1300_vm10, %v3514_v3, %v3545_v26  ;;  %v2252_v5 = vld [vmem:[%s4051_s3] sm:$0xf]  ;;  %v2323_v7 = vmov 48  }
 0x528   :  { %2224 = vset.pattern.permute.xlu0 %v2323_v7 }
 0x529   :  { %v1117_v48 = vmul.f32 %v2077_v36, %v1103_v27  ;;  %v1118_v57 = vmul.f32 %v2078_v39, %v1104_v43  ;;  %v1752_v8 = vpop.permute.xlu0 %1751 }
 0x52a   :  { %v1755_v54 = vsel %vm138_vm3, %v1750_v40, %v1752_v8  ;;  %v1829_v50 = vpop.permute.xlu1 %1828 }
 0x52b   :  { %v1119_v16 = vadd.f32 %v1117_v48, %v3603_v2  ;;  %v1120_v30 = vadd.f32 %v1118_v57, %v3605_v37  ;;  %v1677_v25 = vpop.permute.xlu2 %1676  ;;  %1759 = vrot.lane.b32.xlu2 %v1755_v54, %s2321_s16 }
 0x52c   :  { %v1679_v9 = vsel %vm654_vm0, %v3730_v24, %v1677_v25  ;;  %v1381_v24 = vsel %vm1300_vm10, %v3545_v26, %v3514_v3  ;;  %v2322_v3 = vmov 41   ;;  %v4246_v26 = vld [vmem:[#allocation10_spill] sm:$0xff] }
 0x52d   :  { %v3774_v18 = vadd.f32 %v3508_v60, %v1120_v30  ;;  %v3777_v15 = vadd.f32 %v3551_v33, %v1119_v16  ;;  %v1308_v60 = vmul.f32 %v4243_v45, %v1302_v31  ;;  %2222 = vset.pattern.permute.xlu1 %v2322_v3  ;;  %v1386_v32 = vmul.f32 %v4246_v26, %v1380_v53  ;;  %v4247_v30 = vld [vmem:[#allocation12_spill] sm:$0xff] }
 0x52e   :  { %v1387_v19 = vmul.f32 %v4246_v26, %v1381_v24  ;;  %v1481_v53 = vadd.s32 1, %v3562_v21 }
 0x52f   :  { %1654 = vrot.lane.b32.xlu0 %v1649_v1, %s2263_s25 }
 0x531   :  { %v1330_v59 = vpop.permute.xlu0 %1329 }
 0x532   :  { %v1331_v37 = vsel %vm1300_vm10, %v1328_v44, %v1330_v59  ;;  %v1332_v49 = vsel %vm1300_vm10, %v1330_v59, %v1328_v44  ;;  %v1407_v31 = vpop.permute.xlu1 %1406 }
 0x533   :  { %v1723_v2 = vpop.permute.xlu2 %1722  ;;  %v1337_v33 = vmul.f32 %v4244_v12, %v1331_v37  ;;  %v1338_v63 = vmul.f32 %v4244_v12, %v1332_v49 }
 0x534   :  { %v1725_v17 = vsel %vm477_vm4, %v1721_v61, %v1723_v2  ;;  %vm1485_vm4 = vcmp.lt.s32.totalorder %v1481_v53, 16  ;;  %v1697_v53 = vadd.s32 2, %v3562_v21 }
 0x535   :  { %v1339_v55 = vadd.f32 %v1337_v33, %v1307_v10  ;;  %v1340_v47 = vadd.f32 %v1338_v63, %v1308_v60  ;;  %v4248_v33 = vld [vmem:[#allocation14_spill] sm:$0xff] }
 0x537   :  { %1684 = vrot.lane.b32.xlu0 %v1679_v9, %s2263_s25 }
 0x539   :  { %v1782_v11 = vpop.permute.xlu0 %1781 }
 0x53a   :  { %v1785_v40 = vsel %vm540_vm13, %v1780_v13, %v1782_v11  ;;  %v1859_v39 = vpop.permute.xlu1 %1858 }
 0x53b   :  { %v1754_v62 = vpop.permute.xlu2 %1753 }
 0x53c   :  { %v1756_v56 = vsel %vm138_vm3, %v1752_v8, %v1754_v62 }
 0x53d   :  { %1761 = vrot.lane.b32.xlu1 %v1756_v56, %s2321_s16 }
 0x53f   :  { %1730 = vrot.lane.b32.xlu0 %v1725_v17, %s2321_s16 }
 0x541   :  { %v1360_v14 = vpop.permute.xlu0 %1359 }
 0x542   :  { %v1361_v61 = vsel %vm1300_vm10, %v1358_v58, %v1360_v14  ;;  %v1362_v34 = vsel %vm1300_vm10, %v1360_v14, %v1358_v58  ;;  %v1437_v54 = vpop.permute.xlu1 %1436 }
 0x543   :  { %v1784_v51 = vpop.permute.xlu2 %1783  ;;  %v1367_v6 = vmul.f32 %v4245_v52, %v1361_v61  ;;  %v1368_v29 = vmul.f32 %v4245_v52, %v1362_v34 }
 0x544   :  { %v1786_v41 = vsel %vm540_vm13, %v1782_v11, %v1784_v51  ;;  %vm1516_vm13 = vcmp.lt.s32.totalorder %v3198_v22, 126 }
 0x545   :  { %1791 = vrot.lane.b32.xlu2 %v1786_v41, %s2321_s16  ;;  %1789 = vrot.lane.b32.xlu1 %v1785_v40, %s2321_s16  ;;  %v1369_v44 = vadd.f32 %v1367_v6, %v1339_v55  ;;  %v1370_v38 = vadd.f32 %v1368_v29, %v1340_v47  ;;  %v4249_v41 = vld [vmem:[#allocation16_spill] sm:$0xff]  ;;  %v2080_v6 = vsel %vm1485_vm4, 1.0, %v4225_v42 }
 0x547   :  { %v1388_v28 = vadd.f32 %v1386_v32, %v1369_v44  ;;  %v1389_v35 = vadd.f32 %v1387_v19, %v1370_v38 }
 0x549   :  { %v3816_v4 = vpop.permute.xlu0 %1808 }
 0x54a   :  { %v1889_v45 = vpop.permute.xlu1 %1888 }
 0x54b   :  { %v1833_v23 = vpop.permute.xlu2 %1832 }
 0x54d   :  { %1875 = vperm.xlu1 %2222, %v2252_v5  }
 0x551   :  { %v1831_v36 = vpop.permute.xlu0 %1830 }
 0x552   :  { %v1834_v27 = vsel %vm592_vm14, %v1829_v50, %v1831_v36  ;;  %v1835_v43 = vsel %vm592_vm14, %v1831_v36, %v1833_v23  ;;  %v1467_v9 = vpop.permute.xlu1 %1466  ;;  %v1480_v50 = vadd.s32 1, %v3560_v0 }
 0x553   :  { %1840 = vrot.lane.b32.xlu2 %v1835_v43, %s2321_s16  ;;  %1838 = vrot.lane.b32.xlu0 %v1834_v27, %s2321_s16  ;;  %v1863_v2 = vpop.permute.xlu2 %1862  ;;  %v4251_v43 = vld [vmem:[#allocation18_spill] sm:$0xff] }
 0x554   :  { %vm1484_vm3 = vcmp.lt.s32.totalorder %v1480_v50, 16  ;;  %v1696_v50 = vadd.s32 2, %v3560_v0 }
 0x555   :  { %2223 = vset.pattern.permute.xlu1 %v2323_v7  ;;  %v2079_v52 = vsel %vm1484_vm3, 1.0, %v4225_v42 }
 0x556   :  { %1905 = vperm.xlu1 %2223, %v2252_v5   ;;  %vm1700_vm14 = vcmp.lt.s32.totalorder %v1696_v50, 16  ;;  %v4260_v50 = vld [vmem:[#allocation49_spill] sm:$0xff] }
 0x559   :  { %v1409_v48 = vpop.permute.xlu0 %1408 }
 0x55a   :  { %v1410_v57 = vsel %vm1300_vm10, %v1407_v31, %v1409_v48  ;;  %v1411_v16 = vsel %vm1300_vm10, %v1409_v48, %v1407_v31  ;;  %v1513_v24 = vpop.permute.xlu1 %1512 }
 0x55b   :  { %v1416_v25 = vmul.f32 %v4247_v30, %v1410_v57  ;;  %v1417_v8 = vmul.f32 %v4247_v30, %v1411_v16  ;;  %v1893_v62 = vpop.permute.xlu2 %1892  ;;  %v1596_v16 = vsel %vm1516_vm13, %v3659_v20, %v3696_v46  ;;  %v1597_v30 = vsel %vm1516_vm13, %v3696_v46, %v3659_v20 }
 0x55d   :  { %v1418_v13 = vadd.f32 %v1416_v25, %v1388_v28  ;;  %v1419_v1 = vadd.f32 %v1417_v8, %v1389_v35 }
 0x561   :  { %v1861_v59 = vpop.permute.xlu0 %1860 }
 0x562   :  { %v1864_v37 = vsel %vm623_vm15, %v1859_v39, %v1861_v59  ;;  %v1865_v49 = vsel %vm623_vm15, %v1861_v59, %v1863_v2  ;;  %v1544_v28 = vpop.permute.xlu1 %1543  ;;  %v4250_v39 = vld [vmem:[#allocation20_spill] sm:$0xff]  ;;  %vm1701_vm15 = vcmp.lt.s32.totalorder %v1697_v53, 16 }
 0x563   :  { %1870 = vrot.lane.b32.xlu2 %v1865_v49, %s2321_s16  ;;  %1868 = vrot.lane.b32.xlu0 %v1864_v37, %s2321_s16  ;;  %v4253_v37 = vld [vmem:[#allocation24_spill] sm:$0xff] }
 0x564   :  { %v1602_v49 = vmul.f32 %v4253_v37, %v1596_v16 }
 0x569   :  { %v1439_v10 = vpop.permute.xlu0 %1438 }
 0x56a   :  { %v1440_v60 = vsel %vm1300_vm10, %v1437_v54, %v1439_v10  ;;  %v1441_v12 = vsel %vm1300_vm10, %v1439_v10, %v1437_v54  ;;  %v1574_v23 = vpop.permute.xlu1 %1573 }
 0x56b   :  { %v1446_v63 = vmul.f32 %v4248_v33, %v1440_v60  ;;  %v1447_v55 = vmul.f32 %v4248_v33, %v1441_v12 }
 0x56d   :  { %v1448_v47 = vadd.f32 %v1446_v63, %v1418_v13  ;;  %v1449_v58 = vadd.f32 %v1447_v55, %v1419_v1  ;;  %v4252_v1 = vld [vmem:[#allocation22_spill] sm:$0xff] }
 0x571   :  { %v1891_v11 = vpop.permute.xlu0 %1890 }
 0x572   :  { %v1894_v56 = vsel %vm654_vm0, %v1889_v45, %v1891_v11  ;;  %v1895_v17 = vsel %vm654_vm0, %v1891_v11, %v1893_v62  ;;  %v1603_v45 = vmul.f32 %v4253_v37, %v1597_v30  ;;  %v4254_v11 = vld [vmem:[#allocation26_spill] sm:$0xff]  ;;  %vm1732_vm0 = vcmp.lt.s32.totalorder %v3198_v22, 125 }
 0x573   :  { %1900 = vrot.lane.b32.xlu2 %v1895_v17, %s2321_s16  ;;  %1898 = vrot.lane.b32.xlu0 %v1894_v56, %s2321_s16 }
 0x575   :  { %v1623_v10 = vpop.permute.xlu1 %1622 }
 0x579   :  { %v1469_v51 = vpop.permute.xlu0 %1468 }
 0x57a   :  { %v1470_v14 = vsel %vm1300_vm10, %v1467_v9, %v1469_v51  ;;  %v1471_v40 = vsel %vm1300_vm10, %v1469_v51, %v1467_v9 }
 0x57b   :  { %v1476_v61 = vmul.f32 %v4249_v41, %v1470_v14  ;;  %v1477_v34 = vmul.f32 %v4249_v41, %v1471_v40 }
 0x57d   :  { %v1478_v29 = vadd.f32 %v1476_v61, %v1448_v47  ;;  %v1479_v3 = vadd.f32 %v1477_v34, %v1449_v58  ;;  %v1653_v63 = vpop.permute.xlu1 %1652 }
 0x57f   :  { %v1492_v26 = vmul.f32 %v2079_v52, %v1478_v29  ;;  %v1493_v32 = vmul.f32 %v2080_v6, %v1479_v3 }
 0x581   :  { %v3856_v19 = vadd.f32 %v1492_v26, %v3777_v15  ;;  %v1495_v44 = vadd.f32 %v1493_v32, %v3774_v18  ;;  %v1515_v38 = vpop.permute.xlu0 %1514  ;;  %v4256_v26 = vld [vmem:[#allocation30_spill] sm:$0xff] }
 0x582   :  { %v1517_v36 = vsel %vm1516_vm13, %v1513_v24, %v1515_v38  ;;  %v1518_v15 = vsel %vm1516_vm13, %v1515_v38, %v1513_v24  ;;  %v4255_v24 = vld [vmem:[#allocation28_spill] sm:$0xff] }
 0x583   :  { %v1523_v7 = vmul.f32 %v4251_v43, %v1517_v36  ;;  %v1524_v48 = vmul.f32 %v4251_v43, %v1518_v15 }
 0x585   :  { %v1683_v40 = vpop.permute.xlu1 %1682 }
 0x589   :  { %v1546_v35 = vpop.permute.xlu0 %1545 }
 0x58a   :  { %v1547_v31 = vsel %vm1516_vm13, %v1544_v28, %v1546_v35  ;;  %v1548_v5 = vsel %vm1516_vm13, %v1546_v35, %v1544_v28  ;;  %v2081_v28 = vsel %vm1700_vm14, 1.0, %v4225_v42  ;;  %v2082_v35 = vsel %vm1701_vm15, 1.0, %v4225_v42 }
 0x58b   :  { %v1553_v18 = vmul.f32 %v4250_v39, %v1547_v31  ;;  %v1554_v27 = vmul.f32 %v4250_v39, %v1548_v5 }
 0x58d   :  { %v1555_v54 = vadd.f32 %v1553_v18, %v1523_v7  ;;  %v1556_v13 = vadd.f32 %v1554_v27, %v1524_v48  ;;  %v1811_v18 = vpop.permute.xlu2 %1810  ;;  %v1729_v27 = vpop.permute.xlu1 %1728 }
 0x591   :  { %v1576_v57 = vpop.permute.xlu0 %1575 }
 0x592   :  { %v1577_v25 = vsel %vm1516_vm13, %v1574_v23, %v1576_v57  ;;  %v1578_v8 = vsel %vm1516_vm13, %v1576_v57, %v1574_v23 }
 0x593   :  { %v1583_v2 = vmul.f32 %v4252_v1, %v1577_v25  ;;  %v1584_v59 = vmul.f32 %v4252_v1, %v1578_v8 }
 0x595   :  { %v1585_v60 = vadd.f32 %v1583_v2, %v1555_v54  ;;  %v1586_v12 = vadd.f32 %v1584_v59, %v1556_v13  ;;  %v1760_v43 = vpop.permute.xlu2 %1759  ;;  %v4257_v2 = vld [vmem:[#allocation35_spill] sm:$0xff] }
 0x597   :  { %v1604_v20 = vadd.f32 %v1602_v49, %v1585_v60  ;;  %v1605_v46 = vadd.f32 %v1603_v45, %v1586_v12  ;;  %v4258_v49 = vld [vmem:[#allocation31_spill] sm:$0xff]  ;;  %v4259_v60 = vld [vmem:[#allocation36_spill] sm:$0xff] }
 0x599   :  { %v1625_v33 = vpop.permute.xlu0 %1624 }
 0x59a   :  { %v1626_v47 = vsel %vm1516_vm13, %v1623_v10, %v1625_v33  ;;  %v1627_v58 = vsel %vm1516_vm13, %v1625_v33, %v1623_v10  ;;  %v1812_v33 = vsel %vm1732_vm0, %v3816_v4, %v1811_v18 }
 0x59b   :  { %v1632_v56 = vmul.f32 %v4254_v11, %v1626_v47  ;;  %v1633_v17 = vmul.f32 %v4254_v11, %v1627_v58  ;;  %v1818_v53 = vmul.f32 %v4260_v50, %v1812_v33 }
 0x59d   :  { %v1634_v41 = vadd.f32 %v1632_v56, %v1604_v20  ;;  %v1635_v61 = vadd.f32 %v1633_v17, %v1605_v46 }
 0x59f   :  { %v1792_v48 = vpop.permute.xlu2 %1791 }
 0x5a1   :  { %v1655_v55 = vpop.permute.xlu0 %1654 }
 0x5a2   :  { %v1656_v9 = vsel %vm1516_vm13, %v1653_v63, %v1655_v55  ;;  %v1657_v62 = vsel %vm1516_vm13, %v1655_v55, %v1653_v63  ;;  %v1813_v63 = vsel %vm1732_vm0, %v1811_v18, %v3816_v4 }
 0x5a3   :  { %v1662_v51 = vmul.f32 %v4255_v24, %v1656_v9  ;;  %v1663_v14 = vmul.f32 %v4255_v24, %v1657_v62  ;;  %v1819_v24 = vmul.f32 %v4260_v50, %v1813_v63 }
 0x5a5   :  { %v1664_v29 = vadd.f32 %v1662_v51, %v1634_v41  ;;  %v1665_v3 = vadd.f32 %v1663_v14, %v1635_v61  ;;  %v4261_v14 = vld [vmem:[#allocation50_spill] sm:$0xff]  ;;  %v1912_v61 = vadd.s32 3, %v3560_v0 }
 0x5a7   :  { %vm1916_vm1 = vcmp.lt.s32.totalorder %v1912_v61, 16  ;;  %v2256_v61 = vld [vmem:[%s4050_s0 + $0x18] sm:$0xff] }
 0x5a8   :  { %v2083_v18 = vsel %vm1916_vm1, 1.0, %v4225_v42 }
 0x5a9   :  { %v1685_v34 = vpop.permute.xlu0 %1684 }
 0x5aa   :  { %v1686_v52 = vsel %vm1516_vm13, %v1683_v40, %v1685_v34  ;;  %v1687_v6 = vsel %vm1516_vm13, %v1685_v34, %v1683_v40  ;;  %v1913_v34 = vadd.s32 3, %v3562_v21 }
 0x5ab   :  { %v1692_v32 = vmul.f32 %v4256_v26, %v1686_v52  ;;  %v1693_v38 = vmul.f32 %v4256_v26, %v1687_v6 }
 0x5ac   :  { %vm1917_vm2 = vcmp.lt.s32.totalorder %v1913_v34, 16 }
 0x5ad   :  { %v1694_v31 = vadd.f32 %v1692_v32, %v1664_v29  ;;  %v1695_v5 = vadd.f32 %v1693_v38, %v1665_v3  ;;  %v1841_v30 = vpop.permute.xlu2 %1840 }
 0x5af   :  { %v1708_v23 = vmul.f32 %v2081_v28, %v1694_v31  ;;  %v1709_v36 = vmul.f32 %v2082_v35, %v1695_v5  ;;  %v1762_v7 = vpop.permute.xlu1 %1761 }
 0x5b0   :  { %v1764_v54 = vsel %vm1732_vm0, %v1762_v7, %v1760_v43 }
 0x5b1   :  { %v3910_v15 = vadd.f32 %v1709_v36, %v1495_v44  ;;  %v3913_v39 = vadd.f32 %v1708_v23, %v3856_v19  ;;  %v1731_v57 = vpop.permute.xlu0 %1730  ;;  %v1763_v19 = vsel %vm1732_vm0, %v1760_v43, %v1762_v7  ;;  %v1770_v10 = vmul.f32 %v4258_v49, %v1764_v54 }
 0x5b2   :  { %v1733_v8 = vsel %vm1732_vm0, %v1729_v27, %v1731_v57  ;;  %v1734_v44 = vsel %vm1732_vm0, %v1731_v57, %v1729_v27  ;;  %v1769_v45 = vmul.f32 %v4258_v49, %v1763_v19  ;;  %v2084_v27 = vsel %vm1917_vm2, 1.0, %v4225_v42 }
 0x5b3   :  { %v1739_v59 = vmul.f32 %v4257_v2, %v1733_v8  ;;  %v1740_v37 = vmul.f32 %v4257_v2, %v1734_v44 }
 0x5b5   :  { %v1771_v55 = vadd.f32 %v1769_v45, %v1739_v59  ;;  %v1772_v47 = vadd.f32 %v1770_v10, %v1740_v37 }
 0x5b7   :  { %v1790_v16 = vpop.permute.xlu1 %1789 }
 0x5b8   :  { %v1793_v13 = vsel %vm1732_vm0, %v1790_v16, %v1792_v48  ;;  %v1794_v1 = vsel %vm1732_vm0, %v1792_v48, %v1790_v16 }
 0x5b9   :  { %v1799_v12 = vmul.f32 %v4259_v60, %v1793_v13  ;;  %v1800_v20 = vmul.f32 %v4259_v60, %v1794_v1 }
 0x5bb   :  { %v1801_v56 = vadd.f32 %v1799_v12, %v1771_v55  ;;  %v1802_v17 = vadd.f32 %v1800_v20, %v1772_v47 }
 0x5bd   :  { %v1871_v58 = vpop.permute.xlu2 %1870  ;;  %v1820_v52 = vadd.f32 %v1818_v53, %v1801_v56  ;;  %v1821_v6 = vadd.f32 %v1819_v24, %v1802_v17  ;;  %v2253_v56 = vld [vmem:[%s4050_s0] sm:$0xff]  ;;  %v2254_v53 = vld [vmem:[%s4050_s0 + $0x10] sm:$0xff] }
 0x5be   :  { %v4262_v17 = vld [vmem:[#allocation32_spill] sm:$0xff]  ;;  %v4263_v24 = vld [vmem:[#allocation38_spill] sm:$0xff] }
 0x5bf   :  { %v1876_v46 = vpop.permute.xlu1 %1875  ;;  %v1982_v50 = vmul.f32 %v2253_v56, %v4262_v17  ;;  %v1985_v34 = vmul.f32 %v2256_v61, %v4263_v24 }
 0x5c5   :  { %v1839_v25 = vpop.permute.xlu0 %1838 }
 0x5c6   :  { %v1842_v62 = vsel %vm1732_vm0, %v1839_v25, %v1841_v30  ;;  %v1843_v11 = vsel %vm1732_vm0, %v1841_v30, %v1839_v25 }
 0x5c7   :  { %v1848_v40 = vmul.f32 %v4261_v14, %v1842_v62  ;;  %v1849_v41 = vmul.f32 %v4261_v14, %v1843_v11 }
 0x5c8   :  { %v1906_v26 = vpop.permute.xlu1 %1905 }
 0x5c9   :  { %v1850_v32 = vadd.f32 %v1848_v40, %v1820_v52  ;;  %v1851_v38 = vadd.f32 %v1849_v41, %v1821_v6  ;;  %v2255_v40 = vld [vmem:[%s4050_s0 + $0x8] sm:$0xff]  ;;  %v2257_v6 = vld [vmem:[%s4050_s0 + $0x20] sm:$0xff] }
 0x5ca   :  { %v1983_v41 = vmul.f32 %v2255_v40, %v4262_v17 }
 0x5cd   :  { %v1901_v28 = vpop.permute.xlu2 %1900 }
 0x5d5   :  { %v1869_v9 = vpop.permute.xlu0 %1868 }
 0x5d6   :  { %v1872_v51 = vsel %vm1732_vm0, %v1869_v9, %v1871_v58  ;;  %v1873_v4 = vsel %vm1732_vm0, %v1871_v58, %v1869_v9 }
 0x5d7   :  { %v1878_v29 = vmul.f32 %v1876_v46, %v1872_v51  ;;  %v1879_v3 = vmul.f32 %v1876_v46, %v1873_v4  ;;  %v1984_v51 = vmul.f32 %v2254_v53, %v4263_v24 }
 0x5d9   :  { %v1880_v0 = vadd.f32 %v1878_v29, %v1850_v32  ;;  %v1881_v23 = vadd.f32 %v1879_v3, %v1851_v38  ;;  %v4264_v29 = vld [vmem:[#allocation37_spill] sm:$0xff] }
 0x5da   :  { %v1986_v3 = vmul.f32 %v2257_v6, %v4264_v29  ;;  %v2258_v38 = vld [vmem:[%s4050_s0 + $0x28] sm:$0xff] }
 0x5e5   :  { %v1899_v35 = vpop.permute.xlu0 %1898 }
 0x5e6   :  { %v1902_v31 = vsel %vm1732_vm0, %v1899_v35, %v1901_v28  ;;  %v1903_v5 = vsel %vm1732_vm0, %v1901_v28, %v1899_v35  ;;  %v1987_v28 = vmul.f32 %v2258_v38, %v4264_v29 }
 0x5e7   :  { %v1908_v21 = vmul.f32 %v1906_v26, %v1902_v31  ;;  %v1909_v36 = vmul.f32 %v1906_v26, %v1903_v5  ;;  %v2259_v5 = vld [vmem:[%s4050_s0 + $0x30] sm:$0xff] }
 0x5e9   :  { %v1910_v43 = vadd.f32 %v1908_v21, %v1880_v0  ;;  %v1911_v7 = vadd.f32 %v1909_v36, %v1881_v23  ;;  %v4265_v0 = vld [vmem:[#allocation39_spill] sm:$0xff] }
 0x5ea   :  { %v1988_v23 = vmul.f32 %v2259_v5, %v4265_v0 }
 0x5eb   :  { %v1924_v48 = vmul.f32 %v2083_v18, %v1910_v43  ;;  %v1925_v57 = vmul.f32 %v2084_v27, %v1911_v7  ;;  %v2260_v18 = vld [vmem:[%s4050_s0 + $0x38] sm:$0xff] }
 0x5ec   :  { %v1989_v27 = vmul.f32 %v2260_v18, %v4265_v0 }
 0x5ed   :  { %v1926_v16 = vadd.f32 %v1924_v48, %v3913_v39  ;;  %v1927_v30 = vadd.f32 %v1925_v57, %v3910_v15 }
 0x5ef   :  { %v1930_v25 = vrot.slane %v1926_v16, 2  ;;  %v1931_v8 = vrot.slane %v1927_v30, 2 }
 0x5f1   :  { %v1934_v22 = vadd.f32 %v1930_v25, %v1926_v16  ;;  %v1935_v44 = vadd.f32 %v1931_v8, %v1927_v30  ;;  %v4266_v16 = vld [vmem:[#allocation42_spill] sm:$0xff]  ;;  %v4267_v25 = vld [vmem:[#allocation43_spill] sm:$0xff] }
 0x5f3   :  { %v2085_v19 = vmul.f32 -1.442695, %v1934_v22  ;;  %v2086_v54 = vmul.f32 -1.442695, %v1935_v44  ;;  %v4268_v22 = vld [vmem:[#allocation40_spill] sm:$0xff] }
 0x5f5   :  { %2243 = vpow2.f32 %v2085_v19  ;;  %v4269_v19 = vld [vmem:[#allocation41_spill] sm:$0xff] }
 0x5f6   :  { %2245 = vpow2.f32 %v2086_v54 }
 0x5fb   :  { %v2244_v13 = vpop.eup %2243 }
 0x5fc   :  { %v2246_v1 = vpop.eup %2245  ;;  %v1942_v2 = vadd.f32 1.0, %v2244_v13  ;;  %v4270_v13 = vld [vmem:[#allocation44_spill] sm:$0xff] }
 0x5fd   :  { %v1943_v42 = vadd.f32 1.0, %v2246_v1 }
 0x5fe   :  { %2247 = vrcp.f32 %v1942_v2  ;;  %v1955_v15 = vand.u32 2147483648, %v1942_v2  ;;  %v1953_v12 = vand.u32 2147483647, %v1942_v2  ;;  %vm1949_vm7 = vweird.f32 %v1942_v2 }
 0x5ff   :  { %2249 = vrcp.f32 %v1943_v42  ;;  %v1970_v20 = vand.u32 2147483648, %v1943_v42  ;;  %v1968_v33 = vand.u32 2147483647, %v1943_v42  ;;  %vm1964_vm9 = vweird.f32 %v1943_v42 }
 0x600   :  { %v1956_v55 = vor.u32 1.1754944e-38, %v1955_v15  ;;  %vm1954_vm10 = vcmp.eq.f32.partialorder %v1953_v12, 8.507059e+37 }
 0x601   :  { %v1971_v9 = vor.u32 1.1754944e-38, %v1970_v20  ;;  %vm1969_vm12 = vcmp.eq.f32.partialorder %v1968_v33, 8.507059e+37 }
 0x604   :  { %v2248_v59 = vpop.eup %2247 }
 0x605   :  { %v2250_v37 = vpop.eup %2249  ;;  %v1945_v49 = vmul.f32 %v2248_v59, %v1942_v2  ;;  %vm1950_vm5 = vweird.f32 %v2248_v59  ;;  %v4271_v2 = vld [vmem:[#allocation45_spill] sm:$0xff] }
 0x606   :  { %v1960_v39 = vmul.f32 %v2250_v37, %v1943_v42  ;;  %vm1965_vm6 = vweird.f32 %v2250_v37  ;;  %vm1951_vm8 = vmor %vm1949_vm7, %vm1950_vm5 }
 0x607   :  { %v1946_v45 = vsub.f32 1.0, %v1945_v49  ;;  %vm1966_vm11 = vmor %vm1964_vm9, %vm1965_vm6  ;;  %v4273_v49 = vld [vmem:[#allocation47_spill] sm:$0xff] }
 0x608   :  { %v1961_v10 = vsub.f32 1.0, %v1960_v39 }
 0x609   :  { %v1947_v60 = vmul.f32 %v2248_v59, %v1946_v45 }
 0x60a   :  { %v1962_v46 = vmul.f32 %v2250_v37, %v1961_v10 }
 0x60b   :  { %v1948_v63 = vadd.f32 %v2248_v59, %v1947_v60 }
 0x60c   :  { %v1963_v47 = vadd.f32 %v2250_v37, %v1962_v46 }
 0x60d   :  { %v1952_v58 = vsel %vm1951_vm8, %v2248_v59, %v1948_v63  ;;  %v4272_v59 = vld [vmem:[#allocation46_spill] sm:$0xff] }
 0x60e   :  { %v1957_v62 = vsel %vm1954_vm10, %v1956_v55, %v1952_v58  ;;  %v1967_v11 = vsel %vm1966_vm11, %v2250_v37, %v1963_v47 }
 0x60f   :  { %v1972_v4 = vsel %vm1969_vm12, %v1971_v9, %v1967_v11  ;;  %v1990_v14 = vperm.slane %v1957_v62, 0  ;;  %v2024_v36 = vperm.slane %v1957_v62, 1 }
 0x610   :  { %v1991_v52 = vperm.slane %v1972_v4, 0  ;;  %v2025_v7 = vperm.slane %v1972_v4, 1 }
 0x611   :  { %v1992_v26 = vmul.f32 %v1990_v14, %v1982_v50  ;;  %v1994_v32 = vmul.f32 %v1990_v14, %v1984_v51  ;;  %v1996_v21 = vmul.f32 %v1990_v14, %v1986_v3  ;;  %v1998_v48 = vmul.f32 %v1990_v14, %v1988_v23 }
 0x612   :  { %v1993_v35 = vmul.f32 %v1991_v52, %v1983_v41  ;;  %v1995_v31 = vmul.f32 %v1991_v52, %v1985_v34  ;;  %v1997_v43 = vmul.f32 %v1991_v52, %v1987_v28  ;;  %v1999_v57 = vmul.f32 %v1991_v52, %v1989_v27 }
 0x613   :  { %2000 = vst [vmem:[%s4054_s4] sm:$0xff] %v1992_v26  ;;  %v2026_v30 = vmul.f32 %v2024_v36, %v4266_v16  ;;  %v2027_v8 = vmul.f32 %v2025_v7, %v4267_v25  ;;  %v2028_v44 = vmul.f32 %v2024_v36, %v4268_v22  ;;  %v2029_v54 = vmul.f32 %v2025_v7, %v4269_v19 }
 0x614   :  { %2001 = vst [vmem:[%s4054_s4 + $0x8] sm:$0xff] %v1993_v35  ;;  %v2030_v1 = vmul.f32 %v2024_v36, %v4270_v13  ;;  %v2031_v42 = vmul.f32 %v2025_v7, %v4271_v2  ;;  %v2032_v37 = vmul.f32 %v2024_v36, %v4272_v59  ;;  %v2033_v39 = vmul.f32 %v2025_v7, %v4273_v49 }
 0x615   :  { %2002 = vst [vmem:[%s4054_s4 + $0x10] sm:$0xff] %v1994_v32 }
 0x616   :  { %2003 = vst [vmem:[%s4054_s4 + $0x18] sm:$0xff] %v1995_v31 }
 0x617   :  { %2004 = vst [vmem:[%s4054_s4 + $0x20] sm:$0xff] %v1996_v21 }
 0x618   :  { %2005 = vst [vmem:[%s4054_s4 + $0x28] sm:$0xff] %v1997_v43 }
 0x619   :  { %2006 = vst [vmem:[%s4054_s4 + $0x30] sm:$0xff] %v1998_v48 }
 0x61a   :  { %2007 = vst [vmem:[%s4054_s4 + $0x38] sm:$0xff] %v1999_v57 }
 0x61b   :  { %2095 = vst [vmem:[%s4054_s4 + $0x40] sm:$0xff] %v2026_v30 }
 0x61c   :  { %2096 = vst [vmem:[%s4054_s4 + $0x48] sm:$0xff] %v2027_v8 }
 0x61d   :  { %2097 = vst [vmem:[%s4054_s4 + $0x50] sm:$0xff] %v2028_v44 }
 0x61e   :  { %2098 = vst [vmem:[%s4054_s4 + $0x58] sm:$0xff] %v2029_v54 }
 0x61f   :  { %2099 = vst [vmem:[%s4054_s4 + $0x60] sm:$0xff] %v2030_v1 }
 0x620   :  { %2100 = vst [vmem:[%s4054_s4 + $0x68] sm:$0xff] %v2031_v42 }
 0x621   :  { %2101 = vst [vmem:[%s4054_s4 + $0x70] sm:$0xff] %v2032_v37 }
 0x622   :  { %2102 = vst [vmem:[%s4054_s4 + $0x78] sm:$0xff] %v2033_v39 }

</bundles_post_ra>
